<compile_context>
chip_gen: v6e
topology: v6e:2x2x1
jax: 0.10.0
libtpu: 0.0.40
codegen_flags: <defaults>
</compile_context>

<pallas_src>
import functools

import jax
import jax.numpy as jnp
import numpy as np
from jax.experimental import pallas as pl
from jax.experimental.pallas import tpu as pltpu


def _bilateral_tap_loop(g2d_ref, x_ref, g_ref, out_ref, *, K, Ho, Wo,
                        inv_sigma_guide, shared_guide):
    """x_ref: (1, C, Hp, Wp) padded value block; g_ref: (1, Cg, Hp, Wp) or None."""
    f32 = jnp.float32
    c = K // 2

    # Center tap of the guide (output-aligned window).
    if shared_guide:
        center = x_ref[0, :, c:c + Ho, c:c + Wo].astype(f32)
    else:
        center = g_ref[0, :, c:c + Ho, c:c + Wo].astype(f32)
    if inv_sigma_guide != 1.0:
        center = center * f32(inv_sigma_guide)

    C = x_ref.shape[1]
    acc = jnp.zeros((C, Ho, Wo), f32)
    norm = jnp.zeros((1, Ho, Wo), f32)

    for ky in range(K):
        for kx in range(K):
            xs = x_ref[0, :, ky:ky + Ho, kx:kx + Wo].astype(f32)
            if shared_guide:
                gs = xs if inv_sigma_guide == 1.0 else xs * f32(inv_sigma_guide)
            else:
                gs = g_ref[0, :, ky:ky + Ho, kx:kx + Wo].astype(f32)
                if inv_sigma_guide != 1.0:
                    gs = gs * f32(inv_sigma_guide)
            d2 = jnp.sum((gs - center) ** 2, axis=0, keepdims=True)   # (1,Ho,Wo)
            w = jnp.exp(-0.5 * d2) * g2d_ref[ky, kx]                  # (1,Ho,Wo)
            norm = norm + w
            acc = acc + xs * w

    # norm == 0 -> divide by 1 (matches `norm + empty_mask` in the module).
    denom = norm + (norm == 0.0).astype(f32)
    out_ref[0] = (acc / denom).astype(out_ref.dtype)


def _kernel_shared(g2d_ref, x_ref, out_ref, *, K, Ho, Wo, inv_sigma_guide):
    _bilateral_tap_loop(g2d_ref, x_ref, None, out_ref, K=K, Ho=Ho, Wo=Wo,
                        inv_sigma_guide=inv_sigma_guide, shared_guide=True)


def _kernel_guided(g2d_ref, x_ref, g_ref, out_ref, *, K, Ho, Wo, inv_sigma_guide):
    _bilateral_tap_loop(g2d_ref, x_ref, g_ref, out_ref, K=K, Ho=Ho, Wo=Wo,
                        inv_sigma_guide=inv_sigma_guide, shared_guide=False)


def bilateral_filter(x, input_for_kernel=None, *, kernel_size, stride=1,
                     sigma_for_kernel=None, sigma_for_guide=1.0):
    """Forward pass of BilateralFilter(kernel_size, stride)."""
    assert kernel_size % 2 == 1
    K = int(kernel_size)
    pad = K // 2
    if sigma_for_kernel is None:
        sigma_for_kernel = float(K) / 4.0      # Parameter init value in the module

    B, C, H, W = x.shape
    out_dtype = x.dtype

    # gaussian_2d_kernel(sigma): truncated, normalized to sum 1.
    sig2 = float(sigma_for_kernel) ** 2
    r = jnp.arange(-pad, pad + 1, dtype=jnp.float32)
    g1 = jnp.exp(-0.5 * r * r / sig2)
    g2 = g1[:, None] * g1[None, :]
    g2 = (g2 / jnp.sum(g2)).astype(jnp.float32)              # (K, K)

    # Zero padding identical to F.unfold(padding=K//2); stride-1 output == (H, W).
    xpad = jnp.pad(x.astype(jnp.float32),
                   ((0, 0), (0, 0), (pad, pad), (pad, pad)))
    Hp, Wp = H + 2 * pad, W + 2 * pad
    Ho, Wo = Hp - K + 1, Wp - K + 1                           # == H, W

    inv_sig = 1.0 / float(sigma_for_guide)
    smem_spec = pl.BlockSpec(memory_space=pltpu.MemorySpace.SMEM)

    if input_for_kernel is None:
        # Guide shares the value stream -> only one big HBM input.
        Cg = C
        kernel_fn = functools.partial(_kernel_shared, K=K, Ho=Ho, Wo=Wo,
                                      inv_sigma_guide=inv_sig)
        in_specs = [smem_spec,
                    pl.BlockSpec((1, C, Hp, Wp), lambda b: (b, 0, 0, 0))]
        operands = (g2, xpad)
        in_bytes = int(g2.size + xpad.size) * 4
    else:
        gin = input_for_kernel.astype(jnp.float32)
        Cg = gin.shape[1]
        gpad = jnp.pad(gin, ((0, 0), (0, 0), (pad, pad), (pad, pad)))
        kernel_fn = functools.partial(_kernel_guided, K=K, Ho=Ho, Wo=Wo,
                                      inv_sigma_guide=inv_sig)
        in_specs = [smem_spec,
                    pl.BlockSpec((1, C, Hp, Wp), lambda b: (b, 0, 0, 0)),
                    pl.BlockSpec((1, Cg, Hp, Wp), lambda b: (b, 0, 0, 0))]
        operands = (g2, xpad, gpad)
        in_bytes = int(g2.size + xpad.size + gpad.size) * 4

    out_bytes = int(B * C * Ho * Wo) * 4
    flops = int(B * K * K * Ho * Wo * (3 * Cg + 2 * C + 2))
    transcendentals = int(B * K * K * Ho * Wo)

    out1 = pl.pallas_call(
        kernel_fn,
        out_shape=jax.ShapeDtypeStruct((B, C, Ho, Wo), out_dtype),
        grid=(B,),
        in_specs=in_specs,
        out_specs=pl.BlockSpec((1, C, Ho, Wo), lambda b: (b, 0, 0, 0)),
        compiler_params=pltpu.CompilerParams(
            dimension_semantics=("parallel",)),
        cost_estimate=pl.CostEstimate(flops=flops,
                                      transcendentals=transcendentals,
                                      bytes_accessed=in_bytes + out_bytes),
    )(*operands)

    if stride == 1:
        return out1
    # Strided output is an exact subsample of the stride-1 result (same taps,
    # same guide center). TODO(synk): compute strided windows in-kernel instead.
    return out1[:, :, ::stride, ::stride]


def bilateral_filter_reference(x, input_for_kernel=None, *, kernel_size, stride=1,
                               sigma_for_kernel=None, sigma_for_guide=1.0):
    """Pure-JAX reference mirroring the PyTorch module (unfold formulation)."""
    K = int(kernel_size)
    pad = K // 2
    if sigma_for_kernel is None:
        sigma_for_kernel = float(K) / 4.0
    B, C, H, W = x.shape

    sig2 = float(sigma_for_kernel) ** 2
    r = jnp.arange(-pad, pad + 1, dtype=jnp.float32)
    g1 = jnp.exp(-0.5 * r * r / sig2)
    g2 = g1[:, None] * g1[None, :]
    g2 = g2 / jnp.sum(g2)
    gk = g2.reshape(1, 1, K, K, 1, 1)

    Oh = (H + 2 * pad - K) // stride + 1
    Ow = (W + 2 * pad - K) // stride + 1

    def unfold(t):  # (B, Ct, H, W) -> (B, Ct, K, K, Oh, Ow)
        tp = jnp.pad(t, ((0, 0), (0, 0), (pad, pad), (pad, pad)))
        rows = []
        for ky in range(K):
            cols = []
            for kx in range(K):
                sl = tp[:, :,
                        ky:ky + (Oh - 1) * stride + 1:stride,
                        kx:kx + (Ow - 1) * stride + 1:stride]
                cols.append(sl)
            rows.append(jnp.stack(cols, axis=2))              # (B,Ct,K,Oh,Ow)
        return jnp.stack(rows, axis=2)                        # (B,Ct,K,K,Oh,Ow)

    guide_in = (x if input_for_kernel is None else input_for_kernel) / sigma_for_guide
    gcols = unfold(guide_in.astype(jnp.float32))
    cy = cx = K // 2
    center = gcols[:, :, cy:cy + 1, cx:cx + 1, :, :]
    diff_sq = jnp.sum((gcols - center) ** 2, axis=1, keepdims=True)
    guide = jnp.exp(-0.5 * diff_sq)                           # (B,1,K,K,Oh,Ow)

    ker_mul_gd = gk * guide
    norm = jnp.sum(ker_mul_gd, axis=(2, 3), keepdims=True)
    empty = (norm == 0).astype(jnp.float32)
    ker_mul_gd = ker_mul_gd / (norm + empty)

    xcols = unfold(x.astype(jnp.float32))
    out = jnp.sum(xcols * ker_mul_gd, axis=(2, 3))            # (B,C,Oh,Ow)
    return out.astype(x.dtype)


if __name__ == "__main__":
    key = jax.random.PRNGKey(0)
    k1, k2 = jax.random.split(key)

    B, C, H, W = 2, 4, 16, 16
    x = jax.random.normal(k1, (B, C, H, W), dtype=jnp.float32)

    # 1) Default path: guide == input (input_for_kernel=None), K=5, stride=1.
    out = bilateral_filter(x, kernel_size=5, stride=1)
    jax.block_until_ready(out)
    ref = bilateral_filter_reference(x, kernel_size=5, stride=1)
    assert out.shape == ref.shape
    assert np.allclose(np.asarray(out), np.asarray(ref), rtol=1e-4, atol=1e-4), \
        float(np.abs(np.asarray(out) - np.asarray(ref)).max())

    # 2) Separate guide tensor (input_for_kernel), K=3, stride=1.
    guide_in = jax.random.normal(k2, (B, 2, H, W), dtype=jnp.float32)
    out_g = bilateral_filter(x, guide_in, kernel_size=3, stride=1)
    jax.block_until_ready(out_g)
    ref_g = bilateral_filter_reference(x, guide_in, kernel_size=3, stride=1)
    assert out_g.shape == ref_g.shape
    assert np.allclose(np.asarray(out_g), np.asarray(ref_g), rtol=1e-4, atol=1e-4), \
        float(np.abs(np.asarray(out_g) - np.asarray(ref_g)).max())

    # 3) Strided output, K=3, stride=2.
    out_s = bilateral_filter(x, kernel_size=3, stride=2)
    jax.block_until_ready(out_s)
    ref_s = bilateral_filter_reference(x, kernel_size=3, stride=2)
    assert out_s.shape == ref_s.shape
    assert np.allclose(np.asarray(out_s), np.asarray(ref_s), rtol=1e-4, atol=1e-4), \
        float(np.abs(np.asarray(out_s) - np.asarray(ref_s)).max())

    print("KERNEL_OK")
</pallas_src>

<mosaic_0001>
module attributes {stable_mosaic.version = 11 : i64} {
  func.func @_kernel_shared(%arg0: i32, %arg1: memref<5x5xf32, #tpu.memory_space<smem>>, %arg2: memref<1x4x20x20xf32, #tpu.memory_space<vmem>>, %arg3: memref<1x4x16x16xf32, #tpu.memory_space<vmem>>) attributes {dimension_semantics = [#tpu.dimension_semantics<parallel>], iteration_bounds = array<i64: 2>, scalar_prefetch = 0 : i64, scratch_operands = 0 : i64, tpu.core_type = #tpu.core_type<tc>, window_params = [{transform_indices = @transform_0, window_bounds = array<i64: 5, 5>}, {transform_indices = @transform_1, window_bounds = array<i64: 1, 4, 20, 20>}, {transform_indices = @transform_2, window_bounds = array<i64: 1, 4, 16, 16>}]} {
    %c0 = arith.constant 0 : index
    %c0_0 = arith.constant 0 : index
    %c2 = arith.constant 2 : index
    %c2_1 = arith.constant 2 : index
    %0 = vector.load %arg2[%c0, %c0_0, %c2, %c2_1] : memref<1x4x20x20xf32, #tpu.memory_space<vmem>>, vector<1x4x16x16xf32>
    %1 = vector.shape_cast %0 : vector<1x4x16x16xf32> to vector<4x16x16xf32>
    %cst = arith.constant 0.000000e+00 : f32
    %2 = vector.broadcast %cst : f32 to vector<4x16x16xf32>
    %cst_2 = arith.constant 0.000000e+00 : f32
    %3 = vector.broadcast %cst_2 : f32 to vector<1x16x16xf32>
    %c0_3 = arith.constant 0 : index
    %c0_4 = arith.constant 0 : index
    %c0_5 = arith.constant 0 : index
    %c0_6 = arith.constant 0 : index
    %4 = vector.load %arg2[%c0_3, %c0_4, %c0_5, %c0_6] : memref<1x4x20x20xf32, #tpu.memory_space<vmem>>, vector<1x4x16x16xf32>
    %5 = vector.shape_cast %4 : vector<1x4x16x16xf32> to vector<4x16x16xf32>
    %6 = arith.subf %5, %1 : vector<4x16x16xf32>
    %7 = arith.mulf %6, %6 : vector<4x16x16xf32>
    %cst_7 = arith.constant dense<0.000000e+00> : vector<16x16xf32>
    %8 = vector.multi_reduction <add>, %7, %cst_7 [0] : vector<4x16x16xf32> to vector<16x16xf32>
    %9 = vector.shape_cast %8 : vector<16x16xf32> to vector<1x16x16xf32>
    %cst_8 = arith.constant -5.000000e-01 : f32
    %10 = vector.broadcast %cst_8 : f32 to vector<1x16x16xf32>
    %11 = arith.mulf %10, %9 : vector<1x16x16xf32>
    %12 = math.exp %11 : vector<1x16x16xf32>
    %c0_9 = arith.constant 0 : index
    %c0_10 = arith.constant 0 : index
    %13 = memref.load %arg1[%c0_9, %c0_10] : memref<5x5xf32, #tpu.memory_space<smem>>
    %14 = vector.broadcast %13 : f32 to vector<1x16x16xf32>
    %15 = arith.mulf %12, %14 : vector<1x16x16xf32>
    %16 = arith.addf %3, %15 : vector<1x16x16xf32>
    %17 = vector.broadcast %15 : vector<1x16x16xf32> to vector<4x16x16xf32>
    %18 = arith.mulf %5, %17 : vector<4x16x16xf32>
    %19 = arith.addf %2, %18 : vector<4x16x16xf32>
    %c0_11 = arith.constant 0 : index
    %c0_12 = arith.constant 0 : index
    %c0_13 = arith.constant 0 : index
    %c1 = arith.constant 1 : index
    %20 = vector.load %arg2[%c0_11, %c0_12, %c0_13, %c1] : memref<1x4x20x20xf32, #tpu.memory_space<vmem>>, vector<1x4x16x16xf32>
    %21 = vector.shape_cast %20 : vector<1x4x16x16xf32> to vector<4x16x16xf32>
    %22 = arith.subf %21, %1 : vector<4x16x16xf32>
    %23 = arith.mulf %22, %22 : vector<4x16x16xf32>
    %cst_14 = arith.constant dense<0.000000e+00> : vector<16x16xf32>
    %24 = vector.multi_reduction <add>, %23, %cst_14 [0] : vector<4x16x16xf32> to vector<16x16xf32>
    %25 = vector.shape_cast %24 : vector<16x16xf32> to vector<1x16x16xf32>
    %cst_15 = arith.constant -5.000000e-01 : f32
    %26 = vector.broadcast %cst_15 : f32 to vector<1x16x16xf32>
    %27 = arith.mulf %26, %25 : vector<1x16x16xf32>
    %28 = math.exp %27 : vector<1x16x16xf32>
    %c0_16 = arith.constant 0 : index
    %c1_17 = arith.constant 1 : index
    %29 = memref.load %arg1[%c0_16, %c1_17] : memref<5x5xf32, #tpu.memory_space<smem>>
    %30 = vector.broadcast %29 : f32 to vector<1x16x16xf32>
    %31 = arith.mulf %28, %30 : vector<1x16x16xf32>
    %32 = arith.addf %16, %31 : vector<1x16x16xf32>
    %33 = vector.broadcast %31 : vector<1x16x16xf32> to vector<4x16x16xf32>
    %34 = arith.mulf %21, %33 : vector<4x16x16xf32>
    %35 = arith.addf %19, %34 : vector<4x16x16xf32>
    %c0_18 = arith.constant 0 : index
    %c0_19 = arith.constant 0 : index
    %c0_20 = arith.constant 0 : index
    %c2_21 = arith.constant 2 : index
    %36 = vector.load %arg2[%c0_18, %c0_19, %c0_20, %c2_21] : memref<1x4x20x20xf32, #tpu.memory_space<vmem>>, vector<1x4x16x16xf32>
    %37 = vector.shape_cast %36 : vector<1x4x16x16xf32> to vector<4x16x16xf32>
    %38 = arith.subf %37, %1 : vector<4x16x16xf32>
    %39 = arith.mulf %38, %38 : vector<4x16x16xf32>
    %cst_22 = arith.constant dense<0.000000e+00> : vector<16x16xf32>
    %40 = vector.multi_reduction <add>, %39, %cst_22 [0] : vector<4x16x16xf32> to vector<16x16xf32>
    %41 = vector.shape_cast %40 : vector<16x16xf32> to vector<1x16x16xf32>
    %cst_23 = arith.constant -5.000000e-01 : f32
    %42 = vector.broadcast %cst_23 : f32 to vector<1x16x16xf32>
    %43 = arith.mulf %42, %41 : vector<1x16x16xf32>
    %44 = math.exp %43 : vector<1x16x16xf32>
    %c0_24 = arith.constant 0 : index
    %c2_25 = arith.constant 2 : index
    %45 = memref.load %arg1[%c0_24, %c2_25] : memref<5x5xf32, #tpu.memory_space<smem>>
    %46 = vector.broadcast %45 : f32 to vector<1x16x16xf32>
    %47 = arith.mulf %44, %46 : vector<1x16x16xf32>
    %48 = arith.addf %32, %47 : vector<1x16x16xf32>
    %49 = vector.broadcast %47 : vector<1x16x16xf32> to vector<4x16x16xf32>
    %50 = arith.mulf %37, %49 : vector<4x16x16xf32>
    %51 = arith.addf %35, %50 : vector<4x16x16xf32>
    %c0_26 = arith.constant 0 : index
    %c0_27 = arith.constant 0 : index
    %c0_28 = arith.constant 0 : index
    %c3 = arith.constant 3 : index
    %52 = vector.load %arg2[%c0_26, %c0_27, %c0_28, %c3] : memref<1x4x20x20xf32, #tpu.memory_space<vmem>>, vector<1x4x16x16xf32>
    %53 = vector.shape_cast %52 : vector<1x4x16x16xf32> to vector<4x16x16xf32>
    %54 = arith.subf %53, %1 : vector<4x16x16xf32>
    %55 = arith.mulf %54, %54 : vector<4x16x16xf32>
    %cst_29 = arith.constant dense<0.000000e+00> : vector<16x16xf32>
    %56 = vector.multi_reduction <add>, %55, %cst_29 [0] : vector<4x16x16xf32> to vector<16x16xf32>
    %57 = vector.shape_cast %56 : vector<16x16xf32> to vector<1x16x16xf32>
    %cst_30 = arith.constant -5.000000e-01 : f32
    %58 = vector.broadcast %cst_30 : f32 to vector<1x16x16xf32>
    %59 = arith.mulf %58, %57 : vector<1x16x16xf32>
    %60 = math.exp %59 : vector<1x16x16xf32>
    %c0_31 = arith.constant 0 : index
    %c3_32 = arith.constant 3 : index
    %61 = memref.load %arg1[%c0_31, %c3_32] : memref<5x5xf32, #tpu.memory_space<smem>>
    %62 = vector.broadcast %61 : f32 to vector<1x16x16xf32>
    %63 = arith.mulf %60, %62 : vector<1x16x16xf32>
    %64 = arith.addf %48, %63 : vector<1x16x16xf32>
    %65 = vector.broadcast %63 : vector<1x16x16xf32> to vector<4x16x16xf32>
    %66 = arith.mulf %53, %65 : vector<4x16x16xf32>
    %67 = arith.addf %51, %66 : vector<4x16x16xf32>
    %c0_33 = arith.constant 0 : index
    %c0_34 = arith.constant 0 : index
    %c0_35 = arith.constant 0 : index
    %c4 = arith.constant 4 : index
    %68 = vector.load %arg2[%c0_33, %c0_34, %c0_35, %c4] : memref<1x4x20x20xf32, #tpu.memory_space<vmem>>, vector<1x4x16x16xf32>
    %69 = vector.shape_cast %68 : vector<1x4x16x16xf32> to vector<4x16x16xf32>
    %70 = arith.subf %69, %1 : vector<4x16x16xf32>
    %71 = arith.mulf %70, %70 : vector<4x16x16xf32>
    %cst_36 = arith.constant dense<0.000000e+00> : vector<16x16xf32>
    %72 = vector.multi_reduction <add>, %71, %cst_36 [0] : vector<4x16x16xf32> to vector<16x16xf32>
    %73 = vector.shape_cast %72 : vector<16x16xf32> to vector<1x16x16xf32>
    %cst_37 = arith.constant -5.000000e-01 : f32
    %74 = vector.broadcast %cst_37 : f32 to vector<1x16x16xf32>
    %75 = arith.mulf %74, %73 : vector<1x16x16xf32>
    %76 = math.exp %75 : vector<1x16x16xf32>
    %c0_38 = arith.constant 0 : index
    %c4_39 = arith.constant 4 : index
    %77 = memref.load %arg1[%c0_38, %c4_39] : memref<5x5xf32, #tpu.memory_space<smem>>
    %78 = vector.broadcast %77 : f32 to vector<1x16x16xf32>
    %79 = arith.mulf %76, %78 : vector<1x16x16xf32>
    %80 = arith.addf %64, %79 : vector<1x16x16xf32>
    %81 = vector.broadcast %79 : vector<1x16x16xf32> to vector<4x16x16xf32>
    %82 = arith.mulf %69, %81 : vector<4x16x16xf32>
    %83 = arith.addf %67, %82 : vector<4x16x16xf32>
    %c0_40 = arith.constant 0 : index
    %c0_41 = arith.constant 0 : index
    %c1_42 = arith.constant 1 : index
    %c0_43 = arith.constant 0 : index
    %84 = vector.load %arg2[%c0_40, %c0_41, %c1_42, %c0_43] : memref<1x4x20x20xf32, #tpu.memory_space<vmem>>, vector<1x4x16x16xf32>
    %85 = vector.shape_cast %84 : vector<1x4x16x16xf32> to vector<4x16x16xf32>
    %86 = arith.subf %85, %1 : vector<4x16x16xf32>
    %87 = arith.mulf %86, %86 : vector<4x16x16xf32>
    %cst_44 = arith.constant dense<0.000000e+00> : vector<16x16xf32>
    %88 = vector.multi_reduction <add>, %87, %cst_44 [0] : vector<4x16x16xf32> to vector<16x16xf32>
    %89 = vector.shape_cast %88 : vector<16x16xf32> to vector<1x16x16xf32>
    %cst_45 = arith.constant -5.000000e-01 : f32
    %90 = vector.broadcast %cst_45 : f32 to vector<1x16x16xf32>
    %91 = arith.mulf %90, %89 : vector<1x16x16xf32>
    %92 = math.exp %91 : vector<1x16x16xf32>
    %c1_46 = arith.constant 1 : index
    %c0_47 = arith.constant 0 : index
    %93 = memref.load %arg1[%c1_46, %c0_47] : memref<5x5xf32, #tpu.memory_space<smem>>
    %94 = vector.broadcast %93 : f32 to vector<1x16x16xf32>
    %95 = arith.mulf %92, %94 : vector<1x16x16xf32>
    %96 = arith.addf %80, %95 : vector<1x16x16xf32>
    %97 = vector.broadcast %95 : vector<1x16x16xf32> to vector<4x16x16xf32>
    %98 = arith.mulf %85, %97 : vector<4x16x16xf32>
    %99 = arith.addf %83, %98 : vector<4x16x16xf32>
    %c0_48 = arith.constant 0 : index
    %c0_49 = arith.constant 0 : index
    %c1_50 = arith.constant 1 : index
    %c1_51 = arith.constant 1 : index
    %100 = vector.load %arg2[%c0_48, %c0_49, %c1_50, %c1_51] : memref<1x4x20x20xf32, #tpu.memory_space<vmem>>, vector<1x4x16x16xf32>
    %101 = vector.shape_cast %100 : vector<1x4x16x16xf32> to vector<4x16x16xf32>
    %102 = arith.subf %101, %1 : vector<4x16x16xf32>
    %103 = arith.mulf %102, %102 : vector<4x16x16xf32>
    %cst_52 = arith.constant dense<0.000000e+00> : vector<16x16xf32>
    %104 = vector.multi_reduction <add>, %103, %cst_52 [0] : vector<4x16x16xf32> to vector<16x16xf32>
    %105 = vector.shape_cast %104 : vector<16x16xf32> to vector<1x16x16xf32>
    %cst_53 = arith.constant -5.000000e-01 : f32
    %106 = vector.broadcast %cst_53 : f32 to vector<1x16x16xf32>
    %107 = arith.mulf %106, %105 : vector<1x16x16xf32>
    %108 = math.exp %107 : vector<1x16x16xf32>
    %c1_54 = arith.constant 1 : index
    %c1_55 = arith.constant 1 : index
    %109 = memref.load %arg1[%c1_54, %c1_55] : memref<5x5xf32, #tpu.memory_space<smem>>
    %110 = vector.broadcast %109 : f32 to vector<1x16x16xf32>
    %111 = arith.mulf %108, %110 : vector<1x16x16xf32>
    %112 = arith.addf %96, %111 : vector<1x16x16xf32>
    %113 = vector.broadcast %111 : vector<1x16x16xf32> to vector<4x16x16xf32>
    %114 = arith.mulf %101, %113 : vector<4x16x16xf32>
    %115 = arith.addf %99, %114 : vector<4x16x16xf32>
    %c0_56 = arith.constant 0 : index
    %c0_57 = arith.constant 0 : index
    %c1_58 = arith.constant 1 : index
    %c2_59 = arith.constant 2 : index
    %116 = vector.load %arg2[%c0_56, %c0_57, %c1_58, %c2_59] : memref<1x4x20x20xf32, #tpu.memory_space<vmem>>, vector<1x4x16x16xf32>
    %117 = vector.shape_cast %116 : vector<1x4x16x16xf32> to vector<4x16x16xf32>
    %118 = arith.subf %117, %1 : vector<4x16x16xf32>
    %119 = arith.mulf %118, %118 : vector<4x16x16xf32>
    %cst_60 = arith.constant dense<0.000000e+00> : vector<16x16xf32>
    %120 = vector.multi_reduction <add>, %119, %cst_60 [0] : vector<4x16x16xf32> to vector<16x16xf32>
    %121 = vector.shape_cast %120 : vector<16x16xf32> to vector<1x16x16xf32>
    %cst_61 = arith.constant -5.000000e-01 : f32
    %122 = vector.broadcast %cst_61 : f32 to vector<1x16x16xf32>
    %123 = arith.mulf %122, %121 : vector<1x16x16xf32>
    %124 = math.exp %123 : vector<1x16x16xf32>
    %c1_62 = arith.constant 1 : index
    %c2_63 = arith.constant 2 : index
    %125 = memref.load %arg1[%c1_62, %c2_63] : memref<5x5xf32, #tpu.memory_space<smem>>
    %126 = vector.broadcast %125 : f32 to vector<1x16x16xf32>
    %127 = arith.mulf %124, %126 : vector<1x16x16xf32>
    %128 = arith.addf %112, %127 : vector<1x16x16xf32>
    %129 = vector.broadcast %127 : vector<1x16x16xf32> to vector<4x16x16xf32>
    %130 = arith.mulf %117, %129 : vector<4x16x16xf32>
    %131 = arith.addf %115, %130 : vector<4x16x16xf32>
    %c0_64 = arith.constant 0 : index
    %c0_65 = arith.constant 0 : index
    %c1_66 = arith.constant 1 : index
    %c3_67 = arith.constant 3 : index
    %132 = vector.load %arg2[%c0_64, %c0_65, %c1_66, %c3_67] : memref<1x4x20x20xf32, #tpu.memory_space<vmem>>, vector<1x4x16x16xf32>
    %133 = vector.shape_cast %132 : vector<1x4x16x16xf32> to vector<4x16x16xf32>
    %134 = arith.subf %133, %1 : vector<4x16x16xf32>
    %135 = arith.mulf %134, %134 : vector<4x16x16xf32>
    %cst_68 = arith.constant dense<0.000000e+00> : vector<16x16xf32>
    %136 = vector.multi_reduction <add>, %135, %cst_68 [0] : vector<4x16x16xf32> to vector<16x16xf32>
    %137 = vector.shape_cast %136 : vector<16x16xf32> to vector<1x16x16xf32>
    %cst_69 = arith.constant -5.000000e-01 : f32
    %138 = vector.broadcast %cst_69 : f32 to vector<1x16x16xf32>
    %139 = arith.mulf %138, %137 : vector<1x16x16xf32>
    %140 = math.exp %139 : vector<1x16x16xf32>
    %c1_70 = arith.constant 1 : index
    %c3_71 = arith.constant 3 : index
    %141 = memref.load %arg1[%c1_70, %c3_71] : memref<5x5xf32, #tpu.memory_space<smem>>
    %142 = vector.broadcast %141 : f32 to vector<1x16x16xf32>
    %143 = arith.mulf %140, %142 : vector<1x16x16xf32>
    %144 = arith.addf %128, %143 : vector<1x16x16xf32>
    %145 = vector.broadcast %143 : vector<1x16x16xf32> to vector<4x16x16xf32>
    %146 = arith.mulf %133, %145 : vector<4x16x16xf32>
    %147 = arith.addf %131, %146 : vector<4x16x16xf32>
    %c0_72 = arith.constant 0 : index
    %c0_73 = arith.constant 0 : index
    %c1_74 = arith.constant 1 : index
    %c4_75 = arith.constant 4 : index
    %148 = vector.load %arg2[%c0_72, %c0_73, %c1_74, %c4_75] : memref<1x4x20x20xf32, #tpu.memory_space<vmem>>, vector<1x4x16x16xf32>
    %149 = vector.shape_cast %148 : vector<1x4x16x16xf32> to vector<4x16x16xf32>
    %150 = arith.subf %149, %1 : vector<4x16x16xf32>
    %151 = arith.mulf %150, %150 : vector<4x16x16xf32>
    %cst_76 = arith.constant dense<0.000000e+00> : vector<16x16xf32>
    %152 = vector.multi_reduction <add>, %151, %cst_76 [0] : vector<4x16x16xf32> to vector<16x16xf32>
    %153 = vector.shape_cast %152 : vector<16x16xf32> to vector<1x16x16xf32>
    %cst_77 = arith.constant -5.000000e-01 : f32
    %154 = vector.broadcast %cst_77 : f32 to vector<1x16x16xf32>
    %155 = arith.mulf %154, %153 : vector<1x16x16xf32>
    %156 = math.exp %155 : vector<1x16x16xf32>
    %c1_78 = arith.constant 1 : index
    %c4_79 = arith.constant 4 : index
    %157 = memref.load %arg1[%c1_78, %c4_79] : memref<5x5xf32, #tpu.memory_space<smem>>
    %158 = vector.broadcast %157 : f32 to vector<1x16x16xf32>
    %159 = arith.mulf %156, %158 : vector<1x16x16xf32>
    %160 = arith.addf %144, %159 : vector<1x16x16xf32>
    %161 = vector.broadcast %159 : vector<1x16x16xf32> to vector<4x16x16xf32>
    %162 = arith.mulf %149, %161 : vector<4x16x16xf32>
    %163 = arith.addf %147, %162 : vector<4x16x16xf32>
    %c0_80 = arith.constant 0 : index
    %c0_81 = arith.constant 0 : index
    %c2_82 = arith.constant 2 : index
    %c0_83 = arith.constant 0 : index
    %164 = vector.load %arg2[%c0_80, %c0_81, %c2_82, %c0_83] : memref<1x4x20x20xf32, #tpu.memory_space<vmem>>, vector<1x4x16x16xf32>
    %165 = vector.shape_cast %164 : vector<1x4x16x16xf32> to vector<4x16x16xf32>
    %166 = arith.subf %165, %1 : vector<4x16x16xf32>
    %167 = arith.mulf %166, %166 : vector<4x16x16xf32>
    %cst_84 = arith.constant dense<0.000000e+00> : vector<16x16xf32>
    %168 = vector.multi_reduction <add>, %167, %cst_84 [0] : vector<4x16x16xf32> to vector<16x16xf32>
    %169 = vector.shape_cast %168 : vector<16x16xf32> to vector<1x16x16xf32>
    %cst_85 = arith.constant -5.000000e-01 : f32
    %170 = vector.broadcast %cst_85 : f32 to vector<1x16x16xf32>
    %171 = arith.mulf %170, %169 : vector<1x16x16xf32>
    %172 = math.exp %171 : vector<1x16x16xf32>
    %c2_86 = arith.constant 2 : index
    %c0_87 = arith.constant 0 : index
    %173 = memref.load %arg1[%c2_86, %c0_87] : memref<5x5xf32, #tpu.memory_space<smem>>
    %174 = vector.broadcast %173 : f32 to vector<1x16x16xf32>
    %175 = arith.mulf %172, %174 : vector<1x16x16xf32>
    %176 = arith.addf %160, %175 : vector<1x16x16xf32>
    %177 = vector.broadcast %175 : vector<1x16x16xf32> to vector<4x16x16xf32>
    %178 = arith.mulf %165, %177 : vector<4x16x16xf32>
    %179 = arith.addf %163, %178 : vector<4x16x16xf32>
    %c0_88 = arith.constant 0 : index
    %c0_89 = arith.constant 0 : index
    %c2_90 = arith.constant 2 : index
    %c1_91 = arith.constant 1 : index
    %180 = vector.load %arg2[%c0_88, %c0_89, %c2_90, %c1_91] : memref<1x4x20x20xf32, #tpu.memory_space<vmem>>, vector<1x4x16x16xf32>
    %181 = vector.shape_cast %180 : vector<1x4x16x16xf32> to vector<4x16x16xf32>
    %182 = arith.subf %181, %1 : vector<4x16x16xf32>
    %183 = arith.mulf %182, %182 : vector<4x16x16xf32>
    %cst_92 = arith.constant dense<0.000000e+00> : vector<16x16xf32>
    %184 = vector.multi_reduction <add>, %183, %cst_92 [0] : vector<4x16x16xf32> to vector<16x16xf32>
    %185 = vector.shape_cast %184 : vector<16x16xf32> to vector<1x16x16xf32>
    %cst_93 = arith.constant -5.000000e-01 : f32
    %186 = vector.broadcast %cst_93 : f32 to vector<1x16x16xf32>
    %187 = arith.mulf %186, %185 : vector<1x16x16xf32>
    %188 = math.exp %187 : vector<1x16x16xf32>
    %c2_94 = arith.constant 2 : index
    %c1_95 = arith.constant 1 : index
    %189 = memref.load %arg1[%c2_94, %c1_95] : memref<5x5xf32, #tpu.memory_space<smem>>
    %190 = vector.broadcast %189 : f32 to vector<1x16x16xf32>
    %191 = arith.mulf %188, %190 : vector<1x16x16xf32>
    %192 = arith.addf %176, %191 : vector<1x16x16xf32>
    %193 = vector.broadcast %191 : vector<1x16x16xf32> to vector<4x16x16xf32>
    %194 = arith.mulf %181, %193 : vector<4x16x16xf32>
    %195 = arith.addf %179, %194 : vector<4x16x16xf32>
    %c0_96 = arith.constant 0 : index
    %c0_97 = arith.constant 0 : index
    %c2_98 = arith.constant 2 : index
    %c2_99 = arith.constant 2 : index
    %196 = vector.load %arg2[%c0_96, %c0_97, %c2_98, %c2_99] : memref<1x4x20x20xf32, #tpu.memory_space<vmem>>, vector<1x4x16x16xf32>
    %197 = vector.shape_cast %196 : vector<1x4x16x16xf32> to vector<4x16x16xf32>
    %198 = arith.subf %197, %1 : vector<4x16x16xf32>
    %199 = arith.mulf %198, %198 : vector<4x16x16xf32>
    %cst_100 = arith.constant dense<0.000000e+00> : vector<16x16xf32>
    %200 = vector.multi_reduction <add>, %199, %cst_100 [0] : vector<4x16x16xf32> to vector<16x16xf32>
    %201 = vector.shape_cast %200 : vector<16x16xf32> to vector<1x16x16xf32>
    %cst_101 = arith.constant -5.000000e-01 : f32
    %202 = vector.broadcast %cst_101 : f32 to vector<1x16x16xf32>
    %203 = arith.mulf %202, %201 : vector<1x16x16xf32>
    %204 = math.exp %203 : vector<1x16x16xf32>
    %c2_102 = arith.constant 2 : index
    %c2_103 = arith.constant 2 : index
    %205 = memref.load %arg1[%c2_102, %c2_103] : memref<5x5xf32, #tpu.memory_space<smem>>
    %206 = vector.broadcast %205 : f32 to vector<1x16x16xf32>
    %207 = arith.mulf %204, %206 : vector<1x16x16xf32>
    %208 = arith.addf %192, %207 : vector<1x16x16xf32>
    %209 = vector.broadcast %207 : vector<1x16x16xf32> to vector<4x16x16xf32>
    %210 = arith.mulf %197, %209 : vector<4x16x16xf32>
    %211 = arith.addf %195, %210 : vector<4x16x16xf32>
    %c0_104 = arith.constant 0 : index
    %c0_105 = arith.constant 0 : index
    %c2_106 = arith.constant 2 : index
    %c3_107 = arith.constant 3 : index
    %212 = vector.load %arg2[%c0_104, %c0_105, %c2_106, %c3_107] : memref<1x4x20x20xf32, #tpu.memory_space<vmem>>, vector<1x4x16x16xf32>
    %213 = vector.shape_cast %212 : vector<1x4x16x16xf32> to vector<4x16x16xf32>
    %214 = arith.subf %213, %1 : vector<4x16x16xf32>
    %215 = arith.mulf %214, %214 : vector<4x16x16xf32>
    %cst_108 = arith.constant dense<0.000000e+00> : vector<16x16xf32>
    %216 = vector.multi_reduction <add>, %215, %cst_108 [0] : vector<4x16x16xf32> to vector<16x16xf32>
    %217 = vector.shape_cast %216 : vector<16x16xf32> to vector<1x16x16xf32>
    %cst_109 = arith.constant -5.000000e-01 : f32
    %218 = vector.broadcast %cst_109 : f32 to vector<1x16x16xf32>
    %219 = arith.mulf %218, %217 : vector<1x16x16xf32>
    %220 = math.exp %219 : vector<1x16x16xf32>
    %c2_110 = arith.constant 2 : index
    %c3_111 = arith.constant 3 : index
    %221 = memref.load %arg1[%c2_110, %c3_111] : memref<5x5xf32, #tpu.memory_space<smem>>
    %222 = vector.broadcast %221 : f32 to vector<1x16x16xf32>
    %223 = arith.mulf %220, %222 : vector<1x16x16xf32>
    %224 = arith.addf %208, %223 : vector<1x16x16xf32>
    %225 = vector.broadcast %223 : vector<1x16x16xf32> to vector<4x16x16xf32>
    %226 = arith.mulf %213, %225 : vector<4x16x16xf32>
    %227 = arith.addf %211, %226 : vector<4x16x16xf32>
    %c0_112 = arith.constant 0 : index
    %c0_113 = arith.constant 0 : index
    %c2_114 = arith.constant 2 : index
    %c4_115 = arith.constant 4 : index
    %228 = vector.load %arg2[%c0_112, %c0_113, %c2_114, %c4_115] : memref<1x4x20x20xf32, #tpu.memory_space<vmem>>, vector<1x4x16x16xf32>
    %229 = vector.shape_cast %228 : vector<1x4x16x16xf32> to vector<4x16x16xf32>
    %230 = arith.subf %229, %1 : vector<4x16x16xf32>
    %231 = arith.mulf %230, %230 : vector<4x16x16xf32>
    %cst_116 = arith.constant dense<0.000000e+00> : vector<16x16xf32>
    %232 = vector.multi_reduction <add>, %231, %cst_116 [0] : vector<4x16x16xf32> to vector<16x16xf32>
    %233 = vector.shape_cast %232 : vector<16x16xf32> to vector<1x16x16xf32>
    %cst_117 = arith.constant -5.000000e-01 : f32
    %234 = vector.broadcast %cst_117 : f32 to vector<1x16x16xf32>
    %235 = arith.mulf %234, %233 : vector<1x16x16xf32>
    %236 = math.exp %235 : vector<1x16x16xf32>
    %c2_118 = arith.constant 2 : index
    %c4_119 = arith.constant 4 : index
    %237 = memref.load %arg1[%c2_118, %c4_119] : memref<5x5xf32, #tpu.memory_space<smem>>
    %238 = vector.broadcast %237 : f32 to vector<1x16x16xf32>
    %239 = arith.mulf %236, %238 : vector<1x16x16xf32>
    %240 = arith.addf %224, %239 : vector<1x16x16xf32>
    %241 = vector.broadcast %239 : vector<1x16x16xf32> to vector<4x16x16xf32>
    %242 = arith.mulf %229, %241 : vector<4x16x16xf32>
    %243 = arith.addf %227, %242 : vector<4x16x16xf32>
    %c0_120 = arith.constant 0 : index
    %c0_121 = arith.constant 0 : index
    %c3_122 = arith.constant 3 : index
    %c0_123 = arith.constant 0 : index
    %244 = vector.load %arg2[%c0_120, %c0_121, %c3_122, %c0_123] : memref<1x4x20x20xf32, #tpu.memory_space<vmem>>, vector<1x4x16x16xf32>
    %245 = vector.shape_cast %244 : vector<1x4x16x16xf32> to vector<4x16x16xf32>
    %246 = arith.subf %245, %1 : vector<4x16x16xf32>
    %247 = arith.mulf %246, %246 : vector<4x16x16xf32>
    %cst_124 = arith.constant dense<0.000000e+00> : vector<16x16xf32>
    %248 = vector.multi_reduction <add>, %247, %cst_124 [0] : vector<4x16x16xf32> to vector<16x16xf32>
    %249 = vector.shape_cast %248 : vector<16x16xf32> to vector<1x16x16xf32>
    %cst_125 = arith.constant -5.000000e-01 : f32
    %250 = vector.broadcast %cst_125 : f32 to vector<1x16x16xf32>
    %251 = arith.mulf %250, %249 : vector<1x16x16xf32>
    %252 = math.exp %251 : vector<1x16x16xf32>
    %c3_126 = arith.constant 3 : index
    %c0_127 = arith.constant 0 : index
    %253 = memref.load %arg1[%c3_126, %c0_127] : memref<5x5xf32, #tpu.memory_space<smem>>
    %254 = vector.broadcast %253 : f32 to vector<1x16x16xf32>
    %255 = arith.mulf %252, %254 : vector<1x16x16xf32>
    %256 = arith.addf %240, %255 : vector<1x16x16xf32>
    %257 = vector.broadcast %255 : vector<1x16x16xf32> to vector<4x16x16xf32>
    %258 = arith.mulf %245, %257 : vector<4x16x16xf32>
    %259 = arith.addf %243, %258 : vector<4x16x16xf32>
    %c0_128 = arith.constant 0 : index
    %c0_129 = arith.constant 0 : index
    %c3_130 = arith.constant 3 : index
    %c1_131 = arith.constant 1 : index
    %260 = vector.load %arg2[%c0_128, %c0_129, %c3_130, %c1_131] : memref<1x4x20x20xf32, #tpu.memory_space<vmem>>, vector<1x4x16x16xf32>
    %261 = vector.shape_cast %260 : vector<1x4x16x16xf32> to vector<4x16x16xf32>
    %262 = arith.subf %261, %1 : vector<4x16x16xf32>
    %263 = arith.mulf %262, %262 : vector<4x16x16xf32>
    %cst_132 = arith.constant dense<0.000000e+00> : vector<16x16xf32>
    %264 = vector.multi_reduction <add>, %263, %cst_132 [0] : vector<4x16x16xf32> to vector<16x16xf32>
    %265 = vector.shape_cast %264 : vector<16x16xf32> to vector<1x16x16xf32>
    %cst_133 = arith.constant -5.000000e-01 : f32
    %266 = vector.broadcast %cst_133 : f32 to vector<1x16x16xf32>
    %267 = arith.mulf %266, %265 : vector<1x16x16xf32>
    %268 = math.exp %267 : vector<1x16x16xf32>
    %c3_134 = arith.constant 3 : index
    %c1_135 = arith.constant 1 : index
    %269 = memref.load %arg1[%c3_134, %c1_135] : memref<5x5xf32, #tpu.memory_space<smem>>
    %270 = vector.broadcast %269 : f32 to vector<1x16x16xf32>
    %271 = arith.mulf %268, %270 : vector<1x16x16xf32>
    %272 = arith.addf %256, %271 : vector<1x16x16xf32>
    %273 = vector.broadcast %271 : vector<1x16x16xf32> to vector<4x16x16xf32>
    %274 = arith.mulf %261, %273 : vector<4x16x16xf32>
    %275 = arith.addf %259, %274 : vector<4x16x16xf32>
    %c0_136 = arith.constant 0 : index
    %c0_137 = arith.constant 0 : index
    %c3_138 = arith.constant 3 : index
    %c2_139 = arith.constant 2 : index
    %276 = vector.load %arg2[%c0_136, %c0_137, %c3_138, %c2_139] : memref<1x4x20x20xf32, #tpu.memory_space<vmem>>, vector<1x4x16x16xf32>
    %277 = vector.shape_cast %276 : vector<1x4x16x16xf32> to vector<4x16x16xf32>
    %278 = arith.subf %277, %1 : vector<4x16x16xf32>
    %279 = arith.mulf %278, %278 : vector<4x16x16xf32>
    %cst_140 = arith.constant dense<0.000000e+00> : vector<16x16xf32>
    %280 = vector.multi_reduction <add>, %279, %cst_140 [0] : vector<4x16x16xf32> to vector<16x16xf32>
    %281 = vector.shape_cast %280 : vector<16x16xf32> to vector<1x16x16xf32>
    %cst_141 = arith.constant -5.000000e-01 : f32
    %282 = vector.broadcast %cst_141 : f32 to vector<1x16x16xf32>
    %283 = arith.mulf %282, %281 : vector<1x16x16xf32>
    %284 = math.exp %283 : vector<1x16x16xf32>
    %c3_142 = arith.constant 3 : index
    %c2_143 = arith.constant 2 : index
    %285 = memref.load %arg1[%c3_142, %c2_143] : memref<5x5xf32, #tpu.memory_space<smem>>
    %286 = vector.broadcast %285 : f32 to vector<1x16x16xf32>
    %287 = arith.mulf %284, %286 : vector<1x16x16xf32>
    %288 = arith.addf %272, %287 : vector<1x16x16xf32>
    %289 = vector.broadcast %287 : vector<1x16x16xf32> to vector<4x16x16xf32>
    %290 = arith.mulf %277, %289 : vector<4x16x16xf32>
    %291 = arith.addf %275, %290 : vector<4x16x16xf32>
    %c0_144 = arith.constant 0 : index
    %c0_145 = arith.constant 0 : index
    %c3_146 = arith.constant 3 : index
    %c3_147 = arith.constant 3 : index
    %292 = vector.load %arg2[%c0_144, %c0_145, %c3_146, %c3_147] : memref<1x4x20x20xf32, #tpu.memory_space<vmem>>, vector<1x4x16x16xf32>
    %293 = vector.shape_cast %292 : vector<1x4x16x16xf32> to vector<4x16x16xf32>
    %294 = arith.subf %293, %1 : vector<4x16x16xf32>
    %295 = arith.mulf %294, %294 : vector<4x16x16xf32>
    %cst_148 = arith.constant dense<0.000000e+00> : vector<16x16xf32>
    %296 = vector.multi_reduction <add>, %295, %cst_148 [0] : vector<4x16x16xf32> to vector<16x16xf32>
    %297 = vector.shape_cast %296 : vector<16x16xf32> to vector<1x16x16xf32>
    %cst_149 = arith.constant -5.000000e-01 : f32
    %298 = vector.broadcast %cst_149 : f32 to vector<1x16x16xf32>
    %299 = arith.mulf %298, %297 : vector<1x16x16xf32>
    %300 = math.exp %299 : vector<1x16x16xf32>
    %c3_150 = arith.constant 3 : index
    %c3_151 = arith.constant 3 : index
    %301 = memref.load %arg1[%c3_150, %c3_151] : memref<5x5xf32, #tpu.memory_space<smem>>
    %302 = vector.broadcast %301 : f32 to vector<1x16x16xf32>
    %303 = arith.mulf %300, %302 : vector<1x16x16xf32>
    %304 = arith.addf %288, %303 : vector<1x16x16xf32>
    %305 = vector.broadcast %303 : vector<1x16x16xf32> to vector<4x16x16xf32>
    %306 = arith.mulf %293, %305 : vector<4x16x16xf32>
    %307 = arith.addf %291, %306 : vector<4x16x16xf32>
    %c0_152 = arith.constant 0 : index
    %c0_153 = arith.constant 0 : index
    %c3_154 = arith.constant 3 : index
    %c4_155 = arith.constant 4 : index
    %308 = vector.load %arg2[%c0_152, %c0_153, %c3_154, %c4_155] : memref<1x4x20x20xf32, #tpu.memory_space<vmem>>, vector<1x4x16x16xf32>
    %309 = vector.shape_cast %308 : vector<1x4x16x16xf32> to vector<4x16x16xf32>
    %310 = arith.subf %309, %1 : vector<4x16x16xf32>
    %311 = arith.mulf %310, %310 : vector<4x16x16xf32>
    %cst_156 = arith.constant dense<0.000000e+00> : vector<16x16xf32>
    %312 = vector.multi_reduction <add>, %311, %cst_156 [0] : vector<4x16x16xf32> to vector<16x16xf32>
    %313 = vector.shape_cast %312 : vector<16x16xf32> to vector<1x16x16xf32>
    %cst_157 = arith.constant -5.000000e-01 : f32
    %314 = vector.broadcast %cst_157 : f32 to vector<1x16x16xf32>
    %315 = arith.mulf %314, %313 : vector<1x16x16xf32>
    %316 = math.exp %315 : vector<1x16x16xf32>
    %c3_158 = arith.constant 3 : index
    %c4_159 = arith.constant 4 : index
    %317 = memref.load %arg1[%c3_158, %c4_159] : memref<5x5xf32, #tpu.memory_space<smem>>
    %318 = vector.broadcast %317 : f32 to vector<1x16x16xf32>
    %319 = arith.mulf %316, %318 : vector<1x16x16xf32>
    %320 = arith.addf %304, %319 : vector<1x16x16xf32>
    %321 = vector.broadcast %319 : vector<1x16x16xf32> to vector<4x16x16xf32>
    %322 = arith.mulf %309, %321 : vector<4x16x16xf32>
    %323 = arith.addf %307, %322 : vector<4x16x16xf32>
    %c0_160 = arith.constant 0 : index
    %c0_161 = arith.constant 0 : index
    %c4_162 = arith.constant 4 : index
    %c0_163 = arith.constant 0 : index
    %324 = vector.load %arg2[%c0_160, %c0_161, %c4_162, %c0_163] : memref<1x4x20x20xf32, #tpu.memory_space<vmem>>, vector<1x4x16x16xf32>
    %325 = vector.shape_cast %324 : vector<1x4x16x16xf32> to vector<4x16x16xf32>
    %326 = arith.subf %325, %1 : vector<4x16x16xf32>
    %327 = arith.mulf %326, %326 : vector<4x16x16xf32>
    %cst_164 = arith.constant dense<0.000000e+00> : vector<16x16xf32>
    %328 = vector.multi_reduction <add>, %327, %cst_164 [0] : vector<4x16x16xf32> to vector<16x16xf32>
    %329 = vector.shape_cast %328 : vector<16x16xf32> to vector<1x16x16xf32>
    %cst_165 = arith.constant -5.000000e-01 : f32
    %330 = vector.broadcast %cst_165 : f32 to vector<1x16x16xf32>
    %331 = arith.mulf %330, %329 : vector<1x16x16xf32>
    %332 = math.exp %331 : vector<1x16x16xf32>
    %c4_166 = arith.constant 4 : index
    %c0_167 = arith.constant 0 : index
    %333 = memref.load %arg1[%c4_166, %c0_167] : memref<5x5xf32, #tpu.memory_space<smem>>
    %334 = vector.broadcast %333 : f32 to vector<1x16x16xf32>
    %335 = arith.mulf %332, %334 : vector<1x16x16xf32>
    %336 = arith.addf %320, %335 : vector<1x16x16xf32>
    %337 = vector.broadcast %335 : vector<1x16x16xf32> to vector<4x16x16xf32>
    %338 = arith.mulf %325, %337 : vector<4x16x16xf32>
    %339 = arith.addf %323, %338 : vector<4x16x16xf32>
    %c0_168 = arith.constant 0 : index
    %c0_169 = arith.constant 0 : index
    %c4_170 = arith.constant 4 : index
    %c1_171 = arith.constant 1 : index
    %340 = vector.load %arg2[%c0_168, %c0_169, %c4_170, %c1_171] : memref<1x4x20x20xf32, #tpu.memory_space<vmem>>, vector<1x4x16x16xf32>
    %341 = vector.shape_cast %340 : vector<1x4x16x16xf32> to vector<4x16x16xf32>
    %342 = arith.subf %341, %1 : vector<4x16x16xf32>
    %343 = arith.mulf %342, %342 : vector<4x16x16xf32>
    %cst_172 = arith.constant dense<0.000000e+00> : vector<16x16xf32>
    %344 = vector.multi_reduction <add>, %343, %cst_172 [0] : vector<4x16x16xf32> to vector<16x16xf32>
    %345 = vector.shape_cast %344 : vector<16x16xf32> to vector<1x16x16xf32>
    %cst_173 = arith.constant -5.000000e-01 : f32
    %346 = vector.broadcast %cst_173 : f32 to vector<1x16x16xf32>
    %347 = arith.mulf %346, %345 : vector<1x16x16xf32>
    %348 = math.exp %347 : vector<1x16x16xf32>
    %c4_174 = arith.constant 4 : index
    %c1_175 = arith.constant 1 : index
    %349 = memref.load %arg1[%c4_174, %c1_175] : memref<5x5xf32, #tpu.memory_space<smem>>
    %350 = vector.broadcast %349 : f32 to vector<1x16x16xf32>
    %351 = arith.mulf %348, %350 : vector<1x16x16xf32>
    %352 = arith.addf %336, %351 : vector<1x16x16xf32>
    %353 = vector.broadcast %351 : vector<1x16x16xf32> to vector<4x16x16xf32>
    %354 = arith.mulf %341, %353 : vector<4x16x16xf32>
    %355 = arith.addf %339, %354 : vector<4x16x16xf32>
    %c0_176 = arith.constant 0 : index
    %c0_177 = arith.constant 0 : index
    %c4_178 = arith.constant 4 : index
    %c2_179 = arith.constant 2 : index
    %356 = vector.load %arg2[%c0_176, %c0_177, %c4_178, %c2_179] : memref<1x4x20x20xf32, #tpu.memory_space<vmem>>, vector<1x4x16x16xf32>
    %357 = vector.shape_cast %356 : vector<1x4x16x16xf32> to vector<4x16x16xf32>
    %358 = arith.subf %357, %1 : vector<4x16x16xf32>
    %359 = arith.mulf %358, %358 : vector<4x16x16xf32>
    %cst_180 = arith.constant dense<0.000000e+00> : vector<16x16xf32>
    %360 = vector.multi_reduction <add>, %359, %cst_180 [0] : vector<4x16x16xf32> to vector<16x16xf32>
    %361 = vector.shape_cast %360 : vector<16x16xf32> to vector<1x16x16xf32>
    %cst_181 = arith.constant -5.000000e-01 : f32
    %362 = vector.broadcast %cst_181 : f32 to vector<1x16x16xf32>
    %363 = arith.mulf %362, %361 : vector<1x16x16xf32>
    %364 = math.exp %363 : vector<1x16x16xf32>
    %c4_182 = arith.constant 4 : index
    %c2_183 = arith.constant 2 : index
    %365 = memref.load %arg1[%c4_182, %c2_183] : memref<5x5xf32, #tpu.memory_space<smem>>
    %366 = vector.broadcast %365 : f32 to vector<1x16x16xf32>
    %367 = arith.mulf %364, %366 : vector<1x16x16xf32>
    %368 = arith.addf %352, %367 : vector<1x16x16xf32>
    %369 = vector.broadcast %367 : vector<1x16x16xf32> to vector<4x16x16xf32>
    %370 = arith.mulf %357, %369 : vector<4x16x16xf32>
    %371 = arith.addf %355, %370 : vector<4x16x16xf32>
    %c0_184 = arith.constant 0 : index
    %c0_185 = arith.constant 0 : index
    %c4_186 = arith.constant 4 : index
    %c3_187 = arith.constant 3 : index
    %372 = vector.load %arg2[%c0_184, %c0_185, %c4_186, %c3_187] : memref<1x4x20x20xf32, #tpu.memory_space<vmem>>, vector<1x4x16x16xf32>
    %373 = vector.shape_cast %372 : vector<1x4x16x16xf32> to vector<4x16x16xf32>
    %374 = arith.subf %373, %1 : vector<4x16x16xf32>
    %375 = arith.mulf %374, %374 : vector<4x16x16xf32>
    %cst_188 = arith.constant dense<0.000000e+00> : vector<16x16xf32>
    %376 = vector.multi_reduction <add>, %375, %cst_188 [0] : vector<4x16x16xf32> to vector<16x16xf32>
    %377 = vector.shape_cast %376 : vector<16x16xf32> to vector<1x16x16xf32>
    %cst_189 = arith.constant -5.000000e-01 : f32
    %378 = vector.broadcast %cst_189 : f32 to vector<1x16x16xf32>
    %379 = arith.mulf %378, %377 : vector<1x16x16xf32>
    %380 = math.exp %379 : vector<1x16x16xf32>
    %c4_190 = arith.constant 4 : index
    %c3_191 = arith.constant 3 : index
    %381 = memref.load %arg1[%c4_190, %c3_191] : memref<5x5xf32, #tpu.memory_space<smem>>
    %382 = vector.broadcast %381 : f32 to vector<1x16x16xf32>
    %383 = arith.mulf %380, %382 : vector<1x16x16xf32>
    %384 = arith.addf %368, %383 : vector<1x16x16xf32>
    %385 = vector.broadcast %383 : vector<1x16x16xf32> to vector<4x16x16xf32>
    %386 = arith.mulf %373, %385 : vector<4x16x16xf32>
    %387 = arith.addf %371, %386 : vector<4x16x16xf32>
    %c0_192 = arith.constant 0 : index
    %c0_193 = arith.constant 0 : index
    %c4_194 = arith.constant 4 : index
    %c4_195 = arith.constant 4 : index
    %388 = vector.load %arg2[%c0_192, %c0_193, %c4_194, %c4_195] : memref<1x4x20x20xf32, #tpu.memory_space<vmem>>, vector<1x4x16x16xf32>
    %389 = vector.shape_cast %388 : vector<1x4x16x16xf32> to vector<4x16x16xf32>
    %390 = arith.subf %389, %1 : vector<4x16x16xf32>
    %391 = arith.mulf %390, %390 : vector<4x16x16xf32>
    %cst_196 = arith.constant dense<0.000000e+00> : vector<16x16xf32>
    %392 = vector.multi_reduction <add>, %391, %cst_196 [0] : vector<4x16x16xf32> to vector<16x16xf32>
    %393 = vector.shape_cast %392 : vector<16x16xf32> to vector<1x16x16xf32>
    %cst_197 = arith.constant -5.000000e-01 : f32
    %394 = vector.broadcast %cst_197 : f32 to vector<1x16x16xf32>
    %395 = arith.mulf %394, %393 : vector<1x16x16xf32>
    %396 = math.exp %395 : vector<1x16x16xf32>
    %c4_198 = arith.constant 4 : index
    %c4_199 = arith.constant 4 : index
    %397 = memref.load %arg1[%c4_198, %c4_199] : memref<5x5xf32, #tpu.memory_space<smem>>
    %398 = vector.broadcast %397 : f32 to vector<1x16x16xf32>
    %399 = arith.mulf %396, %398 : vector<1x16x16xf32>
    %400 = arith.addf %384, %399 : vector<1x16x16xf32>
    %401 = vector.broadcast %399 : vector<1x16x16xf32> to vector<4x16x16xf32>
    %402 = arith.mulf %389, %401 : vector<4x16x16xf32>
    %403 = arith.addf %387, %402 : vector<4x16x16xf32>
    %cst_200 = arith.constant 0.000000e+00 : f32
    %404 = vector.broadcast %cst_200 : f32 to vector<1x16x16xf32>
    %405 = arith.cmpf oeq, %400, %404 : vector<1x16x16xf32>
    %406 = arith.extui %405 : vector<1x16x16xi1> to vector<1x16x16xi32>
    %407 = arith.sitofp %406 : vector<1x16x16xi32> to vector<1x16x16xf32>
    %408 = arith.addf %400, %407 : vector<1x16x16xf32>
    %409 = vector.broadcast %408 : vector<1x16x16xf32> to vector<4x16x16xf32>
    %410 = arith.divf %403, %409 : vector<4x16x16xf32>
    %c0_201 = arith.constant 0 : index
    %c0_202 = arith.constant 0 : index
    %c0_203 = arith.constant 0 : index
    %c0_204 = arith.constant 0 : index
    %411 = vector.load %arg3[%c0_201, %c0_202, %c0_203, %c0_204] : memref<1x4x16x16xf32, #tpu.memory_space<vmem>>, vector<1x4x16x16xf32>
    %412 = vector.shape_cast %411 : vector<1x4x16x16xf32> to vector<4x16x16xf32>
    %413 = vector.shape_cast %410 : vector<4x16x16xf32> to vector<1x4x16x16xf32>
    tpu.vector_store %arg3[%c0_201, %c0_202, %c0_203, %c0_204], %413 {strides = array<i32>} : memref<1x4x16x16xf32, #tpu.memory_space<vmem>>, vector<1x4x16x16xf32>,
    return
  }
  func.func @transform_0(%arg0: i32) -> (i32, i32) {
    %c0_i32 = arith.constant 0 : i32
    %c0_i32_0 = arith.constant 0 : i32
    %c0_i32_1 = arith.constant 0 : i32
    return %c0_i32, %c0_i32_0 : i32, i32
  }
  func.func @transform_1(%arg0: i32) -> (i32, i32, i32, i32) {
    %c0_i32 = arith.constant 0 : i32
    %c0_i32_0 = arith.constant 0 : i32
    %c0_i32_1 = arith.constant 0 : i32
    %c0_i32_2 = arith.constant 0 : i32
    return %arg0, %c0_i32, %c0_i32_0, %c0_i32_1 : i32, i32, i32, i32
  }
  func.func @transform_2(%arg0: i32) -> (i32, i32, i32, i32) {
    %c0_i32 = arith.constant 0 : i32
    %c0_i32_0 = arith.constant 0 : i32
    %c0_i32_1 = arith.constant 0 : i32
    %c0_i32_2 = arith.constant 0 : i32
    return %arg0, %c0_i32, %c0_i32_0, %c0_i32_1 : i32, i32, i32, i32
  }
}

</mosaic_0001>

<bundles_post_ra>
// kernel: tpu_custom_call.1
= control target key start
LH: loop header
LB: loop body
LE: loop exit
PB: predicated region body
PF: predicated region fallthrough
CT: control target
= control target key end

     0   :  { %7 = vsyncpa [#allocation4], 0  ;;  %s5470_s0 = inlined_call_operand.vmem [shape: f32[5,5], index: 0, kind: input, shape index: {}]   ;;  %s5471_s1 = inlined_call_operand.vmem [shape: f32[2,4,20,20], index: 1, kind: input, shape index: {}]   ;;  %s5472_s2 = inlined_call_operand.hbm [shape: f32[2,4,16,16], index: 2, kind: output, shape index: {}]  }
   0x1   :  { %8 = vsyncpa [#allocation3], 0 }
   0x2   :  { %10 = vsyncpa [#allocation3 + $0x1], 0  ;;  %s3043_s9 = smov 0   ;;  %s3045_s10 = smov 0  }
   0x3   :  { %s3047_s11 = smov 0   ;;  %s3049_s12 = smov 0  }
   0x4 LB: > { %s3064_s13 = sadd.s32 4294967295, %s3015_s12   ;;  %s2669_s14 = sadd.s32 4294967294, %s3015_s12   ;;  %s3015_s12 = sphi %s3049_s12, %s5866_s12   ;;  %s3011_s11 = sphi %s3047_s11, %s5865_s11   ;;  %s3007_s10 = sphi %s3045_s10, %s5864_s10   ;;  %s3003_s9 = sphi %s3043_s9, %s5863_s9  }
   0x5   : > { %s3068_s15 = sadd.s32 1, %s3015_s12   ;;  %s70_s16 = sadd.s32 1, %s3011_s11 }
   0x6   : > { %s67_s17 = ssub.s32 %s3015_s12, %s3068_s15  ;;  %p80_p0 = scmp.ne.s32.totalorder %s3011_s11, %s3007_s10 }
   0x7   : > { %p68_p1 = scmp.eq.s32.totalorder %s67_s17, 0  ;;  %p81_p2 = scmp.eq.s32.totalorder %s3064_s13, 1 }
   0x8   : > { %p86_p3 = scmp.ne.s32.totalorder %s3007_s10, %s3003_s9  ;;  %p87_p4 = scmp.eq.s32.totalorder %s2669_s14, 1 }
   0x9   : > { %s3079_s18 = scalar_select %p68_p1, %s3011_s11, %s70_s16  }
   0xa   : > { %p3081_p5 = por %p81_p2, %p80_p0  ;;  %p3085_p6 = por %p87_p4, %p86_p3 }
   0xb   : > { %p2670_p7 = scmp.ge.s32.totalorder %s3015_s12, 1  ;;  %p94_p8 = scmp.lt.s32.totalorder %s3015_s12, 3 }
   0xc   : > { %p2724_p9 = scmp.eq.s32.totalorder %s3064_s13, 0  ;;  %s107_s24 = sshll.u32 %s5470_s0, 4  ;;  %s108_s24 = int_to_ptr.vmem [resolvable:$true] %s107_s24 }
   0xd   : > { %p3092_p10 = pnand %p2670_p7, %p94_p8  ;;  %s2936_s25 = scalar_lea.vmem %s108_s24, 128 }
   0xe   : > { %p2937_p13 = scmp.ne.s32.totalorder %s108_s24, %s2936_s25  ;;  %p2944_p3 = scmp.lt.s32.totalorder %s108_s24, %s108_s24 }
   0xf   : > { %p2716_p11 = pneg %p3092_p10  ;;  %p2945_p4 = scmp.lt.s32.totalorder %s2936_s25, %s2936_s25 }
  0x11   : > { %p2717_p12 = pnand %p2724_p9, %p2716_p11  ;;  %p2946_p7 = por %p2945_p4, %p2944_p3 }
  0x13   : > { %p2938_p0 = pneg %p2717_p12 }
  0x15   : > { %p2939_p1 = pnand %p2938_p0, %p2937_p13 }
  0x17   : > { %p2940_p2 = pneg %p2939_p1 }
  0x19   : > { %p2947_p8 = pnand %p2946_p7, %p2940_p2 }
  0x1b   : > { %2950 = shalt.err (!%p2947_p8)
}
  0x1c   : > { %s3017_s26 = smov [#allocation2]   ;;  %128 = sbr.rel (%p3092_p10) target bundleno = 775 (0x307), region = 28 }
  0x1d   : > { %2719 = dma.vmem_to_smem (!%p2717_p12), %s108_s24, 128, %s3017_s26, [#allocation4]  }
  0x21   : > { %2994 = dma.done.wait (%p2724_p9), [#allocation4], 128  }
  0x22   : > { %2996 = vsyncadd (%p2724_p9), [#allocation4], 4294967168 }
  0x23   : > { %134 = sfence }
  0x24   : > { %p151_p11 = scmp.lt.s32.totalorder %s3064_s13, 1  ;;  %s3018_s4 = smov 126   ;;  %vm402_vm0 = vcmask 146448   ;;  %vm303_vm1 = vcmask 138248   ;;  %vm525_vm2 = vcmask 154648   ;;  %vm648_vm3 = vcmask 162848  }
  0x25   : > { %s3019_s5 = smov 127   ;;  %s2678_s6 = sld [smem:[#allocation2 + $0x2]]  ;;  %vm220_vm4 = vcmask 130048  }
  0x26   : > { %s152_s27 = scalar_select %p151_p11, %s3064_s13, 1 }
  0x27   : > { %s3020_s7 = smov 1   ;;  %s3021_s8 = smov 2  }
  0x28   : > { %s2709_s28 = smul.u32 96, %s152_s27  ;;  %s2677_s14 = sld [smem:[#allocation2 + $0x1]] }
  0x29   : > { %s2679_s16 = sld [smem:[#allocation2 + $0x3]]  ;;  %s3022_s22 = smov 125  }
  0x2a   : > { %s3114_s3 = scalar_lea.vmem %s5471_s1, %s2709_s28  ;;  %s2680_s17 = sld [smem:[#allocation2 + $0x4]] }
  0x2b   : > { %v3117_v0 = vld [vmem:[%s3114_s3 + $0x1a] sm:$0xff]  ;;  %v3120_v1 = vld [vmem:[%s3114_s3 + $0x2] sm:$0xff]  ;;  %v3130_v3 = vld [vmem:[%s3114_s3 + $0xa] sm:$0xff]  ;;  %v424_v50 = vstv %s2678_s6  ;;  %s2682_s21 = sld [smem:[#allocation2 + $0x81]]  ;;  %s3023_s23 = smov 124  }
  0x2c   : > { %v3123_v2 = vld [vmem:[%s3114_s3 + $0x22] sm:$0xff]  ;;  %184 = vrot.lane.b32.xlu1 %v3117_v0, %s3018_s4  ;;  %180 = vrot.lane.b32.xlu0 %v3120_v1, %s3018_s4  ;;  %v3133_v4 = vld [vmem:[%s3114_s3 + $0x3a] sm:$0xff]  ;;  %s3603_s24 = sld [smem:[#allocation2 + $0x82]] }
  0x2d   : > { %v3136_v5 = vld [vmem:[%s3114_s3 + $0x32] sm:$0xff]  ;;  %v3142_v7 = vld [vmem:[%s3114_s3 + $0x4a] sm:$0xff]  ;;  %v3148_v9 = vld [vmem:[%s3114_s3 + $0x20] sm:$0xff]  ;;  %s3661_s25 = sld [smem:[#allocation2 + $0x83]] }
  0x2e   : > { %v3139_v6 = vld [vmem:[%s3114_s3 + $0x52] sm:$0xff]  ;;  %v3145_v8 = vld [vmem:[%s3114_s3 + $0x8] sm:$0xff]  ;;  %v389_v13 = vsub.f32 %v3148_v9, %v3123_v2  ;;  %v3163_v15 = vld [vmem:[%s3114_s3] sm:$0xff]  ;;  %s3730_s26 = sld [smem:[#allocation2 + $0x84]] }
  0x2f   : > { %v3151_v10 = vld [vmem:[%s3114_s3 + $0x38] sm:$0xff]  ;;  %v3154_v11 = vld [vmem:[%s3114_s3 + $0x50] sm:$0xff]  ;;  %v387_v12 = vsub.f32 %v3145_v8, %v3130_v3  ;;  %v3178_v19 = vld [vmem:[%s3114_s3 + $0x48] sm:$0xff]  ;;  %v386_v20 = vsub.f32 %v3163_v15, %v3120_v1  ;;  %s3791_s27 = sld [smem:[#allocation2 + $0x101]] }
  0x30   : > { %v391_v14 = vsub.f32 %v3151_v10, %v3133_v4  ;;  %v3166_v16 = vld [vmem:[%s3114_s3 + $0x18] sm:$0xff]  ;;  %186 = vrot.lane.b32.xlu1 %v3123_v2, %s3018_s4  ;;  %182 = vrot.lane.b32.xlu0 %v3130_v3, %s3018_s4  ;;  %v393_v17 = vsub.f32 %v3154_v11, %v3139_v6  ;;  %v3175_v18 = vld [vmem:[%s3114_s3 + $0x30] sm:$0xff]  ;;  %v397_v23 = vmul.f32 %v389_v13, %v389_v13  ;;  %s3893_s28 = sld [smem:[#allocation2 + $0x102]] }
  0x31   : > { %v388_v21 = vsub.f32 %v3166_v16, %v3117_v0  ;;  %v395_v22 = vmul.f32 %v387_v12, %v387_v12  ;;  %v390_v25 = vsub.f32 %v3175_v18, %v3136_v5  ;;  %v392_v27 = vsub.f32 %v3178_v19, %v3142_v7  ;;  %s4033_s29 = sld [smem:[#allocation2 + $0x103]] }
  0x32   : > { %v399_v24 = vmul.f32 %v391_v14, %v391_v14  ;;  %v401_v26 = vmul.f32 %v393_v17, %v393_v17  ;;  %v394_v28 = vmul.f32 %v386_v20, %v386_v20  ;;  %v411_v31 = vsel %vm402_vm0, %v397_v23, 0.0  ;;  %s4170_s30 = sld [smem:[#allocation2 + $0x104]] }
  0x33   : > { %v396_v29 = vmul.f32 %v388_v21, %v388_v21  ;;  %v410_v30 = vsel %vm402_vm0, %v395_v22, 0.0  ;;  %v398_v33 = vmul.f32 %v390_v25, %v390_v25  ;;  %v400_v35 = vmul.f32 %v392_v27, %v392_v27  ;;  %s4278_s6 = sld [smem:[#allocation2 + $0x181]] }
  0x34   : > { %v413_v32 = vsel %vm402_vm0, %v399_v24, 0.0  ;;  %190 = vrot.lane.b32.xlu1 %v3133_v4, %s3018_s4  ;;  %188 = vrot.lane.b32.xlu0 %v3136_v5, %s3018_s4  ;;  %v412_v34 = vadd.f32 %v411_v31, %v410_v30  ;;  %v403_v36 = vsel %vm402_vm0, %v394_v28, 0.0  ;;  %v415_v37 = vsel %vm402_vm0, %v401_v26, 0.0 }
  0x35   : > { %v404_v38 = vsel %vm402_vm0, %v396_v29, 0.0  ;;  %v406_v39 = vsel %vm402_vm0, %v398_v33, 0.0  ;;  %v408_v42 = vsel %vm402_vm0, %v400_v35, 0.0 }
  0x36   : > { %v414_v40 = vadd.f32 %v413_v32, %v412_v34  ;;  %v405_v41 = vadd.f32 %v404_v38, %v403_v36 }
  0x38   : > { %194 = vrot.lane.b32.xlu1 %v3139_v6, %s3018_s4  ;;  %192 = vrot.lane.b32.xlu0 %v3142_v7, %s3018_s4  ;;  %v416_v43 = vadd.f32 %v415_v37, %v414_v40  ;;  %v407_v44 = vadd.f32 %v406_v39, %v405_v41 }
  0x3a   : > { %v418_v45 = vmul.f32 -0.5, %v416_v43  ;;  %v409_v46 = vadd.f32 %v408_v42, %v407_v44 }
  0x3c   : > { %265 = vrot.lane.b32.xlu1 %v3130_v3, %s3019_s5  ;;  %263 = vrot.lane.b32.xlu0 %v3120_v1, %s3019_s5  ;;  %v421_v47 = vmul.f32 1.442695, %v418_v45  ;;  %v417_v48 = vmul.f32 -0.5, %v409_v46 }
  0x3e   : > { %2769 = vpow2.f32 %v421_v47  ;;  %v419_v49 = vmul.f32 1.442695, %v417_v48 }
  0x40   : > { %269 = vrot.lane.b32.xlu1 %v3123_v2, %s3019_s5  ;;  %267 = vrot.lane.b32.xlu0 %v3117_v0, %s3019_s5  ;;  %2771 = vpow2.f32 %v419_v49 }
  0x44   : > { %273 = vrot.lane.b32.xlu1 %v3133_v4, %s3019_s5  ;;  %271 = vrot.lane.b32.xlu0 %v3136_v5, %s3019_s5 }
  0x48   : > { %277 = vrot.lane.b32.xlu1 %v3139_v6, %s3019_s5  ;;  %275 = vrot.lane.b32.xlu0 %v3142_v7, %s3019_s5 }
  0x4b   : > { %v2770_v51 = vpop.eup %2769 }
  0x4c   : > { %v426_v52 = vmul.f32 %v2770_v51, %v424_v50 }
  0x4d   : > { %v2772_v53 = vpop.eup %2771 }
  0x4e   : > { %431 = vrot.lane.b32.xlu1 %v426_v52, %s3018_s4  ;;  %v425_v54 = vmul.f32 %v2772_v53, %v424_v50  ;;  %v438_v55 = vmul.f32 %v426_v52, %v3145_v8  ;;  %v440_v57 = vmul.f32 %v426_v52, %v3148_v9  ;;  %v442_v59 = vmul.f32 %v426_v52, %v3151_v10 }
  0x4f   : > { %v444_v61 = vmul.f32 %v426_v52, %v3154_v11 }
  0x50   : > { %429 = vrot.lane.b32.xlu0 %v425_v54, %s3018_s4  ;;  %v437_v56 = vmul.f32 %v425_v54, %v3163_v15  ;;  %v439_v58 = vmul.f32 %v425_v54, %v3166_v16  ;;  %v441_v60 = vmul.f32 %v425_v54, %v3175_v18  ;;  %v443_v62 = vmul.f32 %v425_v54, %v3178_v19 }
  0x52   : > { %455 = vrot.lane.b32.xlu1 %v438_v55, %s3018_s4 }
  0x54   : > { %453 = vrot.lane.b32.xlu0 %v437_v56, %s3018_s4 }
  0x56   : > { %459 = vrot.lane.b32.xlu1 %v440_v57, %s3018_s4 }
  0x58   : > { %457 = vrot.lane.b32.xlu0 %v439_v58, %s3018_s4 }
  0x5a   : > { %463 = vrot.lane.b32.xlu1 %v442_v59, %s3018_s4 }
  0x5c   : > { %461 = vrot.lane.b32.xlu0 %v441_v60, %s3018_s4 }
  0x5e   : > { %467 = vrot.lane.b32.xlu1 %v444_v61, %s3018_s4 }
  0x60   : > { %465 = vrot.lane.b32.xlu0 %v443_v62, %s3018_s4 }
  0x62   : > { %487 = vrot.lane.b32.xlu1 %v3130_v3, %s3020_s7 }
  0x64   : > { %485 = vrot.lane.b32.xlu0 %v3120_v1, %s3020_s7 }
  0x66   : > { %491 = vrot.lane.b32.xlu1 %v3123_v2, %s3020_s7 }
  0x68   : > { %489 = vrot.lane.b32.xlu0 %v3117_v0, %s3020_s7 }
  0x6a   : > { %495 = vrot.lane.b32.xlu1 %v3133_v4, %s3020_s7 }
  0x6c   : > { %493 = vrot.lane.b32.xlu0 %v3136_v5, %s3020_s7 }
  0x6e   : > { %499 = vrot.lane.b32.xlu1 %v3139_v6, %s3020_s7 }
  0x70   : > { %497 = vrot.lane.b32.xlu0 %v3142_v7, %s3020_s7  ;;  %s4418_s7 = sld [smem:[#allocation2 + $0x182]] }
  0x72   : > { %610 = vrot.lane.b32.xlu1 %v3130_v3, %s3021_s8 }
  0x74   : > { %608 = vrot.lane.b32.xlu0 %v3120_v1, %s3021_s8 }
  0x76   : > { %614 = vrot.lane.b32.xlu1 %v3123_v2, %s3021_s8 }
  0x78   : > { %612 = vrot.lane.b32.xlu0 %v3117_v0, %s3021_s8 }
  0x7a   : > { %618 = vrot.lane.b32.xlu1 %v3133_v4, %s3021_s8 }
  0x7c   : > { %616 = vrot.lane.b32.xlu0 %v3136_v5, %s3021_s8 }
  0x7e   : > { %622 = vrot.lane.b32.xlu1 %v3139_v6, %s3021_s8 }
  0x80   : > { %620 = vrot.lane.b32.xlu0 %v3142_v7, %s3021_s8  ;;  %s4567_s8 = sld [smem:[#allocation2 + $0x183]] }
  0x9e   : > { %v3254_v63 = vpop.permute.xlu1 %184  ;;  %v3256_v12 = vpop.permute.xlu0 %180 }
  0x9f   : > { %5556 = vst [vmem:[#allocation8_spill] sm:$0xff] %v3254_v63  ;;  %5557 = vst [vmem:[#allocation9_spill] sm:$0xff] %v3256_v12 }
  0xa2   : > { %v3258_v13 = vpop.permute.xlu1 %186  ;;  %v3260_v14 = vpop.permute.xlu0 %182 }
  0xa3   : > { %5558 = vst [vmem:[#allocation10_spill] sm:$0xff] %v3258_v13  ;;  %5559 = vst [vmem:[#allocation11_spill] sm:$0xff] %v3260_v14 }
  0xa6   : > { %v3262_v17 = vpop.permute.xlu1 %190  ;;  %v3264_v20 = vpop.permute.xlu0 %188 }
  0xa7   : > { %5560 = vst [vmem:[#allocation12_spill] sm:$0xff] %v3262_v17  ;;  %5561 = vst [vmem:[#allocation13_spill] sm:$0xff] %v3264_v20 }
  0xaa   : > { %v3266_v21 = vpop.permute.xlu1 %194  ;;  %v3268_v22 = vpop.permute.xlu0 %192 }
  0xab   : > { %5562 = vst [vmem:[#allocation14_spill] sm:$0xff] %v3266_v21  ;;  %5563 = vst [vmem:[#allocation15_spill] sm:$0xff] %v3268_v22 }
  0xae   : > { %v3270_v23 = vpop.permute.xlu1 %265  ;;  %v3272_v24 = vpop.permute.xlu0 %263 }
  0xaf   : > { %5564 = vst [vmem:[#allocation16_spill] sm:$0xff] %v3270_v23  ;;  %5565 = vst [vmem:[#allocation17_spill] sm:$0xff] %v3272_v24  ;;  %v288_v29 = vsub.f32 %v3145_v8, %v3270_v23  ;;  %v287_v35 = vsub.f32 %v3163_v15, %v3272_v24 }
  0xb1   : > { %v296_v34 = vmul.f32 %v288_v29, %v288_v29  ;;  %v295_v43 = vmul.f32 %v287_v35, %v287_v35 }
  0xb2   : > { %v3274_v25 = vpop.permute.xlu1 %269  ;;  %v3276_v26 = vpop.permute.xlu0 %267 }
  0xb3   : > { %5566 = vst [vmem:[#allocation18_spill] sm:$0xff] %v3274_v25  ;;  %5567 = vst [vmem:[#allocation19_spill] sm:$0xff] %v3276_v26  ;;  %v290_v28 = vsub.f32 %v3148_v9, %v3274_v25  ;;  %v289_v33 = vsub.f32 %v3166_v16, %v3276_v26  ;;  %v311_v42 = vsel %vm303_vm1, %v296_v34, 0.0  ;;  %v304_v51 = vsel %vm303_vm1, %v295_v43, 0.0 }
  0xb4   : > { %v325_v34 = vstv %s2677_s14  ;;  %s4666_s14 = sld [smem:[#allocation2]] }
  0xb5   : > { %v298_v32 = vmul.f32 %v290_v28, %v290_v28  ;;  %v297_v40 = vmul.f32 %v289_v33, %v289_v33 }
  0xb6   : > { %v3278_v27 = vpop.permute.xlu1 %273  ;;  %v3286_v31 = vpop.permute.xlu0 %271 }
  0xb7   : > { %5568 = vst [vmem:[#allocation20_spill] sm:$0xff] %v3278_v27  ;;  %v292_v30 = vsub.f32 %v3151_v10, %v3278_v27  ;;  %5569 = vst [vmem:[#allocation21_spill] sm:$0xff] %v3286_v31  ;;  %v291_v37 = vsub.f32 %v3175_v18, %v3286_v31  ;;  %v312_v39 = vsel %vm303_vm1, %v298_v32, 0.0  ;;  %v305_v48 = vsel %vm303_vm1, %v297_v40, 0.0 }
  0xb8   : > { %v313_v46 = vadd.f32 %v312_v39, %v311_v42  ;;  %v306_v55 = vadd.f32 %v305_v48, %v304_v51 }
  0xb9   : > { %v300_v36 = vmul.f32 %v292_v30, %v292_v30  ;;  %v299_v45 = vmul.f32 %v291_v37, %v291_v37 }
  0xba   : > { %v3294_v38 = vpop.permute.xlu1 %277  ;;  %v3301_v47 = vpop.permute.xlu0 %275 }
  0xbb   : > { %5570 = vst [vmem:[#allocation22_spill] sm:$0xff] %v3294_v38  ;;  %v294_v41 = vsub.f32 %v3154_v11, %v3294_v38  ;;  %v314_v44 = vsel %vm303_vm1, %v300_v36, 0.0  ;;  %5571 = vst [vmem:[#allocation23_spill] sm:$0xff] %v3301_v47  ;;  %v307_v52 = vsel %vm303_vm1, %v299_v45, 0.0  ;;  %v293_v54 = vsub.f32 %v3178_v19, %v3301_v47 }
  0xbc   : > { %v315_v50 = vadd.f32 %v314_v44, %v313_v46  ;;  %v308_v58 = vadd.f32 %v307_v52, %v306_v55 }
  0xbd   : > { %v302_v49 = vmul.f32 %v294_v41, %v294_v41  ;;  %v301_v57 = vmul.f32 %v293_v54, %v293_v54 }
  0xbf   : > { %v316_v53 = vsel %vm303_vm1, %v302_v49, 0.0  ;;  %v309_v60 = vsel %vm303_vm1, %v301_v57, 0.0 }
  0xc0   : > { %v317_v56 = vadd.f32 %v316_v53, %v315_v50  ;;  %v310_v62 = vadd.f32 %v309_v60, %v308_v58  ;;  %v3310_v29 = vpop.permute.xlu1 %431 }
  0xc1   : > { %5572 = vst [vmem:[#allocation24_spill] sm:$0xff] %v3310_v29 }
  0xc2   : > { %v319_v59 = vmul.f32 -0.5, %v317_v56  ;;  %v318_v28 = vmul.f32 -0.5, %v310_v62  ;;  %v3312_v32 = vpop.permute.xlu0 %429 }
  0xc3   : > { %5573 = vst [vmem:[#allocation25_spill] sm:$0xff] %v3312_v32  ;;  %v3389_v32 = vld [vmem:[%s3114_s3 + $0x39] sm:$0xff] }
  0xc4   : > { %v322_v61 = vmul.f32 1.442695, %v319_v59  ;;  %v320_v30 = vmul.f32 1.442695, %v318_v28  ;;  %v3314_v33 = vpop.permute.xlu1 %455 }
  0xc5   : > { %5574 = vst [vmem:[#allocation26_spill] sm:$0xff] %v3314_v33 }
  0xc6   : > { %2773 = vpow2.f32 %v322_v61  ;;  %v3316_v36 = vpop.permute.xlu0 %453 }
  0xc7   : > { %2775 = vpow2.f32 %v320_v30  ;;  %5575 = vst [vmem:[#allocation27_spill] sm:$0xff] %v3316_v36 }
  0xc8   : > { %v3318_v37 = vpop.permute.xlu1 %459 }
  0xc9   : > { %5576 = vst [vmem:[#allocation28_spill] sm:$0xff] %v3318_v37 }
  0xca   : > { %v3324_v41 = vpop.permute.xlu0 %457 }
  0xcb   : > { %5577 = vst [vmem:[#allocation29_spill] sm:$0xff] %v3324_v41  ;;  %v3373_v41 = vld [vmem:[%s3114_s3 + $0x21] sm:$0xff] }
  0xcc   : > { %v3326_v42 = vpop.permute.xlu1 %463 }
  0xcd   : > { %5578 = vst [vmem:[#allocation30_spill] sm:$0xff] %v3326_v42 }
  0xce   : > { %v3332_v44 = vpop.permute.xlu0 %461 }
  0xcf   : > { %5579 = vst [vmem:[#allocation31_spill] sm:$0xff] %v3332_v44 }
  0xd0   : > { %v3334_v45 = vpop.permute.xlu1 %467 }
  0xd1   : > { %5580 = vst [vmem:[#allocation32_spill] sm:$0xff] %v3334_v45 }
  0xd2   : > { %v3336_v46 = vpop.permute.xlu0 %465 }
  0xd3   : > { %v2774_v35 = vpop.eup %2773  ;;  %5581 = vst [vmem:[#allocation33_spill] sm:$0xff] %v3336_v46 }
  0xd4   : > { %v3320_v39 = vmul.f32 %v2774_v35, %v325_v34  ;;  %v2776_v40 = vpop.eup %2775  ;;  %v3338_v48 = vpop.permute.xlu1 %487 }
  0xd5   : > { %v3328_v43 = vmul.f32 %v2776_v40, %v325_v34  ;;  %v510_v57 = vsub.f32 %v3145_v8, %v3338_v48 }
  0xd6   : > { %332 = vrot.lane.b32.xlu1 %v3320_v39, %s3019_s5  ;;  %v3340_v49 = vpop.permute.xlu0 %485 }
  0xd7   : > { %330 = vrot.lane.b32.xlu0 %v3328_v43, %s3019_s5  ;;  %5582 = vst [vmem:[#allocation34_spill] sm:$0xff] %v3340_v49  ;;  %v509_v61 = vsub.f32 %v3163_v15, %v3340_v49  ;;  %v518_v40 = vmul.f32 %v510_v57, %v510_v57 }
  0xd8   : > { %v3342_v50 = vpop.permute.xlu1 %491 }
  0xd9   : > { %v512_v55 = vsub.f32 %v3148_v9, %v3342_v50  ;;  %v517_v45 = vmul.f32 %v509_v61, %v509_v61  ;;  %v533_v61 = vsel %vm525_vm2, %v518_v40, 0.0  ;;  %v3399_v40 = vld [vmem:[%s3114_s3 + $0x51] sm:$0xff] }
  0xda   : > { %v3344_v51 = vpop.permute.xlu0 %489 }
  0xdb   : > { %5583 = vst [vmem:[#allocation35_spill] sm:$0xff] %v3344_v51  ;;  %v511_v56 = vsub.f32 %v3166_v16, %v3344_v51  ;;  %v520_v28 = vmul.f32 %v512_v55, %v512_v55 }
  0xdc   : > { %v3346_v52 = vpop.permute.xlu1 %495 }
  0xdd   : > { %v514_v58 = vsub.f32 %v3151_v10, %v3346_v52  ;;  %v519_v34 = vmul.f32 %v511_v56, %v511_v56  ;;  %v534_v42 = vsel %vm525_vm2, %v520_v28, 0.0  ;;  %v800_v56 = vsub.f32 %v3373_v41, %v3274_v25 }
  0xde   : > { %v3348_v53 = vpop.permute.xlu0 %493  ;;  %v535_v29 = vadd.f32 %v534_v42, %v533_v61 }
  0xdf   : > { %5584 = vst [vmem:[#allocation36_spill] sm:$0xff] %v3348_v53  ;;  %v513_v62 = vsub.f32 %v3175_v18, %v3348_v53  ;;  %v522_v46 = vmul.f32 %v514_v58, %v514_v58  ;;  %v527_v57 = vsel %vm525_vm2, %v519_v34, 0.0  ;;  %v3384_v58 = vld [vmem:[%s3114_s3 + $0x9] sm:$0xff]  ;;  %v802_v34 = vsub.f32 %v3389_v32, %v3278_v27 }
  0xe0   : > { %v3350_v54 = vpop.permute.xlu1 %499  ;;  %v798_v28 = vsub.f32 %v3384_v58, %v3270_v23  ;;  %v3433_v27 = vld [vmem:[%s3114_s3 + $0x49] sm:$0xff] }
  0xe1   : > { %5585 = vst [vmem:[#allocation37_spill] sm:$0xff] %v3350_v54  ;;  %v516_v30 = vsub.f32 %v3154_v11, %v3350_v54  ;;  %v521_v44 = vmul.f32 %v513_v62, %v513_v62  ;;  %v536_v62 = vsel %vm525_vm2, %v522_v46, 0.0  ;;  %v808_v46 = vmul.f32 %v800_v56, %v800_v56 }
  0xe2   : > { %v3360_v59 = vpop.permute.xlu0 %497  ;;  %v537_v20 = vadd.f32 %v536_v62, %v535_v29  ;;  %v806_v14 = vmul.f32 %v798_v28, %v798_v28  ;;  %v3411_v29 = vld [vmem:[%s3114_s3 + $0x19] sm:$0xff] }
  0xe3   : > { %5586 = vst [vmem:[#allocation38_spill] sm:$0xff] %v3360_v59  ;;  %v515_v35 = vsub.f32 %v3178_v19, %v3360_v59  ;;  %v524_v36 = vmul.f32 %v516_v30, %v516_v30  ;;  %v526_v30 = vsel %vm525_vm2, %v517_v45, 0.0  ;;  %v529_v22 = vsel %vm525_vm2, %v521_v44, 0.0 }
  0xe4   : > { %v3362_v60 = vpop.permute.xlu1 %610  ;;  %v804_v45 = vsub.f32 %v3399_v40, %v3294_v38  ;;  %v799_v28 = vsub.f32 %v3411_v29, %v3276_v26 }
  0xe5   : > { %5587 = vst [vmem:[#allocation39_spill] sm:$0xff] %v3362_v60  ;;  %v523_v33 = vmul.f32 %v515_v35, %v515_v35  ;;  %v528_v35 = vadd.f32 %v527_v57, %v526_v30  ;;  %v538_v21 = vsel %vm525_vm2, %v524_v36, 0.0  ;;  %v810_v30 = vmul.f32 %v802_v34, %v802_v34 }
  0xe6   : > { %v3376_v55 = vpop.permute.xlu0 %608  ;;  %v539_v57 = vadd.f32 %v538_v21, %v537_v20  ;;  %v812_v20 = vmul.f32 %v804_v45, %v804_v45  ;;  %v3421_v21 = vld [vmem:[%s3114_s3 + $0x1] sm:$0xff]  ;;  %v820_v34 = vsel %vm303_vm1, %v806_v14, 0.0  ;;  %v807_v23 = vmul.f32 %v799_v28, %v799_v28 }
  0xe7   : > { %5588 = vst [vmem:[#allocation40_spill] sm:$0xff] %v3376_v55  ;;  %v531_v17 = vsel %vm525_vm2, %v523_v33, 0.0  ;;  %v530_v42 = vadd.f32 %v529_v22, %v528_v35  ;;  %v821_v33 = vsel %vm303_vm1, %v808_v46, 0.0  ;;  %v633_v22 = vsub.f32 %v3145_v8, %v3362_v60 }
  0xe8   : > { %v3378_v37 = vpop.permute.xlu1 %614  ;;  %v797_v46 = vsub.f32 %v3421_v21, %v3272_v24  ;;  %v822_v13 = vadd.f32 %v821_v33, %v820_v34  ;;  %v823_v12 = vsel %vm303_vm1, %v810_v30, 0.0  ;;  %v825_v33 = vsel %vm303_vm1, %v812_v20, 0.0 }
  0xe9   : > { %5589 = vst [vmem:[#allocation41_spill] sm:$0xff] %v3378_v37  ;;  %v635_v36 = vsub.f32 %v3148_v9, %v3378_v37  ;;  %v532_v56 = vadd.f32 %v531_v17, %v530_v42  ;;  %v541_v17 = vmul.f32 -0.5, %v539_v57  ;;  %v3425_v42 = vld [vmem:[%s3114_s3 + $0x31] sm:$0xff]  ;;  %v641_v26 = vmul.f32 %v633_v22, %v633_v22 }
  0xea   : > { %v3404_v61 = vpop.permute.xlu0 %612  ;;  %v801_v45 = vsub.f32 %v3425_v42, %v3286_v31  ;;  %v803_v30 = vsub.f32 %v3433_v27, %v3301_v47  ;;  %v632_v34 = vsub.f32 %v3163_v15, %v3376_v55  ;;  %v805_v24 = vmul.f32 %v797_v46, %v797_v46 }
  0xeb   : > { %5590 = vst [vmem:[#allocation42_spill] sm:$0xff] %v3404_v61  ;;  %v643_v35 = vmul.f32 %v635_v36, %v635_v36  ;;  %v540_v63 = vmul.f32 -0.5, %v532_v56  ;;  %v634_v14 = vsub.f32 %v3166_v16, %v3404_v61  ;;  %v544_v56 = vmul.f32 1.442695, %v541_v17 }
  0xec   : > { %v3406_v44 = vpop.permute.xlu1 %618  ;;  %v809_v20 = vmul.f32 %v801_v45, %v801_v45  ;;  %v656_v61 = vsel %vm648_vm3, %v641_v26, 0.0  ;;  %v811_v37 = vmul.f32 %v803_v30, %v803_v30 }
  0xed   : > { %5591 = vst [vmem:[#allocation43_spill] sm:$0xff] %v3406_v44  ;;  %v637_v62 = vsub.f32 %v3151_v10, %v3406_v44  ;;  %v657_v31 = vsel %vm648_vm3, %v643_v35, 0.0  ;;  %v542_v25 = vmul.f32 1.442695, %v540_v63  ;;  %v642_v47 = vmul.f32 %v634_v14, %v634_v14 }
  0xee   : > { %v3430_v38 = vpop.permute.xlu0 %616  ;;  %v814_v44 = vsel %vm303_vm1, %v807_v23, 0.0  ;;  %v658_v60 = vadd.f32 %v657_v31, %v656_v61  ;;  %2777 = vpow2.f32 %v544_v56  ;;  %v816_v26 = vsel %vm303_vm1, %v809_v20, 0.0 }
  0xef   : > { %5592 = vst [vmem:[#allocation44_spill] sm:$0xff] %v3430_v38  ;;  %v645_v57 = vmul.f32 %v637_v62, %v637_v62  ;;  %v636_v22 = vsub.f32 %v3175_v18, %v3430_v38  ;;  %v824_v62 = vadd.f32 %v823_v12, %v822_v13  ;;  %v640_v38 = vmul.f32 %v632_v34, %v632_v34 }
  0xf0   : > { %v3439_v36 = vpop.permute.xlu1 %622  ;;  %2779 = vpow2.f32 %v542_v25  ;;  %v813_v13 = vsel %vm303_vm1, %v805_v24, 0.0  ;;  %v650_v45 = vsel %vm648_vm3, %v642_v47, 0.0  ;;  %v818_v61 = vsel %vm303_vm1, %v811_v37, 0.0 }
  0xf1   : > { %v639_v28 = vsub.f32 %v3154_v11, %v3439_v36  ;;  %v659_v17 = vsel %vm648_vm3, %v645_v57, 0.0  ;;  %v826_v55 = vadd.f32 %v825_v33, %v824_v62  ;;  %v644_v46 = vmul.f32 %v636_v22, %v636_v22 }
  0xf2   : > { %v660_v63 = vadd.f32 %v659_v17, %v658_v60  ;;  %v3454_v12 = vpop.permute.xlu0 %620  ;;  %v815_v23 = vadd.f32 %v814_v44, %v813_v13  ;;  %v649_v33 = vsel %vm648_vm3, %v640_v38, 0.0 }
  0xf3   : > { %v647_v35 = vmul.f32 %v639_v28, %v639_v28  ;;  %5593 = vst [vmem:[#allocation45_spill] sm:$0xff] %v3454_v12  ;;  %v828_v57 = vmul.f32 -0.5, %v826_v55  ;;  %v652_v25 = vsel %vm648_vm3, %v644_v46, 0.0  ;;  %v638_v60 = vsub.f32 %v3178_v19, %v3454_v12 }
  0xf4   : > { %v817_v30 = vadd.f32 %v816_v26, %v815_v23  ;;  %v651_v24 = vadd.f32 %v650_v45, %v649_v33  ;;  %v670_v45 = vstv %s2680_s17  ;;  %s4687_s17 = sld [smem:[#allocation2 + $0x80]] }
  0xf5   : > { %v661_v14 = vsel %vm648_vm3, %v647_v35, 0.0  ;;  %v646_v34 = vmul.f32 %v638_v60, %v638_v60  ;;  %v831_v22 = vmul.f32 1.442695, %v828_v57  ;;  %v339_v60 = vmul.f32 %v3320_v39, %v3145_v8 }
  0xf6   : > { %v662_v31 = vadd.f32 %v661_v14, %v660_v63  ;;  %v819_v47 = vadd.f32 %v818_v61, %v817_v30  ;;  %v653_v62 = vadd.f32 %v652_v25, %v651_v24  ;;  %v547_v63 = vstv %s2679_s16  ;;  %s4680_s16 = sld [smem:[#allocation2 + $0x184]] }
  0xf7   : > { %v654_v55 = vsel %vm648_vm3, %v646_v34, 0.0  ;;  %v338_v34 = vmul.f32 %v3328_v43, %v3163_v15 }
  0xf8   : > { %v664_v56 = vmul.f32 -0.5, %v662_v31  ;;  %v655_v37 = vadd.f32 %v654_v55, %v653_v62  ;;  %v827_v38 = vmul.f32 -0.5, %v819_v47  ;;  %v834_v31 = vstv %s2682_s21  ;;  %s4711_s21 = sld [smem:[#allocation2 + $0x100]] }
  0xf9   : > { %v340_v47 = vmul.f32 %v3328_v43, %v3166_v16  ;;  %v345_v62 = vmul.f32 %v3320_v39, %v3154_v11  ;;  %v898_v55 = vsub.f32 %v3373_v41, %v3123_v2 }
  0xfa   : > { %v667_v28 = vmul.f32 1.442695, %v664_v56  ;;  %v663_v44 = vmul.f32 -0.5, %v655_v37  ;;  %v829_v46 = vmul.f32 1.442695, %v827_v38  ;;  %v341_v56 = vmul.f32 %v3320_v39, %v3148_v9 }
  0xfb   : > { %v2778_v20 = vpop.eup %2777  ;;  %v342_v37 = vmul.f32 %v3328_v43, %v3175_v18 }
  0xfc   : > { %2781 = vpow2.f32 %v667_v28  ;;  %v665_v17 = vmul.f32 1.442695, %v663_v44  ;;  %v3466_v13 = vmul.f32 %v2778_v20, %v547_v63  ;;  %v896_v28 = vsub.f32 %v3384_v58, %v3130_v3 }
  0xfd   : > { %2783 = vpow2.f32 %v831_v22  ;;  %v2780_v35 = vpop.eup %2779  ;;  %v343_v22 = vmul.f32 %v3320_v39, %v3151_v10  ;;  %v900_v39 = vsub.f32 %v3389_v32, %v3133_v4  ;;  %v906_v20 = vmul.f32 %v898_v55, %v898_v55 }
  0xfe   : > { %2785 = vpow2.f32 %v665_v17  ;;  %v3468_v26 = vmul.f32 %v2780_v35, %v547_v63  ;;  %554 = vrot.lane.b32.xlu1 %v3466_v13, %s3022_s22  ;;  %v561_v38 = vmul.f32 %v3466_v13, %v3145_v8  ;;  %v904_v44 = vmul.f32 %v896_v28, %v896_v28 }
  0xff   : > { %2787 = vpow2.f32 %v829_v46  ;;  %v344_v3 = vmul.f32 %v3328_v43, %v3178_v19  ;;  %v563_v2 = vmul.f32 %v3466_v13, %v3148_v9  ;;  %v902_v17 = vsub.f32 %v3399_v40, %v3139_v6 }
 0x100   : > { %552 = vrot.lane.b32.xlu0 %v3468_v26, %s3022_s22  ;;  %v895_v35 = vsub.f32 %v3421_v21, %v3120_v1  ;;  %v908_v46 = vmul.f32 %v900_v39, %v900_v39  ;;  %v918_v4 = vsel %vm402_vm0, %v904_v44, 0.0  ;;  %v919_v63 = vsel %vm402_vm0, %v906_v20, 0.0 }
 0x101   : > { %v897_v43 = vsub.f32 %v3411_v29, %v3117_v0  ;;  %v910_v6 = vmul.f32 %v902_v17, %v902_v17  ;;  %v920_v1 = vadd.f32 %v919_v63, %v918_v4  ;;  %v562_v0 = vmul.f32 %v3468_v26, %v3166_v16 }
 0x102   : > { %v564_v28 = vmul.f32 %v3468_v26, %v3175_v18  ;;  %v566_v39 = vmul.f32 %v3468_v26, %v3178_v19  ;;  %v998_v4 = vsub.f32 %v3389_v32, %v3346_v52 }
 0x109   : > { %v2782_v14 = vpop.eup %2781 }
 0x10a   : > { %v3474_v23 = vmul.f32 %v2782_v14, %v670_v45  ;;  %v2784_v57 = vpop.eup %2783  ;;  %v565_v14 = vmul.f32 %v3466_v13, %v3151_v10 }
 0x10b   : > { %v3478_v61 = vmul.f32 %v2784_v57, %v834_v31  ;;  %v2786_v33 = vpop.eup %2785  ;;  %v921_v57 = vsel %vm402_vm0, %v908_v46, 0.0  ;;  %v994_v46 = vsub.f32 %v3384_v58, %v3338_v48 }
 0x10c   : > { %677 = vrot.lane.b32.xlu1 %v3474_v23, %s3023_s23  ;;  %v3482_v25 = vmul.f32 %v2786_v33, %v670_v45  ;;  %v2788_v30 = vpop.eup %2787  ;;  %v560_v45 = vmul.f32 %v3468_v26, %v3163_v15  ;;  %v903_v33 = vmul.f32 %v895_v35, %v895_v35  ;;  %v686_v44 = vmul.f32 %v3474_v23, %v3148_v9 }
 0x10d   : > { %v3489_v24 = vmul.f32 %v2788_v30, %v834_v31  ;;  %v899_v31 = vsub.f32 %v3425_v42, %v3136_v5  ;;  %v567_v30 = vmul.f32 %v3466_v13, %v3154_v11  ;;  %v684_v13 = vmul.f32 %v3474_v23, %v3145_v8 }
 0x10e   : > { %675 = vrot.lane.b32.xlu0 %v3482_v25, %s3023_s23  ;;  %v911_v5 = vsel %vm402_vm0, %v903_v33, 0.0  ;;  %v688_v17 = vmul.f32 %v3474_v23, %v3151_v10  ;;  %v996_v26 = vsub.f32 %v3373_v41, %v3342_v50  ;;  %v690_v10 = vmul.f32 %v3474_v23, %v3154_v11 }
 0x10f   : > { %v995_v23 = vsub.f32 %v3411_v29, %v3344_v51 }
 0x110   : > { %841 = vrot.lane.b32.xlu1 %v3478_v61, %s3019_s5  ;;  %v1004_v63 = vmul.f32 %v996_v26, %v996_v26 }
 0x112   : > { %839 = vrot.lane.b32.xlu0 %v3489_v24, %s3019_s5  ;;  %v1017_v11 = vsel %vm525_vm2, %v1004_v63, 0.0  ;;  %v5596_v63 = vld [vmem:[#allocation43_spill] sm:$0xff] }
 0x114   : > { %356 = vrot.lane.b32.xlu1 %v339_v60, %s3019_s5  ;;  %v905_v60 = vmul.f32 %v897_v43, %v897_v43  ;;  %v1000_v43 = vsub.f32 %v3399_v40, %v3350_v54 }
 0x116   : > { %354 = vrot.lane.b32.xlu0 %v338_v34, %s3019_s5  ;;  %v901_v34 = vsub.f32 %v3433_v27, %v3142_v7 }
 0x118   : > { %360 = vrot.lane.b32.xlu1 %v341_v56, %s3019_s5  ;;  %v922_v56 = vadd.f32 %v921_v57, %v920_v1  ;;  %v909_v7 = vmul.f32 %v901_v34, %v901_v34  ;;  %v687_v1 = vmul.f32 %v3482_v25, %v3175_v18  ;;  %v1008_v57 = vmul.f32 %v1000_v43, %v1000_v43 }
 0x119   : > { %v850_v34 = vmul.f32 %v3478_v61, %v3373_v41  ;;  %v1096_v43 = vsub.f32 %v3389_v32, %v5596_v63 }
 0x11a   : > { %358 = vrot.lane.b32.xlu0 %v340_v47, %s3019_s5  ;;  %v907_v47 = vmul.f32 %v899_v31, %v899_v31 }
 0x11c   : > { %364 = vrot.lane.b32.xlu1 %v343_v22, %s3019_s5  ;;  %v923_v22 = vsel %vm402_vm0, %v910_v6, 0.0  ;;  %v1006_v6 = vmul.f32 %v998_v4, %v998_v4 }
 0x11d   : > { %v924_v55 = vadd.f32 %v923_v22, %v922_v56  ;;  %v689_v56 = vmul.f32 %v3482_v25, %v3178_v19  ;;  %v1003_v22 = vmul.f32 %v995_v23, %v995_v23  ;;  %v847_v19 = vmul.f32 %v3489_v24, %v3421_v21 }
 0x11e   : > { %362 = vrot.lane.b32.xlu0 %v342_v37, %s3019_s5  ;;  %v1019_v18 = vsel %vm525_vm2, %v1006_v6, 0.0 }
 0x11f   : > { %v926_v8 = vmul.f32 -0.5, %v924_v55 }
 0x120   : > { %368 = vrot.lane.b32.xlu1 %v345_v62, %s3019_s5  ;;  %v912_v62 = vsel %vm402_vm0, %v905_v60, 0.0  ;;  %v993_v60 = vsub.f32 %v3421_v21, %v3340_v49 }
 0x121   : > { %v913_v37 = vadd.f32 %v912_v62, %v911_v5  ;;  %v929_v9 = vmul.f32 1.442695, %v926_v8  ;;  %v999_v5 = vsub.f32 %v3433_v27, %v3360_v59  ;;  %v932_v8 = vstv %s3603_s24  ;;  %s4747_s24 = sld [smem:[#allocation2 + $0x201]] }
 0x122   : > { %366 = vrot.lane.b32.xlu0 %v344_v3, %s3019_s5  ;;  %v916_v3 = vsel %vm402_vm0, %v909_v7, 0.0 }
 0x123   : > { %2789 = vpow2.f32 %v929_v9  ;;  %v1007_v7 = vmul.f32 %v999_v5, %v999_v5  ;;  %v5594_v9 = vld [vmem:[#allocation41_spill] sm:$0xff] }
 0x124   : > { %578 = vrot.lane.b32.xlu1 %v561_v38, %s3022_s22  ;;  %v914_v38 = vsel %vm402_vm0, %v907_v47, 0.0  ;;  %v1021_v47 = vsel %vm525_vm2, %v1008_v57, 0.0  ;;  %v1104_v57 = vmul.f32 %v1096_v43, %v1096_v43 }
 0x125   : > { %v915_v20 = vadd.f32 %v914_v38, %v913_v37  ;;  %v1010_v37 = vsel %vm525_vm2, %v1003_v22, 0.0  ;;  %v1014_v26 = vsel %vm525_vm2, %v1007_v7, 0.0 }
 0x126   : > { %576 = vrot.lane.b32.xlu0 %v560_v45, %s3022_s22 }
 0x127   : > { %v917_v35 = vadd.f32 %v916_v3, %v915_v20 }
 0x128   : > { %582 = vrot.lane.b32.xlu1 %v563_v2, %s3022_s22  ;;  %v683_v2 = vmul.f32 %v3482_v25, %v3163_v15  ;;  %v685_v15 = vmul.f32 %v3482_v25, %v3166_v16  ;;  %v848_v16 = vmul.f32 %v3478_v61, %v3384_v58  ;;  %v852_v25 = vmul.f32 %v3478_v61, %v3389_v32 }
 0x129   : > { %v925_v45 = vmul.f32 -0.5, %v917_v35  ;;  %v1094_v35 = vsub.f32 %v3373_v41, %v5594_v9 }
 0x12a   : > { %580 = vrot.lane.b32.xlu0 %v562_v0, %s3022_s22  ;;  %v997_v0 = vsub.f32 %v3425_v42, %v3348_v53 }
 0x12b   : > { %v927_v31 = vmul.f32 1.442695, %v925_v45  ;;  %v1102_v6 = vmul.f32 %v1094_v35, %v1094_v35 }
 0x12c   : > { %586 = vrot.lane.b32.xlu1 %v565_v14, %s3022_s22  ;;  %v1002_v14 = vmul.f32 %v994_v46, %v994_v46 }
 0x12d   : > { %2791 = vpow2.f32 %v927_v31 }
 0x12e   : > { %584 = vrot.lane.b32.xlu0 %v564_v28, %s3022_s22  ;;  %v1016_v33 = vsel %vm525_vm2, %v1002_v14, 0.0  ;;  %v1001_v28 = vmul.f32 %v993_v60, %v993_v60  ;;  %v1115_v60 = vsel %vm648_vm3, %v1102_v6, 0.0 }
 0x130   : > { %590 = vrot.lane.b32.xlu1 %v567_v30, %s3022_s22  ;;  %v1018_v30 = vadd.f32 %v1017_v11, %v1016_v33  ;;  %v2790_v38 = vpop.eup %2789  ;;  %v853_v33 = vmul.f32 %v3489_v24, %v3433_v27 }
 0x131   : > { %v934_v4 = vmul.f32 %v2790_v38, %v932_v8 }
 0x132   : > { %588 = vrot.lane.b32.xlu0 %v566_v39, %s3022_s22  ;;  %v1020_v62 = vadd.f32 %v1019_v18, %v1018_v30  ;;  %v1009_v39 = vsel %vm525_vm2, %v1001_v28, 0.0  ;;  %v5597_v18 = vld [vmem:[#allocation42_spill] sm:$0xff] }
 0x133   : > { %v1011_v20 = vadd.f32 %v1010_v37, %v1009_v39  ;;  %v1097_v37 = vsub.f32 %v3433_v27, %v3454_v12  ;;  %v950_v39 = vmul.f32 %v934_v4, %v3389_v32 }
 0x134   : > { %701 = vrot.lane.b32.xlu1 %v684_v13, %s3023_s23  ;;  %v1005_v13 = vmul.f32 %v997_v0, %v997_v0  ;;  %v1022_v55 = vadd.f32 %v1021_v47, %v1020_v62  ;;  %v1093_v0 = vsub.f32 %v3411_v29, %v5597_v18  ;;  %v5598_v47 = vld [vmem:[#allocation40_spill] sm:$0xff] }
 0x135   : > { %v1091_v5 = vsub.f32 %v3421_v21, %v5598_v47  ;;  %v5599_v62 = vld [vmem:[#allocation44_spill] sm:$0xff] }
 0x136   : > { %699 = vrot.lane.b32.xlu0 %v683_v2, %s3023_s23  ;;  %v1024_v3 = vmul.f32 -0.5, %v1022_v55  ;;  %v849_v2 = vmul.f32 %v3489_v24, %v3411_v29  ;;  %v1095_v28 = vsub.f32 %v3425_v42, %v5599_v62 }
 0x138   : > { %705 = vrot.lane.b32.xlu1 %v686_v44, %s3023_s23  ;;  %v1012_v44 = vsel %vm525_vm2, %v1005_v13, 0.0  ;;  %v1027_v45 = vmul.f32 1.442695, %v1024_v3 }
 0x139   : > { %v1013_v46 = vadd.f32 %v1012_v44, %v1011_v20  ;;  %v1099_v44 = vmul.f32 %v1091_v5, %v1091_v5 }
 0x13a   : > { %703 = vrot.lane.b32.xlu0 %v685_v15, %s3023_s23  ;;  %v5595_v15 = vld [vmem:[#allocation39_spill] sm:$0xff]  ;;  %v2792_v11 = vpop.eup %2791  ;;  %2793 = vpow2.f32 %v1027_v45 }
 0x13b   : > { %v1015_v14 = vadd.f32 %v1014_v26, %v1013_v46  ;;  %v952_v26 = vmul.f32 %v934_v4, %v3399_v40  ;;  %v1107_v35 = vsel %vm648_vm3, %v1099_v44, 0.0  ;;  %v3705_v44 = vld [vmem:[%s3114_s3 + $0x1a] sm:$0xff] }
 0x13c   : > { %709 = vrot.lane.b32.xlu1 %v688_v17, %s3023_s23  ;;  %v854_v17 = vmul.f32 %v3478_v61, %v3399_v40  ;;  %v851_v61 = vmul.f32 %v3489_v24, %v3425_v42  ;;  %v1117_v24 = vsel %vm648_vm3, %v1104_v57, 0.0  ;;  %v5601_v57 = vld [vmem:[#allocation16_spill] sm:$0xff] }
 0x13d   : > { %v1023_v31 = vmul.f32 -0.5, %v1015_v14  ;;  %v3675_v14 = vld [vmem:[%s3114_s3 + $0x22] sm:$0xff] }
 0x13e   : > { %707 = vrot.lane.b32.xlu0 %v687_v1, %s3023_s23  ;;  %v1098_v1 = vsub.f32 %v3399_v40, %v3439_v36 }
 0x13f   : > { %v1025_v13 = vmul.f32 1.442695, %v1023_v31 }
 0x140   : > { %713 = vrot.lane.b32.xlu1 %v690_v10, %s3023_s23  ;;  %v1092_v10 = vsub.f32 %v3384_v58, %v5595_v15  ;;  %v1106_v30 = vmul.f32 %v1098_v1, %v1098_v1 }
 0x141   : > { %2795 = vpow2.f32 %v1025_v13 }
 0x142   : > { %711 = vrot.lane.b32.xlu0 %v689_v56, %s3023_s23  ;;  %v1100_v23 = vmul.f32 %v1092_v10, %v1092_v10  ;;  %v933_v56 = vmul.f32 %v2792_v11, %v932_v8  ;;  %v1103_v8 = vmul.f32 %v1095_v28, %v1095_v28  ;;  %v5603_v28 = vld [vmem:[#allocation22_spill] sm:$0xff] }
 0x144   : > { %865 = vrot.lane.b32.xlu1 %v848_v16, %s3019_s5  ;;  %v946_v16 = vmul.f32 %v934_v4, %v3384_v58  ;;  %v1114_v22 = vsel %vm648_vm3, %v1100_v23, 0.0  ;;  %v945_v38 = vmul.f32 %v933_v56, %v3421_v21  ;;  %v1110_v46 = vsel %vm648_vm3, %v1103_v8, 0.0  ;;  %v3685_v23 = vld [vmem:[%s3114_s3 + $0xa] sm:$0xff]  ;;  %v5604_v8 = vld [vmem:[#allocation19_spill] sm:$0xff] }
 0x145   : > { %v1116_v55 = vadd.f32 %v1115_v60, %v1114_v22  ;;  %v1248_v31 = vsub.f32 %v3685_v23, %v5601_v57  ;;  %v5602_v60 = vld [vmem:[#allocation20_spill] sm:$0xff] }
 0x146   : > { %863 = vrot.lane.b32.xlu0 %v847_v19, %s3019_s5  ;;  %v1101_v19 = vmul.f32 %v1093_v0, %v1093_v0 }
 0x147   : > { %v1118_v7 = vadd.f32 %v1117_v24, %v1116_v55  ;;  %v2794_v45 = vpop.eup %2793  ;;  %v3695_v24 = vld [vmem:[%s3114_s3 + $0x52] sm:$0xff]  ;;  %v951_v55 = vmul.f32 %v933_v56, %v3433_v27 }
 0x148   : > { %869 = vrot.lane.b32.xlu1 %v850_v34, %s3019_s5  ;;  %v948_v34 = vmul.f32 %v934_v4, %v3373_v41  ;;  %v1108_v3 = vsel %vm648_vm3, %v1101_v19, 0.0  ;;  %v1254_v13 = vsub.f32 %v3695_v24, %v5603_v28  ;;  %v1256_v19 = vmul.f32 %v1248_v31, %v1248_v31 }
 0x149   : > { %v1109_v10 = vadd.f32 %v1108_v3, %v1107_v35 }
 0x14a   : > { %867 = vrot.lane.b32.xlu0 %v849_v2, %s3019_s5  ;;  %v1105_v2 = vmul.f32 %v1097_v37, %v1097_v37  ;;  %v1262_v3 = vmul.f32 %v1254_v13, %v1254_v13 }
 0x14b   : > { %v1111_v11 = vadd.f32 %v1110_v46, %v1109_v10  ;;  %v3719_v46 = vld [vmem:[%s3114_s3 + $0x32] sm:$0xff]  ;;  %v5606_v10 = vld [vmem:[#allocation21_spill] sm:$0xff] }
 0x14c   : > { %873 = vrot.lane.b32.xlu1 %v852_v25, %s3019_s5  ;;  %v1119_v25 = vsel %vm648_vm3, %v1106_v30, 0.0  ;;  %v1112_v1 = vsel %vm648_vm3, %v1105_v2, 0.0  ;;  %v5605_v2 = vld [vmem:[#allocation17_spill] sm:$0xff]  ;;  %v1275_v31 = vsel %vm303_vm1, %v1262_v3, 0.0 }
 0x14d   : > { %v1120_v20 = vadd.f32 %v1119_v25, %v1118_v7 }
 0x14e   : > { %871 = vrot.lane.b32.xlu0 %v851_v61, %s3019_s5  ;;  %v5600_v61 = vld [vmem:[#allocation18_spill] sm:$0xff] }
 0x14f   : > { %v1122_v43 = vmul.f32 -0.5, %v1120_v20  ;;  %v1250_v6 = vsub.f32 %v3675_v14, %v5600_v61  ;;  %v1249_v20 = vsub.f32 %v3705_v44, %v5604_v8 }
 0x150   : > { %877 = vrot.lane.b32.xlu1 %v854_v17, %s3019_s5  ;;  %v947_v17 = vmul.f32 %v933_v56, %v3411_v29 }
 0x151   : > { %v1125_v30 = vmul.f32 1.442695, %v1122_v43  ;;  %v1258_v5 = vmul.f32 %v1250_v6, %v1250_v6  ;;  %v1251_v43 = vsub.f32 %v3719_v46, %v5606_v10 }
 0x152   : > { %875 = vrot.lane.b32.xlu0 %v853_v33, %s3019_s5  ;;  %v3690_v33 = vld [vmem:[%s3114_s3 + $0x3a] sm:$0xff] }
 0x153   : > { %v1252_v0 = vsub.f32 %v3690_v33, %v5602_v60  ;;  %2797 = vpow2.f32 %v1125_v30  ;;  %v5607_v30 = vld [vmem:[#allocation23_spill] sm:$0xff] }
 0x154   : > { %939 = vrot.lane.b32.xlu1 %v934_v4, %s3018_s4  ;;  %v949_v4 = vmul.f32 %v933_v56, %v3425_v42 }
 0x155   : > { %v1260_v25 = vmul.f32 %v1252_v0, %v1252_v0  ;;  %v3726_v0 = vld [vmem:[%s3114_s3 + $0x4a] sm:$0xff] }
 0x156   : > { %937 = vrot.lane.b32.xlu0 %v933_v56, %s3018_s4  ;;  %v3710_v56 = vld [vmem:[%s3114_s3 + $0x2] sm:$0xff] }
 0x157   : > { %v1273_v35 = vsel %vm303_vm1, %v1260_v25, 0.0 }
 0x158   : > { %963 = vrot.lane.b32.xlu1 %v946_v16, %s3018_s4  ;;  %v1030_v16 = vstv %s3661_s25  ;;  %s4766_s25 = sld [smem:[#allocation2 + $0x202]] }
 0x159   : > { %v1032_v22 = vmul.f32 %v2794_v45, %v1030_v16 }
 0x15a   : > { %961 = vrot.lane.b32.xlu0 %v945_v38, %s3018_s4  ;;  %v2796_v38 = vpop.eup %2795 }
 0x15b   : > { %v1044_v7 = vmul.f32 %v1032_v22, %v3384_v58 }
 0x15c   : > { %967 = vrot.lane.b32.xlu1 %v948_v34, %s3018_s4  ;;  %v1113_v34 = vadd.f32 %v1112_v1, %v1111_v11  ;;  %v1031_v1 = vmul.f32 %v2796_v38, %v1030_v16  ;;  %v1046_v11 = vmul.f32 %v1032_v22, %v3373_v41  ;;  %v1346_v16 = vsub.f32 %v3685_v23, %v3685_v23 }
 0x15e   : > { %965 = vrot.lane.b32.xlu0 %v947_v17, %s3018_s4  ;;  %v1121_v37 = vmul.f32 -0.5, %v1113_v34  ;;  %v1247_v17 = vsub.f32 %v3710_v56, %v5605_v2  ;;  %v1253_v34 = vsub.f32 %v3726_v0, %v5607_v30 }
 0x160   : > { %971 = vrot.lane.b32.xlu1 %v950_v39, %s3018_s4  ;;  %v1271_v39 = vsel %vm303_vm1, %v1258_v5, 0.0  ;;  %v1123_v6 = vmul.f32 1.442695, %v1121_v37  ;;  %v1255_v5 = vmul.f32 %v1247_v17, %v1247_v17  ;;  %v1043_v37 = vmul.f32 %v1031_v1, %v3421_v21 }
 0x161   : > { %v1350_v17 = vsub.f32 %v3690_v33, %v3690_v33 }
 0x162   : > { %969 = vrot.lane.b32.xlu0 %v949_v4, %s3018_s4  ;;  %v1257_v4 = vmul.f32 %v1249_v20, %v1249_v20  ;;  %2799 = vpow2.f32 %v1123_v6  ;;  %v1263_v20 = vsel %vm303_vm1, %v1255_v5, 0.0  ;;  %v3747_v6 = vpop.permute.xlu1 %332  ;;  %v1128_v5 = vstv %s3730_s26  ;;  %s4783_s26 = sld [smem:[#allocation2 + $0x203]] }
 0x163   : > { %5608 = vst [vmem:[#allocation41_spill] sm:$0xff] %v3747_v6 }
 0x164   : > { %975 = vrot.lane.b32.xlu1 %v952_v26, %s3018_s4  ;;  %v1270_v26 = vsel %vm303_vm1, %v1256_v19, 0.0  ;;  %v1348_v19 = vsub.f32 %v3675_v14, %v3675_v14  ;;  %v1264_v38 = vsel %vm303_vm1, %v1257_v4, 0.0  ;;  %v1050_v4 = vmul.f32 %v1032_v22, %v3399_v40 }
 0x165   : > { %v1272_v45 = vadd.f32 %v1271_v39, %v1270_v26  ;;  %v1261_v39 = vmul.f32 %v1253_v34, %v1253_v34  ;;  %v1354_v26 = vmul.f32 %v1346_v16, %v1346_v16  ;;  %v1345_v16 = vsub.f32 %v3710_v56, %v3710_v56 }
 0x166   : > { %973 = vrot.lane.b32.xlu0 %v951_v55, %s3018_s4  ;;  %v1259_v55 = vmul.f32 %v1251_v43, %v1251_v43  ;;  %v1265_v43 = vadd.f32 %v1264_v38, %v1263_v20  ;;  %v1047_v20 = vmul.f32 %v1031_v1, %v3425_v42 }
 0x167   : > { %v1274_v13 = vadd.f32 %v1273_v35, %v1272_v45  ;;  %v1356_v35 = vmul.f32 %v1348_v19, %v1348_v19  ;;  %v1268_v34 = vsel %vm303_vm1, %v1261_v39, 0.0  ;;  %v1358_v19 = vmul.f32 %v1350_v17, %v1350_v17 }
 0x168   : > { %1037 = vrot.lane.b32.xlu1 %v1032_v22, %s3022_s22  ;;  %v1266_v3 = vsel %vm303_vm1, %v1259_v55, 0.0  ;;  %v1352_v55 = vsub.f32 %v3695_v24, %v3695_v24 }
 0x169   : > { %v1276_v25 = vadd.f32 %v1275_v31, %v1274_v13  ;;  %v2798_v31 = vpop.eup %2797  ;;  %v1267_v13 = vadd.f32 %v1266_v3, %v1265_v43 }
 0x16a   : > { %1035 = vrot.lane.b32.xlu0 %v1031_v1, %s3022_s22  ;;  %v1130_v3 = vmul.f32 %v2798_v31, %v1128_v5  ;;  %v1360_v43 = vmul.f32 %v1352_v55, %v1352_v55 }
 0x16b   : > { %v1278_v45 = vmul.f32 -0.5, %v1276_v25  ;;  %v1368_v25 = vsel %vm402_vm0, %v1354_v26, 0.0  ;;  %v1269_v38 = vadd.f32 %v1268_v34, %v1267_v13  ;;  %v1371_v26 = vsel %vm402_vm0, %v1358_v19, 0.0  ;;  %v3771_v34 = vpop.permute.xlu0 %330 }
 0x16c   : > { %1061 = vrot.lane.b32.xlu1 %v1044_v7, %s3022_s22  ;;  %v1048_v7 = vmul.f32 %v1032_v22, %v3389_v32  ;;  %v1369_v22 = vsel %vm402_vm0, %v1356_v35, 0.0  ;;  %v1349_v35 = vsub.f32 %v3719_v46, %v3719_v46  ;;  %5610 = vst [vmem:[#allocation18_spill] sm:$0xff] %v3771_v34  ;;  %v1049_v13 = vmul.f32 %v1031_v1, %v3433_v27 }
 0x16d   : > { %v1370_v17 = vadd.f32 %v1369_v22, %v1368_v25  ;;  %v1373_v19 = vsel %vm402_vm0, %v1360_v43, 0.0 }
 0x16e   : > { %1059 = vrot.lane.b32.xlu0 %v1043_v37, %s3022_s22  ;;  %v1347_v37 = vsub.f32 %v3705_v44, %v3705_v44  ;;  %v1357_v25 = vmul.f32 %v1349_v35, %v1349_v35 }
 0x16f   : > { %v1372_v55 = vadd.f32 %v1371_v26, %v1370_v17  ;;  %v1144_v17 = vmul.f32 %v1130_v3, %v3373_v41 }
 0x170   : > { %1065 = vrot.lane.b32.xlu1 %v1046_v11, %s3022_s22  ;;  %v1045_v11 = vmul.f32 %v1031_v1, %v3411_v29  ;;  %v3763_v39 = vpop.permute.xlu1 %554 }
 0x171   : > { %5609 = vst [vmem:[#allocation42_spill] sm:$0xff] %v3763_v39  ;;  %v2800_v39 = vpop.eup %2799  ;;  %v1374_v43 = vadd.f32 %v1373_v19, %v1372_v55  ;;  %v5617_v19 = vld [vmem:[#allocation9_spill] sm:$0xff] }
 0x172   : > { %1063 = vrot.lane.b32.xlu0 %v1045_v11, %s3022_s22  ;;  %v1353_v11 = vmul.f32 %v1345_v16, %v1345_v16  ;;  %v1351_v16 = vsub.f32 %v3726_v0, %v3726_v0 }
 0x174   : > { %1069 = vrot.lane.b32.xlu1 %v1048_v7, %s3022_s22  ;;  %v1281_v7 = vmul.f32 1.442695, %v1278_v45  ;;  %v1277_v45 = vmul.f32 -0.5, %v1269_v38  ;;  %v1361_v22 = vsel %vm402_vm0, %v1353_v11, 0.0  ;;  %v1359_v35 = vmul.f32 %v1351_v16, %v1351_v16  ;;  %v2882_v16 = vld [vmem:[%s3114_s3] sm:$0xff] }
 0x175   : > { %v1364_v11 = vsel %vm402_vm0, %v1357_v25, 0.0  ;;  %v204_v25 = vsub.f32 %v2882_v16, %v5617_v19  ;;  %v1189_v16 = vsub.f32 %v3710_v56, %v5617_v19 }
 0x176   : > { %1067 = vrot.lane.b32.xlu0 %v1047_v20, %s3022_s22  ;;  %2801 = vpow2.f32 %v1281_v7  ;;  %v1142_v20 = vmul.f32 %v1130_v3, %v3384_v58  ;;  %v3784_v7 = vpop.permute.xlu0 %552  ;;  %v3786_v58 = vmul.f32 %v2800_v39, %v1128_v5  ;;  %v3798_v5 = vld [vmem:[%s3114_s3 + $0x1b] sm:$0xff] }
 0x177   : > { %5612 = vst [vmem:[#allocation20_spill] sm:$0xff] %v3784_v7 }
 0x178   : > { %1073 = vrot.lane.b32.xlu1 %v1050_v4, %s3022_s22  ;;  %v1355_v4 = vmul.f32 %v1347_v37, %v1347_v37  ;;  %v1279_v37 = vmul.f32 1.442695, %v1277_v45 }
 0x17a   : > { %1071 = vrot.lane.b32.xlu0 %v1049_v13, %s3022_s22  ;;  %v1362_v1 = vsel %vm402_vm0, %v1355_v4, 0.0  ;;  %2803 = vpow2.f32 %v1279_v37  ;;  %v1141_v4 = vmul.f32 %v3786_v58, %v3421_v21  ;;  %v1146_v13 = vmul.f32 %v1130_v3, %v3389_v32 }
 0x17b   : > { %v1363_v26 = vadd.f32 %v1362_v1, %v1361_v22  ;;  %v1376_v22 = vmul.f32 -0.5, %v1374_v43  ;;  %v1143_v43 = vmul.f32 %v3786_v58, %v3411_v29 }
 0x17c   : > { %1135 = vrot.lane.b32.xlu1 %v1130_v3, %s3023_s23 }
 0x17d   : > { %v1365_v1 = vadd.f32 %v1364_v11, %v1363_v26  ;;  %v1148_v11 = vmul.f32 %v1130_v3, %v3399_v40  ;;  %v1444_v40 = vsub.f32 %v3685_v23, %v3338_v48  ;;  %v1448_v3 = vsub.f32 %v3690_v33, %v3346_v52 }
 0x17e   : > { %v3774_v31 = vpop.permute.xlu1 %677  ;;  %1133 = vrot.lane.b32.xlu0 %v3786_v58, %s3023_s23 }
 0x17f   : > { %5611 = vst [vmem:[#allocation16_spill] sm:$0xff] %v3774_v31  ;;  %v212_v31 = vmul.f32 %v204_v25, %v204_v25  ;;  %v1145_v25 = vmul.f32 %v3786_v58, %v3425_v42 }
 0x180   : > { %1159 = vrot.lane.b32.xlu1 %v1142_v20, %s3023_s23  ;;  %v3800_v39 = vpop.permute.xlu0 %675  ;;  %v2881_v20 = vld [vmem:[%s3114_s3 + $0x18] sm:$0xff] }
 0x181   : > { %5614 = vst [vmem:[#allocation19_spill] sm:$0xff] %v3800_v39  ;;  %v739_v39 = vsub.f32 %v3421_v21, %v5617_v19  ;;  %v1284_v21 = vstv %s3791_s27  ;;  %s4797_s27 = sld [smem:[#allocation2 + $0x204]] }
 0x182   : > { %v3788_v38 = vpop.permute.xlu1 %841  ;;  %1157 = vrot.lane.b32.xlu0 %v1141_v4, %s3023_s23 }
 0x183   : > { %5613 = vst [vmem:[#allocation22_spill] sm:$0xff] %v3788_v38  ;;  %v5616_v38 = vld [vmem:[#allocation8_spill] sm:$0xff] }
 0x184   : > { %1163 = vrot.lane.b32.xlu1 %v1144_v17, %s3023_s23  ;;  %v206_v17 = vsub.f32 %v2881_v20, %v5616_v38  ;;  %v741_v55 = vsub.f32 %v3411_v29, %v5616_v38  ;;  %v1191_v37 = vsub.f32 %v3705_v44, %v5616_v38  ;;  %v1649_v32 = vsub.f32 %v3798_v5, %v5616_v38  ;;  %v3824_v4 = vpop.permute.xlu0 %839 }
 0x185   : > { %v1366_v20 = vsel %vm402_vm0, %v1359_v35, 0.0  ;;  %5618 = vst [vmem:[#allocation21_spill] sm:$0xff] %v3824_v4  ;;  %v1446_v35 = vsub.f32 %v3675_v14, %v3342_v50  ;;  %v1379_v4 = vmul.f32 1.442695, %v1376_v22 }
 0x186   : > { %v3804_v45 = vpop.permute.xlu1 %356  ;;  %v214_v38 = vmul.f32 %v206_v17, %v206_v17  ;;  %v749_v7 = vmul.f32 %v741_v55, %v741_v55  ;;  %1161 = vrot.lane.b32.xlu0 %v1143_v43, %s3023_s23  ;;  %v1367_v29 = vadd.f32 %v1366_v20, %v1365_v1  ;;  %v1657_v34 = vmul.f32 %v1649_v32, %v1649_v32 }
 0x187   : > { %5615 = vst [vmem:[#allocation17_spill] sm:$0xff] %v3804_v45  ;;  %v1199_v45 = vmul.f32 %v1191_v37, %v1191_v37  ;;  %v747_v17 = vmul.f32 %v739_v39, %v739_v39  ;;  %v1197_v55 = vmul.f32 %v1189_v16, %v1189_v16  ;;  %v1454_v32 = vmul.f32 %v1446_v35, %v1446_v35 }
 0x188   : > { %1167 = vrot.lane.b32.xlu1 %v1146_v13, %s3023_s23  ;;  %v2802_v13 = vpop.eup %2801  ;;  %v3843_v6 = vpop.permute.xlu0 %354  ;;  %v222_v1 = vsel %vm220_vm4, %v214_v38, 0.0  ;;  %v756_v37 = vsel %vm220_vm4, %v749_v7, 0.0  ;;  %v1450_v20 = vsub.f32 %v3695_v24, %v3350_v54  ;;  %v221_v39 = vsel %vm220_vm4, %v212_v31, 0.0 }
 0x189   : > { %5620 = vst [vmem:[#allocation46_spill] sm:$0xff] %v3843_v6  ;;  %v3849_v22 = vmul.f32 %v2802_v13, %v1284_v21  ;;  %2805 = vpow2.f32 %v1379_v4  ;;  %v1375_v42 = vmul.f32 -0.5, %v1367_v29  ;;  %v1206_v38 = vsel %vm220_vm4, %v1199_v45, 0.0  ;;  %v2804_v4 = vpop.eup %2803  ;;  %v5624_v6 = vld [vmem:[#allocation10_spill] sm:$0xff] }
 0x18a   : > { %v3828_v26 = vpop.permute.xlu1 %360  ;;  %1165 = vrot.lane.b32.xlu0 %v1145_v25, %s3023_s23  ;;  %v1664_v7 = vsel %vm220_vm4, %v1657_v34, 0.0  ;;  %v1456_v13 = vmul.f32 %v1448_v3, %v1448_v3  ;;  %v755_v31 = vsel %vm220_vm4, %v747_v17, 0.0  ;;  %v1205_v35 = vsel %vm220_vm4, %v1197_v55, 0.0  ;;  %v3879_v55 = vld [vmem:[%s3114_s3 + $0x23] sm:$0xff] }
 0x18b   : > { %5619 = vst [vmem:[#allocation23_spill] sm:$0xff] %v3828_v26  ;;  %v3837_v26 = vld [vmem:[%s3114_s3 + $0x3] sm:$0xff]  ;;  %v1147_v25 = vmul.f32 %v3786_v58, %v3433_v27  ;;  %v1298_v45 = vmul.f32 %v3685_v23, %v3849_v22  ;;  %v3873_v29 = vadd.f32 %v222_v1, %v221_v39  ;;  %v1467_v34 = vsel %vm525_vm2, %v1454_v32, 0.0 }
 0x18c   : > { %1171 = vrot.lane.b32.xlu1 %v1148_v11, %s3023_s23  ;;  %v1647_v16 = vsub.f32 %v3837_v26, %v5617_v19  ;;  %v1452_v11 = vmul.f32 %v1444_v40, %v1444_v40  ;;  %v3865_v19 = vpop.permute.xlu0 %358  ;;  %v1445_v40 = vsub.f32 %v3705_v44, %v3344_v51  ;;  %v1458_v3 = vmul.f32 %v1450_v20, %v1450_v20 }
 0x18d   : > { %5622 = vst [vmem:[#allocation48_spill] sm:$0xff] %v3865_v19  ;;  %v2883_v19 = vld [vmem:[%s3114_s3 + $0x20] sm:$0xff]  ;;  %v742_v58 = vsub.f32 %v3373_v41, %v5624_v6  ;;  %v1377_v1 = vmul.f32 1.442695, %v1375_v42  ;;  %v1443_v20 = vsub.f32 %v3710_v56, %v3340_v49  ;;  %v1469_v39 = vsel %vm525_vm2, %v1456_v13, 0.0 }
 0x18e   : > { %v3847_v43 = vpop.permute.xlu1 %364  ;;  %v1655_v17 = vmul.f32 %v1647_v16, %v1647_v16  ;;  %v207_v27 = vsub.f32 %v2883_v19, %v5624_v6  ;;  %1169 = vrot.lane.b32.xlu0 %v1147_v25, %s3023_s23  ;;  %v1466_v32 = vsel %vm525_vm2, %v1452_v11, 0.0  ;;  %v1447_v16 = vsub.f32 %v3719_v46, %v3348_v53 }
 0x18f   : > { %5621 = vst [vmem:[#allocation47_spill] sm:$0xff] %v3847_v43  ;;  %v1192_v41 = vsub.f32 %v3675_v14, %v5624_v6  ;;  %v1468_v19 = vadd.f32 %v1467_v34, %v1466_v32  ;;  %v3899_v42 = vmul.f32 %v2804_v4, %v1284_v21  ;;  %v1650_v13 = vsub.f32 %v3879_v55, %v5624_v6  ;;  %v2884_v34 = vld [vmem:[%s3114_s3 + $0x8] sm:$0xff]  ;;  %v5627_v32 = vld [vmem:[#allocation11_spill] sm:$0xff] }
 0x190   : > { %1291 = vrot.lane.b32.xlu1 %v3849_v22, %s3019_s5  ;;  %v3897_v25 = vpop.permute.xlu0 %362  ;;  %v1471_v53 = vsel %vm525_vm2, %v1458_v3, 0.0  ;;  %v1449_v49 = vsub.f32 %v3726_v0, %v3360_v59  ;;  %v215_v51 = vmul.f32 %v207_v27, %v207_v27  ;;  %2807 = vpow2.f32 %v1377_v1 }
 0x191   : > { %5625 = vst [vmem:[#allocation50_spill] sm:$0xff] %v3897_v25  ;;  %v205_v25 = vsub.f32 %v2884_v34, %v5627_v32  ;;  %v1470_v21 = vadd.f32 %v1469_v39, %v1468_v19  ;;  %v1663_v4 = vsel %vm220_vm4, %v1655_v17, 0.0  ;;  %v750_v6 = vmul.f32 %v742_v58, %v742_v58 }
 0x192   : > { %v3869_v43 = vpop.permute.xlu1 %368  ;;  %1289 = vrot.lane.b32.xlu0 %v3899_v42, %s3019_s5  ;;  %v3916_v3 = vadd.f32 %v756_v37, %v755_v31  ;;  %v1297_v27 = vmul.f32 %v3710_v56, %v3899_v42  ;;  %v1302_v19 = vmul.f32 %v3690_v33, %v3849_v22  ;;  %v3926_v1 = vadd.f32 %v1206_v38, %v1205_v35  ;;  %v3938_v38 = vld [vmem:[%s3114_s3 + $0xb] sm:$0xff] }
 0x193   : > { %5623 = vst [vmem:[#allocation49_spill] sm:$0xff] %v3869_v43  ;;  %v1453_v43 = vmul.f32 %v1445_v40, %v1445_v40  ;;  %v1451_v40 = vmul.f32 %v1443_v20, %v1443_v20  ;;  %v1472_v54 = vadd.f32 %v1471_v53, %v1470_v21  ;;  %v1200_v17 = vmul.f32 %v1192_v41, %v1192_v41  ;;  %v2885_v21 = vld [vmem:[%s3114_s3 + $0x9] sm:$0xff] }
 0x194   : > { %1315 = vrot.lane.b32.xlu1 %v1298_v45, %s3019_s5  ;;  %v1300_v45 = vmul.f32 %v3675_v14, %v3849_v22  ;;  %v3918_v59 = vpop.permute.xlu0 %366  ;;  %v1457_v37 = vmul.f32 %v1449_v49, %v1449_v49  ;;  %v3929_v31 = vadd.f32 %v1664_v7, %v1663_v4  ;;  %v229_v53 = vsel %vm220_vm4, %v215_v51, 0.0 }
 0x195   : > { %5628 = vst [vmem:[#allocation52_spill] sm:$0xff] %v3918_v59  ;;  %v1460_v58 = vsel %vm525_vm2, %v1453_v43, 0.0  ;;  %v1658_v20 = vmul.f32 %v1650_v13, %v1650_v13  ;;  %v3935_v34 = vsel %vm220_vm4, %v750_v6, 0.0  ;;  %v1459_v43 = vsel %vm525_vm2, %v1451_v40, 0.0 }
 0x196   : > { %v3901_v11 = vpop.permute.xlu1 %578  ;;  %5630 = vst [vmem:[#allocation54_spill] sm:$0xff] %v3929_v31  ;;  %1313 = vrot.lane.b32.xlu0 %v1297_v27, %s3019_s5  ;;  %v1382_v7 = vstv %s3893_s28  ;;  %v1461_v35 = vadd.f32 %v1460_v58, %v1459_v43  ;;  %v1474_v51 = vmul.f32 -0.5, %v1472_v54  ;;  %v1304_v6 = vmul.f32 %v3695_v24, %v3849_v22  ;;  %s5091_s28 = sld [smem:[#allocation2 + $0x180]] }
 0x197   : > { %5626 = vst [vmem:[#allocation51_spill] sm:$0xff] %v3901_v11  ;;  %v1455_v11 = vmul.f32 %v1447_v16, %v1447_v16  ;;  %v213_v16 = vmul.f32 %v205_v25, %v205_v25  ;;  %v1299_v25 = vmul.f32 %v3705_v44, %v3899_v42  ;;  %v740_v4 = vsub.f32 %v2885_v21, %v5627_v32  ;;  %v2886_v21 = vld [vmem:[%s3114_s3 + $0x38] sm:$0xff] }
 0x198   : > { %1319 = vrot.lane.b32.xlu1 %v1300_v45, %s3019_s5  ;;  %v2806_v45 = vpop.eup %2805  ;;  %v3943_v41 = vpop.permute.xlu0 %576  ;;  %v1464_v54 = vsel %vm525_vm2, %v1457_v37, 0.0  ;;  %v1544_v40 = vsub.f32 %v3675_v14, %v5594_v9  ;;  %v3966_v43 = vsel %vm220_vm4, %v1200_v17, 0.0  ;;  %v5633_v37 = vld [vmem:[#allocation12_spill] sm:$0xff]  ;;  %v1301_v17 = vmul.f32 %v3719_v46, %v3899_v42 }
 0x199   : > { %v1462_v49 = vsel %vm525_vm2, %v1455_v11, 0.0  ;;  %5631 = vst [vmem:[#allocation55_spill] sm:$0xff] %v3943_v41  ;;  %v1190_v11 = vsub.f32 %v3685_v23, %v5627_v32  ;;  %v228_v27 = vsel %vm220_vm4, %v213_v16, 0.0  ;;  %v3963_v22 = vmul.f32 %v2806_v45, %v1382_v7 }
 0x19a   : > { %v3922_v39 = vpop.permute.xlu1 %582  ;;  %v1463_v58 = vadd.f32 %v1462_v49, %v1461_v35  ;;  %1317 = vrot.lane.b32.xlu0 %v1299_v25, %s3019_s5  ;;  %v209_v59 = vsub.f32 %v2886_v21, %v5633_v37  ;;  %v1546_v16 = vsub.f32 %v3690_v33, %v5596_v63  ;;  %v2887_v49 = vld [vmem:[%s3114_s3 + $0x39] sm:$0xff]  ;;  %v1477_v25 = vmul.f32 1.442695, %v1474_v51 }
 0x19b   : > { %5629 = vst [vmem:[#allocation53_spill] sm:$0xff] %v3922_v39  ;;  %v744_v35 = vsub.f32 %v2887_v49, %v5633_v37  ;;  %v3982_v21 = vadd.f32 %v229_v53, %v228_v27  ;;  %v748_v41 = vmul.f32 %v740_v4, %v740_v4  ;;  %v1552_v39 = vmul.f32 %v1544_v40, %v1544_v40  ;;  %v3988_v51 = vld [vmem:[%s3114_s3 + $0x3b] sm:$0xff] }
 0x19c   : > { %1323 = vrot.lane.b32.xlu1 %v1302_v19, %s3019_s5  ;;  %v1648_v19 = vsub.f32 %v3938_v38, %v5627_v32  ;;  %v3976_v45 = vpop.permute.xlu0 %580  ;;  %v1548_v31 = vsub.f32 %v3695_v24, %v3439_v36  ;;  %v1671_v63 = vsel %vm220_vm4, %v1658_v20, 0.0  ;;  %v1396_v53 = vmul.f32 %v3685_v23, %v3963_v22 }
 0x19d   : > { %5634 = vst [vmem:[#allocation57_spill] sm:$0xff] %v3976_v45  ;;  %v217_v4 = vmul.f32 %v209_v59, %v209_v59  ;;  %v1194_v40 = vsub.f32 %v3690_v33, %v5633_v37  ;;  %v752_v20 = vmul.f32 %v744_v35, %v744_v35  ;;  %2809 = vpow2.f32 %v1477_v25 }
 0x19e   : > { %v3947_v13 = vpop.permute.xlu1 %586  ;;  %v1656_v49 = vmul.f32 %v1648_v19, %v1648_v19  ;;  %1321 = vrot.lane.b32.xlu0 %v1301_v17, %s3019_s5  ;;  %v1303_v17 = vmul.f32 %v3726_v0, %v3899_v42  ;;  %v4005_v45 = vsub.f32 %v3988_v51, %v5633_v37  ;;  %v1565_v59 = vsel %vm648_vm3, %v1552_v39, 0.0 }
 0x19f   : > { %5632 = vst [vmem:[#allocation56_spill] sm:$0xff] %v3947_v13  ;;  %v1542_v13 = vsub.f32 %v3685_v23, %v5595_v15  ;;  %v1198_v15 = vmul.f32 %v1190_v11, %v1190_v11  ;;  %v762_v35 = vsel %vm220_vm4, %v748_v41, 0.0  ;;  %v1398_v42 = vmul.f32 %v3675_v14, %v3963_v22 }
 0x1a0   : > { %1327 = vrot.lane.b32.xlu1 %v1304_v6, %s3019_s5  ;;  %v1465_v6 = vadd.f32 %v1464_v54, %v1463_v58  ;;  %v2808_v54 = vpop.eup %2807  ;;  %v1554_v58 = vmul.f32 %v1546_v16, %v1546_v16  ;;  %v3997_v19 = vpop.permute.xlu0 %584  ;;  %v1556_v16 = vmul.f32 %v1548_v31, %v1548_v31  ;;  %v1541_v39 = vsub.f32 %v3710_v56, %v5598_v47 }
 0x1a1   : > { %v1550_v27 = vmul.f32 %v1542_v13, %v1542_v13  ;;  %5636 = vst [vmem:[#allocation59_spill] sm:$0xff] %v3997_v19  ;;  %v1543_v13 = vsub.f32 %v3705_v44, %v5597_v18  ;;  %v1212_v25 = vsel %vm220_vm4, %v1198_v15, 0.0  ;;  %v1545_v41 = vsub.f32 %v3719_v46, %v5599_v62 }
 0x1a2   : > { %v3980_v32 = vpop.permute.xlu1 %590  ;;  %v1473_v11 = vmul.f32 -0.5, %v1465_v6  ;;  %1325 = vrot.lane.b32.xlu0 %v1303_v17, %s3019_s5  ;;  %v4013_v6 = vmul.f32 %v2808_v54, %v1382_v7  ;;  %v1567_v31 = vsel %vm648_vm3, %v1554_v58, 0.0  ;;  %v1670_v15 = vsel %vm220_vm4, %v1656_v49, 0.0 }
 0x1a3   : > { %5635 = vst [vmem:[#allocation58_spill] sm:$0xff] %v3980_v32  ;;  %v1564_v37 = vsel %vm648_vm3, %v1550_v27, 0.0  ;;  %v1202_v17 = vmul.f32 %v1194_v40, %v1194_v40  ;;  %v764_v27 = vadd.f32 %v3935_v34, %v762_v35  ;;  %v1569_v47 = vsel %vm648_vm3, %v1556_v16, 0.0  ;;  %v2888_v16 = vld [vmem:[%s3114_s3 + $0x30] sm:$0xff]  ;;  %v5641_v35 = vld [vmem:[#allocation13_spill] sm:$0xff] }
 0x1a4   : > { %1389 = vrot.lane.b32.xlu1 %v3963_v22, %s3018_s4  ;;  %v1475_v7 = vmul.f32 1.442695, %v1473_v11  ;;  %v1566_v54 = vadd.f32 %v1565_v59, %v1564_v37  ;;  %v4025_v19 = vpop.permute.xlu0 %588  ;;  %v1547_v58 = vsub.f32 %v3726_v0, %v3454_v12  ;;  %v1395_v37 = vmul.f32 %v3710_v56, %v4013_v6  ;;  %v2889_v12 = vld [vmem:[%s3114_s3 + $0x31] sm:$0xff] }
 0x1a5   : > { %5638 = vst [vmem:[#allocation61_spill] sm:$0xff] %v4025_v19  ;;  %v1400_v34 = vmul.f32 %v3690_v33, %v3963_v22  ;;  %v1214_v49 = vadd.f32 %v3966_v43, %v1212_v25  ;;  %v4043_v40 = vadd.f32 %v1671_v63, %v1670_v15  ;;  %v1549_v11 = vmul.f32 %v1541_v39, %v1541_v39 }
 0x1a6   : > { %v4001_v32 = vpop.permute.xlu1 %701  ;;  %v1568_v62 = vadd.f32 %v1567_v31, %v1566_v54  ;;  %1387 = vrot.lane.b32.xlu0 %v4013_v6, %s3018_s4  ;;  %v1553_v59 = vmul.f32 %v1545_v41, %v1545_v41  ;;  %v208_v31 = vsub.f32 %v2888_v16, %v5641_v35  ;;  %2811 = vpow2.f32 %v1475_v7 }
 0x1a7   : > { %5637 = vst [vmem:[#allocation60_spill] sm:$0xff] %v4001_v32  ;;  %v1551_v32 = vmul.f32 %v1543_v13, %v1543_v13  ;;  %5640 = vst [vmem:[#allocation63_spill] sm:$0xff] %v4043_v40  ;;  %v231_v13 = vsel %vm220_vm4, %v217_v4, 0.0  ;;  %v743_v63 = vsub.f32 %v2889_v12, %v5641_v35  ;;  %v1555_v25 = vmul.f32 %v1547_v58, %v1547_v58 }
 0x1a8   : > { %1413 = vrot.lane.b32.xlu1 %v1396_v53, %s3018_s4  ;;  %v1570_v54 = vadd.f32 %v1569_v47, %v1568_v62  ;;  %v4048_v19 = vpop.permute.xlu0 %699  ;;  %v1215_v4 = vsel %vm220_vm4, %v1202_v17, 0.0  ;;  %v1193_v39 = vsub.f32 %v3719_v46, %v5641_v35  ;;  %v1397_v47 = vmul.f32 %v3705_v44, %v4013_v6 }
 0x1a9   : > { %5642 = vst [vmem:[#allocation64_spill] sm:$0xff] %v4048_v19  ;;  %v1558_v43 = vsel %vm648_vm3, %v1551_v32, 0.0  ;;  %v1402_v62 = vmul.f32 %v3695_v24, %v3963_v22  ;;  %v232_v12 = vadd.f32 %v231_v13, %v3982_v21  ;;  %v2890_v32 = vld [vmem:[%s3114_s3 + $0x50] sm:$0xff]  ;;  %v1557_v15 = vsel %vm648_vm3, %v1549_v11, 0.0 }
 0x1aa   : > { %v4027_v53 = vpop.permute.xlu1 %705  ;;  %1411 = vrot.lane.b32.xlu0 %v1395_v37, %s3018_s4  ;;  %v1560_v17 = vsel %vm648_vm3, %v1553_v59, 0.0  ;;  %v216_v58 = vmul.f32 %v208_v31, %v208_v31  ;;  %v1559_v37 = vadd.f32 %v1558_v43, %v1557_v15  ;;  %v1572_v16 = vmul.f32 -0.5, %v1570_v54  ;;  %v2810_v22 = vpop.eup %2809  ;;  %v4087_v54 = vld [vmem:[%s3114_s3 + $0x33] sm:$0xff] }
 0x1ab   : > { %5639 = vst [vmem:[#allocation62_spill] sm:$0xff] %v4027_v53  ;;  %v765_v53 = vsel %vm220_vm4, %v752_v20, 0.0  ;;  %v5644_v20 = vld [vmem:[#allocation14_spill] sm:$0xff]  ;;  %v751_v21 = vmul.f32 %v743_v63, %v743_v63  ;;  %v1708_v13 = vsub.f32 %v3879_v55, %v5600_v61  ;;  %v1562_v11 = vsel %vm648_vm3, %v1555_v25, 0.0 }
 0x1ac   : > { %1417 = vrot.lane.b32.xlu1 %v1398_v42, %s3018_s4  ;;  %v211_v41 = vsub.f32 %v2890_v32, %v5644_v20  ;;  %v4070_v7 = vadd.f32 %v765_v53, %v764_v27  ;;  %v1480_v32 = vstv %s4033_s29  ;;  %v1201_v59 = vmul.f32 %v1193_v39, %v1193_v39 }
 0x1ad   : > { %v1561_v53 = vadd.f32 %v1560_v17, %v1559_v37  ;;  %v1399_v27 = vmul.f32 %v3719_v46, %v4013_v6  ;;  %v4084_v31 = vadd.f32 %v1215_v4, %v1214_v49  ;;  %v1706_v43 = vsub.f32 %v3938_v38, %v5601_v57 }
 0x1ae   : > { %v4050_v42 = vpop.permute.xlu1 %709  ;;  %1415 = vrot.lane.b32.xlu0 %v1397_v47, %s3018_s4  ;;  %v219_v63 = vmul.f32 %v211_v41, %v211_v41  ;;  %v1710_v25 = vsub.f32 %v3988_v51, %v5602_v60  ;;  %v224_v39 = vsel %vm220_vm4, %v216_v58, 0.0  ;;  %v4095_v47 = vld [vmem:[%s3114_s3 + $0x53] sm:$0xff]  ;;  %v1575_v15 = vmul.f32 1.442695, %v1572_v16 }
 0x1af   : > { %5643 = vst [vmem:[#allocation65_spill] sm:$0xff] %v4050_v42  ;;  %v1563_v17 = vadd.f32 %v1562_v11, %v1561_v53  ;;  %v4101_v4 = vmul.f32 %v2810_v22, %v1480_v32  ;;  %v758_v41 = vsel %vm220_vm4, %v751_v21, 0.0  ;;  %v1208_v58 = vsel %vm220_vm4, %v1201_v59, 0.0  ;;  %v2891_v11 = vld [vmem:[%s3114_s3 + $0x51] sm:$0xff] }
 0x1b0   : > { %1421 = vrot.lane.b32.xlu1 %v1400_v34, %s3018_s4  ;;  %v4072_v34 = vpop.permute.xlu0 %703  ;;  %v4111_v16 = vsub.f32 %v4087_v54, %v5641_v35  ;;  %v746_v53 = vsub.f32 %v2891_v11, %v5644_v20  ;;  %v4121_v22 = vadd.f32 %v224_v39, %v3873_v29  ;;  %v233_v21 = vsel %vm220_vm4, %v219_v63, 0.0 }
 0x1b1   : > { %5645 = vst [vmem:[#allocation66_spill] sm:$0xff] %v4072_v34  ;;  %v1712_v34 = vsub.f32 %v4095_v47, %v5603_v28  ;;  %v1718_v59 = vmul.f32 %v1710_v25, %v1710_v25  ;;  %v4125_v35 = vadd.f32 %v758_v41, %v3916_v3  ;;  %2813 = vpow2.f32 %v1575_v15 }
 0x1b2   : > { %v4074_v42 = vpop.permute.xlu1 %713  ;;  %5649 = vst [vmem:[#allocation70_spill] sm:$0xff] %v4111_v16  ;;  %1419 = vrot.lane.b32.xlu0 %v1399_v27, %s3018_s4  ;;  %v1571_v11 = vmul.f32 -0.5, %v1563_v17  ;;  %v4134_v29 = vadd.f32 %v1208_v58, %v3926_v1  ;;  %v1707_v3 = vsub.f32 %v3798_v5, %v5604_v8  ;;  %v234_v39 = vadd.f32 %v233_v21, %v232_v12  ;;  %v4153_v12 = vld [vmem:[%s3114_s3 + $0x4b] sm:$0xff] }
 0x1b3   : > { %5646 = vst [vmem:[#allocation67_spill] sm:$0xff] %v4074_v42  ;;  %v1716_v42 = vmul.f32 %v1708_v13, %v1708_v13  ;;  %v1714_v13 = vmul.f32 %v1706_v43, %v1706_v43  ;;  %v2812_v19 = vpop.eup %2811  ;;  %v1720_v43 = vmul.f32 %v1712_v34, %v1712_v34  ;;  %v754_v15 = vmul.f32 %v746_v53, %v746_v53 }
 0x1b4   : > { %1425 = vrot.lane.b32.xlu1 %v1402_v62, %s3018_s4  ;;  %v4097_v37 = vpop.permute.xlu0 %707  ;;  %v1660_v62 = vmul.f32 %v4005_v45, %v4005_v45  ;;  %v1401_v45 = vmul.f32 %v3726_v0, %v4013_v6  ;;  %v1494_v6 = vmul.f32 %v3685_v23, %v4101_v4  ;;  %v1705_v17 = vsub.f32 %v3837_v26, %v5605_v2 }
 0x1b5   : > { %5647 = vst [vmem:[#allocation68_spill] sm:$0xff] %v4097_v37  ;;  %v1729_v63 = vsel %vm303_vm1, %v1716_v42, 0.0  ;;  %v1196_v1 = vsub.f32 %v3695_v24, %v5644_v20  ;;  %v1728_v42 = vsel %vm303_vm1, %v1714_v13, 0.0  ;;  %v1731_v34 = vsel %vm303_vm1, %v1718_v59, 0.0 }
 0x1b6   : > { %v4099_v49 = vpop.permute.xlu1 %865  ;;  %v4140_v25 = vsel %vm220_vm4, %v1660_v62, 0.0  ;;  %1423 = vrot.lane.b32.xlu0 %v1401_v45, %s3018_s4  ;;  %v1709_v62 = vsub.f32 %v4087_v54, %v5606_v10  ;;  %v1730_v41 = vadd.f32 %v1729_v63, %v1728_v42  ;;  %v1573_v58 = vmul.f32 1.442695, %v1571_v11 }
 0x1b7   : > { %5648 = vst [vmem:[#allocation69_spill] sm:$0xff] %v4099_v49  ;;  %5652 = vst [vmem:[#allocation73_spill] sm:$0xff] %v4140_v25  ;;  %v4157_v45 = vmul.f32 %v2812_v19, %v1480_v32  ;;  %v4165_v13 = vsub.f32 %v4095_v47, %v5644_v20  ;;  %v1715_v59 = vmul.f32 %v1707_v3, %v1707_v3  ;;  %v236_v11 = vmul.f32 -0.5, %v234_v39  ;;  %v2892_v19 = vld [vmem:[%s3114_s3 + $0x48] sm:$0xff]  ;;  %v5656_v32 = vld [vmem:[#allocation15_spill] sm:$0xff] }
 0x1b8   : > { %1487 = vrot.lane.b32.xlu1 %v4101_v4, %s3022_s22  ;;  %v4127_v37 = vpop.permute.xlu0 %711  ;;  %v1711_v63 = vsub.f32 %v4153_v12, %v5607_v30  ;;  %v210_v42 = vsub.f32 %v2892_v19, %v5656_v32  ;;  %v767_v3 = vsel %vm220_vm4, %v754_v15, 0.0  ;;  %v1804_v20 = vsub.f32 %v3938_v38, %v3685_v23  ;;  %v2893_v15 = vld [vmem:[%s3114_s3 + $0x49] sm:$0xff] }
 0x1b9   : > { %5650 = vst [vmem:[#allocation71_spill] sm:$0xff] %v4127_v37  ;;  %5655 = vst [vmem:[#allocation76_spill] sm:$0xff] %v4165_v13  ;;  %v1733_v37 = vsel %vm303_vm1, %v1720_v43, 0.0  ;;  %v1717_v43 = vmul.f32 %v1709_v62, %v1709_v62  ;;  %v1806_v39 = vsub.f32 %v3879_v55, %v3675_v14  ;;  %2815 = vpow2.f32 %v1573_v58 }
 0x1ba   : > { %v4129_v27 = vpop.permute.xlu1 %869  ;;  %1485 = vrot.lane.b32.xlu0 %v4157_v45, %s3022_s22  ;;  %v745_v62 = vsub.f32 %v2893_v15, %v5656_v32  ;;  %v768_v58 = vadd.f32 %v767_v3, %v4070_v7  ;;  %v218_v19 = vmul.f32 %v210_v42, %v210_v42  ;;  %v1808_v15 = vsub.f32 %v3988_v51, %v3690_v33 }
 0x1bb   : > { %5651 = vst [vmem:[#allocation72_spill] sm:$0xff] %v4129_v27  ;;  %v1812_v13 = vmul.f32 %v1804_v20, %v1804_v20  ;;  %v1814_v16 = vmul.f32 %v1806_v39, %v1806_v39  ;;  %v1495_v7 = vmul.f32 %v3705_v44, %v4157_v45  ;;  %v1803_v39 = vsub.f32 %v3837_v26, %v3710_v56 }
 0x1bc   : > { %1511 = vrot.lane.b32.xlu1 %v1494_v6, %s3022_s22  ;;  %v4155_v53 = vpop.permute.xlu0 %863  ;;  %v1496_v6 = vmul.f32 %v3675_v14, %v4101_v4  ;;  %v1722_v14 = vsel %vm303_vm1, %v1715_v59, 0.0  ;;  %v753_v3 = vmul.f32 %v745_v62, %v745_v62  ;;  %v226_v20 = vsel %vm220_vm4, %v218_v19, 0.0 }
 0x1bd   : > { %5653 = vst [vmem:[#allocation74_spill] sm:$0xff] %v4155_v53  ;;  %v1732_v53 = vadd.f32 %v1731_v34, %v1730_v41  ;;  %v1498_v41 = vmul.f32 %v3690_v33, %v4101_v4  ;;  %v1578_v33 = vstv %s4170_s30  ;;  %v1827_v62 = vsel %vm402_vm0, %v1814_v16, 0.0 }
 0x1be   : > { %v4159_v21 = vpop.permute.xlu1 %873  ;;  %v2814_v42 = vpop.eup %2813  ;;  %v1497_v19 = vmul.f32 %v3719_v46, %v4157_v45  ;;  %v760_v16 = vsel %vm220_vm4, %v753_v3, 0.0 }
 0x1bf   : > { %5654 = vst [vmem:[#allocation75_spill] sm:$0xff] %v4159_v21  ;;  %v1713_v21 = vmul.f32 %v1705_v17, %v1705_v17  ;;  %v1734_v27 = vadd.f32 %v1733_v37, %v1732_v53  ;;  %v1493_v17 = vmul.f32 %v3710_v56, %v4157_v45  ;;  %v1719_v37 = vmul.f32 %v1711_v63, %v1711_v63 }
 0x1c0   : > { %1515 = vrot.lane.b32.xlu1 %v1496_v6, %s3022_s22  ;;  %v4182_v49 = vpop.permute.xlu0 %867  ;;  %v1195_v6 = vsub.f32 %v3726_v0, %v5656_v32  ;;  %v1204_v53 = vmul.f32 %v1196_v1, %v1196_v1  ;;  %v239_v56 = vmul.f32 1.442695, %v236_v11 }
 0x1c1   : > { %5657 = vst [vmem:[#allocation77_spill] sm:$0xff] %v4182_v49  ;;  %v1721_v49 = vsel %vm303_vm1, %v1713_v21, 0.0  ;;  %1509 = vrot.lane.b32.xlu0 %v1493_v17, %s3022_s22  ;;  %v1736_v63 = vmul.f32 -0.5, %v1734_v27  ;;  %v1500_v21 = vmul.f32 %v3695_v24, %v4101_v4  ;;  %v1726_v17 = vsel %vm303_vm1, %v1719_v37, 0.0 }
 0x1c2   : > { %v4186_v34 = vpop.permute.xlu1 %877  ;;  %v1723_v59 = vadd.f32 %v1722_v14, %v1721_v49  ;;  %v1810_v27 = vsub.f32 %v4095_v47, %v3695_v24  ;;  %v1816_v4 = vmul.f32 %v1808_v15, %v1808_v15  ;;  %v4229_v24 = vmul.f32 %v2814_v42, %v1578_v33 }
 0x1c3   : > { %5658 = vst [vmem:[#allocation78_spill] sm:$0xff] %v4186_v34  ;;  %v1724_v34 = vsel %vm303_vm1, %v1717_v43, 0.0  ;;  %v1203_v43 = vmul.f32 %v1195_v6, %v1195_v6  ;;  %v1805_v6 = vsub.f32 %v3798_v5, %v3705_v44  ;;  %v1739_v14 = vmul.f32 1.442695, %v1736_v63 }
 0x1c4   : > { %1519 = vrot.lane.b32.xlu1 %v1498_v41, %s3022_s22  ;;  %v4202_v25 = vpop.permute.xlu0 %871  ;;  %v1725_v49 = vadd.f32 %v1724_v34, %v1723_v59  ;;  %v1826_v41 = vsel %vm402_vm0, %v1812_v13, 0.0  ;;  %v770_v15 = vmul.f32 -0.5, %v768_v58  ;;  %v1217_v13 = vsel %vm220_vm4, %v1204_v53, 0.0 }
 0x1c5   : > { %5659 = vst [vmem:[#allocation79_spill] sm:$0xff] %v4202_v25  ;;  %1513 = vrot.lane.b32.xlu0 %v1495_v7, %s3022_s22  ;;  %v227_v7 = vadd.f32 %v226_v20, %v4121_v22  ;;  %v1210_v44 = vsel %vm220_vm4, %v1203_v43, 0.0  ;;  %v1828_v63 = vadd.f32 %v1827_v62, %v1826_v41  ;;  %v1818_v42 = vmul.f32 %v1810_v27, %v1810_v27  ;;  %v4257_v62 = vld [vmem:[%s3114_s3 + $0x24] sm:$0xff] }
 0x1c6   : > { %v4206_v1 = vpop.permute.xlu1 %939  ;;  %v1727_v34 = vadd.f32 %v1726_v17, %v1725_v49  ;;  %v1829_v11 = vsel %vm402_vm0, %v1816_v4, 0.0  ;;  %v1811_v58 = vmul.f32 %v1803_v39, %v1803_v39  ;;  %v1813_v53 = vmul.f32 %v1805_v6, %v1805_v6  ;;  %v2816_v49 = vpop.eup %2815 }
 0x1c7   : > { %5660 = vst [vmem:[#allocation80_spill] sm:$0xff] %v4206_v1  ;;  %2817 = vpow2.f32 %v1739_v14  ;;  %v1499_v43 = vmul.f32 %v3726_v0, %v4157_v45  ;;  %v1592_v20 = vmul.f32 %v3685_v23, %v4229_v24  ;;  %v1218_v27 = vadd.f32 %v1217_v13, %v4084_v31  ;;  %v5680_v1 = vld [vmem:[#allocation34_spill] sm:$0xff] }
 0x1c8   : > { %1523 = vrot.lane.b32.xlu1 %v1500_v21, %s3022_s22  ;;  %v4223_v37 = vpop.permute.xlu0 %875  ;;  %v1807_v21 = vsub.f32 %v4087_v54, %v3719_v46  ;;  %v1735_v3 = vmul.f32 -0.5, %v1727_v34  ;;  %v773_v46 = vmul.f32 1.442695, %v770_v15  ;;  %v761_v39 = vadd.f32 %v760_v16, %v4125_v35  ;;  %v4271_v15 = vld [vmem:[%s3114_s3 + $0x22] sm:$0xff]  ;;  %v4276_v16 = vld [vmem:[%s3114_s3 + $0xc] sm:$0xff] }
 0x1c9   : > { %5661 = vst [vmem:[#allocation81_spill] sm:$0xff] %v4223_v37  ;;  %1517 = vrot.lane.b32.xlu0 %v1497_v19, %s3022_s22  ;;  %v1211_v4 = vadd.f32 %v1210_v44, %v4134_v29  ;;  %2819 = vpow2.f32 %v239_v56  ;;  %v235_v41 = vmul.f32 -0.5, %v227_v7  ;;  %v1830_v45 = vadd.f32 %v1829_v11, %v1828_v63  ;;  %v4359_v37 = vld [vmem:[%s3114_s3 + $0x4c] sm:$0xff] }
 0x1ca   : > { %v4227_v59 = vpop.permute.xlu1 %963  ;;  %v1809_v23 = vsub.f32 %v4153_v12, %v3726_v0  ;;  %v1831_v31 = vsel %vm402_vm0, %v1818_v42, 0.0  ;;  %v1815_v6 = vmul.f32 %v1807_v21, %v1807_v21  ;;  %v1819_v35 = vsel %vm402_vm0, %v1811_v58, 0.0 }
 0x1cb   : > { %5662 = vst [vmem:[#allocation82_spill] sm:$0xff] %v4227_v59  ;;  %v1820_v29 = vsel %vm402_vm0, %v1813_v53, 0.0  ;;  %v2166_v14 = vsub.f32 %v4257_v62, %v5600_v61  ;;  %v1737_v34 = vmul.f32 1.442695, %v1735_v3  ;;  %v4266_v56 = vmul.f32 %v2816_v49, %v1578_v33  ;;  %v4281_v61 = vld [vmem:[%s3114_s3 + $0x1c] sm:$0xff]  ;;  %v4284_v33 = vld [vmem:[%s3114_s3 + $0x4] sm:$0xff] }
 0x1cc   : > { %1585 = vrot.lane.b32.xlu1 %v4229_v24, %s3023_s23  ;;  %v4241_v22 = vpop.permute.xlu0 %937  ;;  %v1594_v13 = vmul.f32 %v4271_v15, %v4229_v24  ;;  %2821 = vpow2.f32 %v773_v46  ;;  %v1220_v7 = vmul.f32 -0.5, %v1218_v27  ;;  %v769_v44 = vmul.f32 -0.5, %v761_v39  ;;  %5667 = vst [vmem:[#allocation87_spill] sm:$0xff] %v4284_v33  ;;  %v4297_v49 = vld [vmem:[%s3114_s3 + $0x34] sm:$0xff]  ;;  %v4302_v27 = vld [vmem:[%s3114_s3 + $0x2] sm:$0xff] }
 0x1cd   : > { %5663 = vst [vmem:[#allocation83_spill] sm:$0xff] %v4241_v22  ;;  %1521 = vrot.lane.b32.xlu0 %v1499_v43, %s3022_s22  ;;  %v1219_v63 = vmul.f32 -0.5, %v1211_v4  ;;  %v237_v21 = vmul.f32 1.442695, %v235_v41  ;;  %v2164_v42 = vsub.f32 %v4276_v16, %v5601_v57  ;;  %v1832_v11 = vadd.f32 %v1831_v31, %v1830_v45 }
 0x1ce   : > { %v4245_v17 = vpop.permute.xlu1 %967  ;;  %v1821_v58 = vadd.f32 %v1820_v29, %v1819_v35  ;;  %v2163_v53 = vsub.f32 %v4284_v33, %v5605_v2  ;;  %v2165_v3 = vsub.f32 %v4281_v61, %v5604_v8  ;;  %v1817_v43 = vmul.f32 %v1809_v23, %v1809_v23  ;;  %v4309_v2 = vld [vmem:[%s3114_s3 + $0x3a] sm:$0xff] }
 0x1cf   : > { %5664 = vst [vmem:[#allocation84_spill] sm:$0xff] %v4245_v17  ;;  %v2174_v57 = vmul.f32 %v2166_v14, %v2166_v14  ;;  %2823 = vpow2.f32 %v1737_v34  ;;  %v1591_v39 = vmul.f32 %v4302_v27, %v4266_v56  ;;  %v1596_v8 = vmul.f32 %v4309_v2, %v4229_v24 }
 0x1d0   : > { %1609 = vrot.lane.b32.xlu1 %v1592_v20, %s3023_s23  ;;  %v4264_v19 = vpop.permute.xlu0 %961  ;;  %v1822_v20 = vsel %vm402_vm0, %v1815_v6, 0.0  ;;  %v4313_v41 = vmul.f32 1.442695, %v1220_v7  ;;  %v771_v45 = vmul.f32 1.442695, %v769_v44  ;;  %v2167_v31 = vsub.f32 %v4297_v49, %v5606_v10  ;;  %v4320_v6 = vld [vmem:[%s3114_s3 + $0x3c] sm:$0xff] }
 0x1d1   : > { %5665 = vst [vmem:[#allocation85_spill] sm:$0xff] %v4264_v19  ;;  %1583 = vrot.lane.b32.xlu0 %v4266_v56, %s3023_s23  ;;  %v4315_v23 = vmul.f32 1.442695, %v1219_v63  ;;  %2825 = vpow2.f32 %v237_v21  ;;  %v2172_v35 = vmul.f32 %v2164_v42, %v2164_v42  ;;  %v1834_v29 = vmul.f32 -0.5, %v1832_v11  ;;  %v4333_v42 = vld [vmem:[%s3114_s3 + $0x1a] sm:$0xff] }
 0x1d2   : > { %v4268_v0 = vpop.permute.xlu1 %971  ;;  %v1823_v14 = vadd.f32 %v1822_v20, %v1821_v58  ;;  %v2171_v34 = vmul.f32 %v2163_v53, %v2163_v53  ;;  %v2168_v7 = vsub.f32 %v4320_v6, %v5602_v60  ;;  %v1824_v44 = vsel %vm402_vm0, %v1817_v43, 0.0  ;;  %v4340_v53 = vld [vmem:[%s3114_s3 + $0x52] sm:$0xff] }
 0x1d3   : > { %5666 = vst [vmem:[#allocation86_spill] sm:$0xff] %v4268_v0  ;;  %v2187_v10 = vsel %vm303_vm1, %v2174_v57, 0.0  ;;  %v1904_v63 = vsub.f32 %v3879_v55, %v3342_v50  ;;  %v1593_v11 = vmul.f32 %v4333_v42, %v4266_v56  ;;  %v1598_v60 = vmul.f32 %v4340_v53, %v4229_v24 }
 0x1d4   : > { %1613 = vrot.lane.b32.xlu1 %v1594_v13, %s3023_s23  ;;  %v4299_v46 = vpop.permute.xlu0 %965  ;;  %v2173_v13 = vmul.f32 %v2165_v3, %v2165_v3  ;;  %v2818_v3 = vpop.eup %2817  ;;  %2827 = vpow2.f32 %v771_v45  ;;  %v2175_v43 = vmul.f32 %v2167_v31, %v2167_v31  ;;  %v1902_v20 = vsub.f32 %v3938_v38, %v3338_v48 }
 0x1d5   : > { %5668 = vst [vmem:[#allocation88_spill] sm:$0xff] %v4299_v46  ;;  %1607 = vrot.lane.b32.xlu0 %v1591_v39, %s3023_s23  ;;  %v2186_v39 = vsel %vm303_vm1, %v2172_v35, 0.0  ;;  %v1837_v24 = vmul.f32 1.442695, %v1834_v29  ;;  %v1825_v22 = vadd.f32 %v1824_v44, %v1823_v14  ;;  %v2179_v45 = vsel %vm303_vm1, %v2171_v34, 0.0  ;;  %v4366_v29 = vld [vmem:[%s3114_s3 + $0x32] sm:$0xff] }
 0x1d6   : > { %v4306_v4 = vpop.permute.xlu1 %975  ;;  %v4355_v31 = vadd.f32 %v2187_v10, %v2186_v39  ;;  %v2180_v57 = vsel %vm303_vm1, %v2173_v13, 0.0  ;;  %v2176_v35 = vmul.f32 %v2168_v7, %v2168_v7  ;;  %v1912_v25 = vmul.f32 %v1904_v63, %v1904_v63  ;;  %5675 = vst [vmem:[#allocation93_spill] sm:$0xff] %v4366_v29  ;;  %v4384_v46 = vld [vmem:[%s3114_s3 + $0x54] sm:$0xff] }
 0x1d7   : > { %5669 = vst [vmem:[#allocation89_spill] sm:$0xff] %v4306_v4  ;;  %v1595_v14 = vmul.f32 %v4366_v29, %v4266_v56  ;;  %v5677_v44 = vstv %s4278_s6  ;;  %v2182_v13 = vsel %vm303_vm1, %v2175_v43, 0.0  ;;  %v2169_v7 = vsub.f32 %v4359_v37, %v5607_v30 }
 0x1d8   : > { %1617 = vrot.lane.b32.xlu1 %v1596_v8, %s3023_s23  ;;  %v4330_v21 = vpop.permute.xlu0 %969  ;;  %v1906_v8 = vsub.f32 %v3988_v51, %v3346_v52  ;;  %v4374_v10 = vmul.f32 %v2818_v3, %v5677_v44  ;;  %v1910_v63 = vmul.f32 %v1902_v20, %v1902_v20  ;;  %v1901_v0 = vsub.f32 %v3837_v26, %v5680_v1  ;;  %v5681_v20 = vld [vmem:[#allocation36_spill] sm:$0xff] }
 0x1d9   : > { %5670 = vst [vmem:[#allocation90_spill] sm:$0xff] %v4330_v21  ;;  %1611 = vrot.lane.b32.xlu0 %v1593_v11, %s3023_s23  ;;  %v4352_v21 = vpop.eup %2819  ;;  %2829 = vpow2.f32 %v1837_v24  ;;  %v1833_v30 = vmul.f32 -0.5, %v1825_v22  ;;  %v2181_v3 = vadd.f32 %v2180_v57, %v2179_v45  ;;  %v2189_v43 = vsel %vm303_vm1, %v2176_v35, 0.0 }
 0x1da   : > { %v4337_v58 = vpop.permute.xlu1 %1037  ;;  %5672 = vst [vmem:[#allocation92_spill] sm:$0xff] %v4352_v21  ;;  %v1914_v19 = vmul.f32 %v1906_v8, %v1906_v8  ;;  %v1905_v44 = vsub.f32 %v4087_v54, %v5681_v20  ;;  %v1925_v17 = vsel %vm525_vm2, %v1912_v25, 0.0  ;;  %v1756_v57 = vmul.f32 %v4374_v10, %v3938_v38 }
 0x1db   : > { %5671 = vst [vmem:[#allocation91_spill] sm:$0xff] %v4337_v58  ;;  %v5673_v58 = vld [vmem:[#allocation37_spill] sm:$0xff]  ;;  %v2177_v35 = vmul.f32 %v2169_v7, %v2169_v7 }
 0x1dc   : > { %1621 = vrot.lane.b32.xlu1 %v1598_v60, %s3023_s23  ;;  %v1908_v11 = vsub.f32 %v4095_v47, %v5673_v58  ;;  %v4363_v4 = vpop.permute.xlu0 %973  ;;  %v5678_v60 = vld [vmem:[#allocation35_spill] sm:$0xff]  ;;  %v1927_v21 = vsel %vm525_vm2, %v1914_v19, 0.0 }
 0x1dd   : > { %5674 = vst [vmem:[#allocation37_spill] sm:$0xff] %v4363_v4  ;;  %v1903_v39 = vsub.f32 %v3798_v5, %v5678_v60  ;;  %v4381_v4 = vpop.eup %2821  ;;  %1615 = vrot.lane.b32.xlu0 %v1595_v14, %s3023_s23  ;;  %v2170_v5 = vsub.f32 %v4384_v46, %v5603_v28  ;;  %v4400_v14 = vld [vmem:[%s3114_s3 + $0x4a] sm:$0xff]  ;;  %v2183_v28 = vadd.f32 %v2182_v13, %v2181_v3  ;;  %v5686_v3 = vstv %s4278_s6 }
 0x1de   : > { %v4370_v34 = vpop.permute.xlu1 %1061  ;;  %5679 = vst [vmem:[#allocation35_spill] sm:$0xff] %v4381_v4  ;;  %v1597_v24 = vmul.f32 %v4400_v14, %v4266_v56  ;;  %v2824_v45 = vpop.eup %2823  ;;  %v5684_v4 = vld [vmem:[#allocation38_spill] sm:$0xff]  ;;  %v1835_v56 = vmul.f32 1.442695, %v1833_v30  ;;  %v2361_v7 = vsub.f32 %v4281_v61, %v5678_v60  ;;  %v2359_v60 = vsub.f32 %v4284_v33, %v5680_v1 }
 0x1df   : > { %5676 = vst [vmem:[#allocation94_spill] sm:$0xff] %v4370_v34  ;;  %v1916_v34 = vmul.f32 %v1908_v11, %v1908_v11  ;;  %v1911_v59 = vmul.f32 %v1903_v39, %v1903_v39  ;;  %v1907_v25 = vsub.f32 %v4153_v12, %v5684_v4  ;;  %v1924_v11 = vsel %vm525_vm2, %v1910_v63, 0.0 }
 0x1e0   : > { %1749 = vrot.lane.b32.xlu1 %v4374_v10, %s3019_s5  ;;  %v4397_v8 = vpop.permute.xlu0 %1035  ;;  %v2178_v40 = vmul.f32 %v2170_v5, %v2170_v5  ;;  %v1926_v13 = vadd.f32 %v1925_v17, %v1924_v11  ;;  %v1913_v39 = vmul.f32 %v1905_v44, %v1905_v44  ;;  %v1758_v17 = vmul.f32 %v4374_v10, %v3879_v55 }
 0x1e1   : > { %5682 = vst [vmem:[#allocation34_spill] sm:$0xff] %v4397_v8  ;;  %v1909_v8 = vmul.f32 %v1901_v0, %v1901_v0  ;;  %1619 = vrot.lane.b32.xlu0 %v1597_v24, %s3023_s23  ;;  %v2360_v0 = vsub.f32 %v4276_v16, %v3338_v48  ;;  %v1929_v19 = vsel %vm525_vm2, %v1916_v34, 0.0  ;;  %v4427_v24 = vmul.f32 %v2824_v45, %v5686_v3 }
 0x1e2   : > { %v4404_v22 = vpop.permute.xlu1 %1065  ;;  %v1918_v5 = vsel %vm525_vm2, %v1911_v59, 0.0  ;;  %v1928_v44 = vadd.f32 %v1927_v21, %v1926_v13  ;;  %v2184_v34 = vsel %vm303_vm1, %v2177_v35, 0.0  ;;  %v2362_v45 = vsub.f32 %v4257_v62, %v3342_v50 }
 0x1e3   : > { %5683 = vst [vmem:[#allocation36_spill] sm:$0xff] %v4404_v22  ;;  %v4414_v22 = vpop.eup %2825  ;;  %v1917_v11 = vsel %vm525_vm2, %v1909_v8, 0.0  ;;  %2831 = vpow2.f32 %v1835_v56  ;;  %v2369_v1 = vmul.f32 %v2361_v7, %v2361_v7  ;;  %v1920_v59 = vsel %vm525_vm2, %v1913_v39, 0.0 }
 0x1e4   : > { %1773 = vrot.lane.b32.xlu1 %v1756_v57, %s3019_s5  ;;  %v4423_v63 = vpop.permute.xlu0 %1059  ;;  %v1915_v57 = vmul.f32 %v1907_v25, %v1907_v25  ;;  %v4436_v48 = vpop.eup %2827  ;;  %v2363_v21 = vsub.f32 %v4297_v49, %v5681_v20  ;;  %v1930_v25 = vadd.f32 %v1929_v19, %v1928_v44  ;;  %v2190_v35 = vadd.f32 %v2189_v43, %v4355_v31 }
 0x1e5   : > { %5685 = vst [vmem:[#allocation38_spill] sm:$0xff] %v4423_v63  ;;  %1747 = vrot.lane.b32.xlu0 %v4427_v24, %s3019_s5  ;;  %v1919_v13 = vadd.f32 %v1918_v5, %v1917_v11  ;;  %v1755_v50 = vmul.f32 %v4427_v24, %v3837_v26  ;;  %v1760_v56 = vmul.f32 %v4374_v10, %v3988_v51  ;;  %v2191_v31 = vsel %vm303_vm1, %v2178_v40, 0.0  ;;  %v4470_v11 = vld [vmem:[%s3114_s3 + $0x1b] sm:$0xff]  ;;  %v5704_v63 = vld [vmem:[#allocation45_spill] sm:$0xff] }
 0x1e6   : > { %v4429_v30 = vpop.permute.xlu1 %1069  ;;  %v2185_v7 = vadd.f32 %v2184_v34, %v2183_v28  ;;  %v2368_v39 = vmul.f32 %v2360_v0, %v2360_v0  ;;  %v1922_v20 = vsel %vm525_vm2, %v1915_v57, 0.0  ;;  %v2370_v43 = vmul.f32 %v2362_v45, %v2362_v45  ;;  %v2830_v26 = vpop.eup %2829 }
 0x1e7   : > { %5687 = vst [vmem:[#allocation95_spill] sm:$0xff] %v4429_v30  ;;  %v2364_v19 = vsub.f32 %v4320_v6, %v3346_v52  ;;  %v1921_v5 = vadd.f32 %v1920_v59, %v1919_v13  ;;  %v2376_v44 = vsel %vm525_vm2, %v2369_v1, 0.0  ;;  %v2371_v28 = vmul.f32 %v2363_v21, %v2363_v21  ;;  %v5692_v13 = vld [vmem:[#allocation39_spill] sm:$0xff] }
 0x1e8   : > { %1777 = vrot.lane.b32.xlu1 %v1758_v17, %s3019_s5  ;;  %v4449_v8 = vpop.permute.xlu0 %1063  ;;  %v2367_v17 = vmul.f32 %v2359_v60, %v2359_v60  ;;  %v1932_v0 = vmul.f32 -0.5, %v1930_v25  ;;  %v1840_v60 = vstv %s4418_s7  ;;  %v2002_v57 = vsub.f32 %v3879_v55, %v5594_v9 }
 0x1e9   : > { %5688 = vst [vmem:[#allocation96_spill] sm:$0xff] %v4449_v8  ;;  %1771 = vrot.lane.b32.xlu0 %v1755_v50, %s3019_s5  ;;  %v1923_v34 = vadd.f32 %v1922_v20, %v1921_v5  ;;  %v1757_v52 = vmul.f32 %v4470_v11, %v4427_v24  ;;  %v1762_v59 = vmul.f32 %v4374_v10, %v4095_v47  ;;  %v4480_v21 = vmul.f32 -0.5, %v2185_v7  ;;  %v5693_v20 = vld [vmem:[#allocation43_spill] sm:$0xff]  ;;  %v5700_v8 = vld [vmem:[#allocation44_spill] sm:$0xff] }
 0x1ea   : > { %v4453_v3 = vpop.permute.xlu1 %1073  ;;  %v4478_v1 = vadd.f32 %v2191_v31, %v2190_v35  ;;  %v2382_v25 = vsel %vm525_vm2, %v2368_v39, 0.0  ;;  %v2000_v55 = vsub.f32 %v3938_v38, %v5692_v13  ;;  %v2375_v50 = vsel %vm525_vm2, %v2367_v17, 0.0 }
 0x1eb   : > { %5689 = vst [vmem:[#allocation97_spill] sm:$0xff] %v4453_v3  ;;  %v2004_v5 = vsub.f32 %v3988_v51, %v5693_v20  ;;  %v4490_v10 = vmul.f32 %v2830_v26, %v1840_v60  ;;  %v2383_v35 = vsel %vm525_vm2, %v2370_v43, 0.0  ;;  %v2377_v7 = vadd.f32 %v2376_v44, %v2375_v50  ;;  %v4523_v50 = vld [vmem:[%s3114_s3 + $0x3] sm:$0xff] }
 0x1ec   : > { %1781 = vrot.lane.b32.xlu1 %v1760_v56, %s3019_s5  ;;  %v4467_v40 = vpop.permute.xlu0 %1067  ;;  %v2372_v56 = vmul.f32 %v2364_v19, %v2364_v19  ;;  %v1935_v31 = vmul.f32 1.442695, %v1932_v0  ;;  %v2365_v39 = vsub.f32 %v4359_v37, %v5684_v4  ;;  %v1931_v17 = vmul.f32 -0.5, %v1923_v34  ;;  %5696 = vst [vmem:[#allocation100_spill] sm:$0xff] %v4523_v50 }
 0x1ed   : > { %5690 = vst [vmem:[#allocation98_spill] sm:$0xff] %v4467_v40  ;;  %1775 = vrot.lane.b32.xlu0 %v1757_v52, %s3019_s5  ;;  %v2378_v40 = vsel %vm525_vm2, %v2371_v28, 0.0  ;;  %v2010_v19 = vmul.f32 %v2002_v57, %v2002_v57  ;;  %v1759_v52 = vmul.f32 %v4427_v24, %v4087_v54  ;;  %v2366_v26 = vsub.f32 %v4384_v46, %v5673_v58 }
 0x1ee   : > { %v4474_v45 = vpop.permute.xlu1 %1135  ;;  %v2008_v43 = vmul.f32 %v2000_v55, %v2000_v55  ;;  %v2458_v44 = vsub.f32 %v4276_v16, %v5692_v13  ;;  %v2006_v4 = vsub.f32 %v4095_v47, %v3439_v36  ;;  %v4508_v28 = vadd.f32 %v2383_v35, %v2382_v25 }
 0x1ef   : > { %5691 = vst [vmem:[#allocation99_spill] sm:$0xff] %v4474_v45  ;;  %v4511_v0 = vsel %vm525_vm2, %v2372_v56, 0.0  ;;  %v2012_v34 = vmul.f32 %v2004_v5, %v2004_v5  ;;  %v1854_v58 = vmul.f32 %v4490_v10, %v3938_v38  ;;  %2833 = vpow2.f32 %v1935_v31  ;;  %v5697_v56 = vld [vmem:[#allocation40_spill] sm:$0xff] }
 0x1f0   : > { %1785 = vrot.lane.b32.xlu1 %v1762_v59, %s3019_s5  ;;  %v4496_v45 = vpop.permute.xlu0 %1071  ;;  %v2832_v57 = vpop.eup %2831  ;;  %v4518_v59 = vadd.f32 %v2378_v40, %v2377_v7  ;;  %v2373_v13 = vmul.f32 %v2365_v39, %v2365_v39  ;;  %v2001_v25 = vsub.f32 %v4470_v11, %v5597_v18  ;;  %v1933_v55 = vmul.f32 1.442695, %v1931_v17 }
 0x1f1   : > { %5694 = vst [vmem:[#allocation39_spill] sm:$0xff] %v4496_v45  ;;  %1779 = vrot.lane.b32.xlu0 %v1759_v52, %s3019_s5  ;;  %v1999_v5 = vsub.f32 %v4523_v50, %v5697_v56  ;;  %v2023_v35 = vsel %vm648_vm3, %v2010_v19, 0.0  ;;  %v1761_v38 = vmul.f32 %v4427_v24, %v4153_v12  ;;  %v4534_v7 = vmul.f32 %v2366_v26, %v2366_v26  ;;  %v4545_v24 = vld [vmem:[%s3114_s3 + $0x23] sm:$0xff] }
 0x1f2   : > { %v4500_v3 = vpop.permute.xlu1 %1159  ;;  %v2022_v31 = vsel %vm648_vm3, %v2008_v43, 0.0  ;;  %v2466_v39 = vmul.f32 %v2458_v44, %v2458_v44  ;;  %v2014_v17 = vmul.f32 %v2006_v4, %v2006_v4  ;;  %v2025_v45 = vsel %vm648_vm3, %v2012_v34, 0.0  ;;  %5701 = vst [vmem:[#allocation44_spill] sm:$0xff] %v4545_v24 }
 0x1f3   : > { %5695 = vst [vmem:[#allocation43_spill] sm:$0xff] %v4500_v3  ;;  %v2003_v30 = vsub.f32 %v4087_v54, %v5700_v8  ;;  %v4541_v19 = vmul.f32 %v2832_v57, %v1840_v60  ;;  %v1856_v26 = vmul.f32 %v4545_v24, %v4490_v10  ;;  %v2009_v43 = vmul.f32 %v2001_v25, %v2001_v25 }
 0x1f4   : > { %1847 = vrot.lane.b32.xlu1 %v4490_v10, %s3018_s4  ;;  %v4528_v52 = vpop.permute.xlu0 %1133  ;;  %v2261_v44 = vsub.f32 %v4284_v33, %v4302_v27  ;;  %v2263_v4 = vsub.f32 %v4281_v61, %v4333_v42  ;;  %2835 = vpow2.f32 %v1933_v55  ;;  %v4554_v34 = vsel %vm525_vm2, %v2373_v13, 0.0 }
 0x1f5   : > { %5698 = vst [vmem:[#allocation40_spill] sm:$0xff] %v4528_v52  ;;  %1783 = vrot.lane.b32.xlu0 %v1761_v38, %s3019_s5  ;;  %v2024_v52 = vadd.f32 %v2023_v35, %v2022_v31  ;;  %v2007_v60 = vmul.f32 %v1999_v5, %v1999_v5  ;;  %v2460_v25 = vsub.f32 %v4257_v62, %v5594_v9  ;;  %v2027_v31 = vsel %vm648_vm3, %v2014_v17, 0.0 }
 0x1f6   : > { %v4532_v40 = vpop.permute.xlu1 %1163  ;;  %v2005_v55 = vsub.f32 %v4153_v12, %v5704_v63  ;;  %v2480_v13 = vsel %vm648_vm3, %v2466_v39, 0.0  ;;  %v2011_v5 = vmul.f32 %v2003_v30, %v2003_v30  ;;  %v1858_v9 = vmul.f32 %v4490_v10, %v3988_v51 }
 0x1f7   : > { %5699 = vst [vmem:[#allocation101_spill] sm:$0xff] %v4532_v40  ;;  %v2026_v35 = vadd.f32 %v2025_v45, %v2024_v52  ;;  %v2016_v45 = vsel %vm648_vm3, %v2009_v43, 0.0  ;;  %v2265_v52 = vsub.f32 %v4297_v49, %v4366_v29  ;;  %v2269_v17 = vmul.f32 %v2261_v44, %v2261_v44 }
 0x1f8   : > { %1871 = vrot.lane.b32.xlu1 %v1854_v58, %s3018_s4  ;;  %v2457_v58 = vsub.f32 %v4284_v33, %v5697_v56  ;;  %v4558_v57 = vpop.permute.xlu0 %1157  ;;  %v1853_v56 = vmul.f32 %v4523_v50, %v4541_v19  ;;  %v2459_v30 = vsub.f32 %v4281_v61, %v5597_v18  ;;  %v2462_v39 = vsub.f32 %v4320_v6, %v5693_v20 }
 0x1f9   : > { %5702 = vst [vmem:[#allocation102_spill] sm:$0xff] %v4558_v57  ;;  %1845 = vrot.lane.b32.xlu0 %v4541_v19, %s3018_s4  ;;  %v2461_v57 = vsub.f32 %v4297_v49, %v5700_v8  ;;  %v2015_v43 = vsel %vm648_vm3, %v2007_v60, 0.0  ;;  %v2468_v33 = vmul.f32 %v2460_v25, %v2460_v25  ;;  %v2013_v44 = vmul.f32 %v2005_v55, %v2005_v55 }
 0x1fa   : > { %v4560_v38 = vpop.permute.xlu1 %1167  ;;  %v2465_v3 = vmul.f32 %v2457_v58, %v2457_v58  ;;  %v2018_v29 = vsel %vm648_vm3, %v2011_v5, 0.0  ;;  %v1855_v18 = vmul.f32 %v4470_v11, %v4541_v19  ;;  %v1860_v61 = vmul.f32 %v4490_v10, %v4095_v47 }
 0x1fb   : > { %5703 = vst [vmem:[#allocation103_spill] sm:$0xff] %v4560_v38  ;;  %v2271_v38 = vmul.f32 %v2263_v4, %v2263_v4  ;;  %v2017_v4 = vadd.f32 %v2016_v45, %v2015_v43  ;;  %v2267_v49 = vsub.f32 %v4359_v37, %v4400_v14  ;;  %v2273_v8 = vmul.f32 %v2265_v52, %v2265_v52 }
 0x1fc   : > { %1875 = vrot.lane.b32.xlu1 %v1856_v26, %s3018_s4  ;;  %v2028_v26 = vadd.f32 %v2027_v31, %v2026_v35  ;;  %v4586_v40 = vpop.permute.xlu0 %1161  ;;  %v2277_v20 = vsel %vm402_vm0, %v2269_v17, 0.0  ;;  %v2834_v58 = vpop.eup %2833  ;;  %v2467_v25 = vmul.f32 %v2459_v30, %v2459_v30  ;;  %v2470_v35 = vmul.f32 %v2462_v39, %v2462_v39  ;;  %v4619_v30 = vld [vmem:[%s3114_s3 + $0xa] sm:$0xff] }
 0x1fd   : > { %1869 = vrot.lane.b32.xlu0 %v1853_v56, %s3018_s4  ;;  %v2278_v60 = vsel %vm402_vm0, %v2271_v38, 0.0  ;;  %v2469_v31 = vmul.f32 %v2461_v57, %v2461_v57  ;;  %v2020_v47 = vsel %vm648_vm3, %v2013_v44, 0.0  ;;  %v2463_v14 = vsub.f32 %v4359_v37, %v5704_v63 }
 0x1fe   : > { %v4588_v51 = vpop.permute.xlu1 %1171  ;;  %v2030_v55 = vmul.f32 -0.5, %v2028_v26  ;;  %v1938_v10 = vstv %s4567_s8  ;;  %v2481_v45 = vsel %vm648_vm3, %v2468_v33, 0.0  ;;  %v2464_v38 = vsub.f32 %v4384_v46, %v3439_v36 }
 0x1ff   : > { %v1857_v57 = vmul.f32 %v4541_v19, %v4087_v54  ;;  %v2279_v52 = vadd.f32 %v2278_v60, %v2277_v20  ;;  %v2280_v17 = vsel %vm402_vm0, %v2273_v8, 0.0  ;;  %v2262_v37 = vsub.f32 %v4276_v16, %v4619_v30 }
 0x200   : > { %1879 = vrot.lane.b32.xlu1 %v1858_v9, %s3018_s4  ;;  %v4602_v5 = vpop.permute.xlu0 %1165  ;;  %v2019_v9 = vadd.f32 %v2018_v29, %v2017_v4  ;;  %v2275_v29 = vmul.f32 %v2267_v49, %v2267_v49  ;;  %v2264_v33 = vsub.f32 %v4257_v62, %v4271_v15  ;;  %v2473_v36 = vsel %vm648_vm3, %v2465_v3, 0.0 }
 0x201   : > { %5705 = vst [vmem:[#allocation45_spill] sm:$0xff] %v4602_v5  ;;  %1873 = vrot.lane.b32.xlu0 %v1855_v18, %s3018_s4  ;;  %v2033_v63 = vmul.f32 1.442695, %v2030_v55  ;;  %v4630_v43 = vmul.f32 %v2834_v58, %v1938_v10  ;;  %v2836_v44 = vpop.eup %2835  ;;  %v2482_v4 = vadd.f32 %v2481_v45, %v2480_v13  ;;  %v2474_v18 = vsel %vm648_vm3, %v2467_v25, 0.0 }
 0x202   : > { %v4604_v56 = vpop.permute.xlu1 %1291  ;;  %v2021_v39 = vadd.f32 %v2020_v47, %v2019_v9  ;;  %v2471_v49 = vmul.f32 %v2463_v14, %v2463_v14  ;;  %v2476_v62 = vsel %vm648_vm3, %v2469_v31, 0.0  ;;  %v2472_v8 = vmul.f32 %v2464_v38, %v2464_v38  ;;  %v4648_v47 = vld [vmem:[%s3114_s3 + $0xb] sm:$0xff] }
 0x203   : > { %5706 = vst [vmem:[#allocation104_spill] sm:$0xff] %v4604_v56  ;;  %v1859_v3 = vmul.f32 %v4541_v19, %v4153_v12  ;;  %v2281_v20 = vadd.f32 %v2280_v17, %v2279_v52  ;;  %v2282_v13 = vsel %vm402_vm0, %v2275_v29, 0.0  ;;  %v2266_v60 = vsub.f32 %v4320_v6, %v4309_v2  ;;  %5709 = vst [vmem:[#allocation107_spill] sm:$0xff] %v4648_v47 }
 0x204   : > { %1883 = vrot.lane.b32.xlu1 %v1860_v61, %s3018_s4  ;;  %v4626_v26 = vpop.permute.xlu0 %1169  ;;  %v2483_v61 = vsel %vm648_vm3, %v2470_v35, 0.0  ;;  %v2270_v58 = vmul.f32 %v2262_v37, %v2262_v37  ;;  %v2272_v25 = vmul.f32 %v2264_v33, %v2264_v33  ;;  %v2475_v35 = vadd.f32 %v2474_v18, %v2473_v36 }
 0x205   : > { %5707 = vst [vmem:[#allocation105_spill] sm:$0xff] %v4626_v26  ;;  %1877 = vrot.lane.b32.xlu0 %v1857_v57, %s3018_s4  ;;  %2837 = vpow2.f32 %v2033_v63  ;;  %v2029_v31 = vmul.f32 -0.5, %v2021_v39  ;;  %v1952_v19 = vmul.f32 %v4648_v47, %v4630_v43  ;;  %v2386_v14 = vadd.f32 %v4511_v0, %v4508_v28 }
 0x206   : > { %v4628_v54 = vpop.permute.xlu1 %1315  ;;  %v2387_v6 = vsel %vm525_vm2, %v4534_v7, 0.0  ;;  %v2381_v45 = vadd.f32 %v4554_v34, %v4518_v59  ;;  %v2478_v38 = vsel %vm648_vm3, %v2471_v49, 0.0  ;;  %v2484_v57 = vadd.f32 %v2483_v61, %v2482_v4 }
 0x207   : > { %v2477_v52 = vadd.f32 %v2476_v62, %v2475_v35  ;;  %v2485_v29 = vsel %vm648_vm3, %v2472_v8, 0.0  ;;  %v2283_v17 = vadd.f32 %v2282_v13, %v2281_v20  ;;  %v2268_v28 = vsub.f32 %v4384_v46, %v4340_v53  ;;  %v4697_v20 = vld [vmem:[%s3114_s3 + $0x3b] sm:$0xff] }
 0x208   : > { %1945 = vrot.lane.b32.xlu1 %v4630_v43, %s3022_s22  ;;  %v4643_v55 = vpop.permute.xlu0 %1289  ;;  %v2274_v0 = vmul.f32 %v2266_v60, %v2266_v60  ;;  %v2284_v7 = vsel %vm402_vm0, %v2270_v58, 0.0  ;;  %v2285_v37 = vsel %vm402_vm0, %v2272_v25, 0.0  ;;  %v2031_v59 = vmul.f32 1.442695, %v2029_v31  ;;  %5713 = vst [vmem:[#allocation111_spill] sm:$0xff] %v4697_v20  ;;  %v5714_v13 = vld [vmem:[#allocation63_spill] sm:$0xff] }
 0x209   : > { %5708 = vst [vmem:[#allocation106_spill] sm:$0xff] %v4643_v55  ;;  %1881 = vrot.lane.b32.xlu0 %v1859_v3, %s3018_s4  ;;  %v2479_v34 = vadd.f32 %v2478_v38, %v2477_v52  ;;  %v4670_v36 = vmul.f32 %v2836_v44, %v1938_v10  ;;  %v1954_v39 = vmul.f32 %v4545_v24, %v4630_v43  ;;  %2839 = vpow2.f32 %v4313_v41  ;;  %v5715_v60 = vld [vmem:[#allocation73_spill] sm:$0xff]  ;;  %v5716_v25 = vld [vmem:[#allocation70_spill] sm:$0xff] }
 0x20a   : > { %v4645_v9 = vpop.permute.xlu1 %1319  ;;  %v1653_v46 = vsub.f32 %v4153_v12, %v5656_v32  ;;  %v2194_v4 = vmul.f32 -0.5, %v4478_v1  ;;  %v2388_v18 = vadd.f32 %v2387_v6, %v2386_v14  ;;  %2841 = vpow2.f32 %v4315_v23  ;;  %v5717_v14 = vld [vmem:[#allocation76_spill] sm:$0xff]  ;;  %v2923_v55 = vld [vmem:[%s3114_s3 + $0x31] sm:$0xff] }
 0x20b   : > { %v2486_v10 = vadd.f32 %v2485_v29, %v2484_v57  ;;  %v2291_v44 = vmul.f32 -0.5, %v2283_v17  ;;  %v2286_v61 = vadd.f32 %v2285_v37, %v2284_v7  ;;  %v2195_v41 = vmul.f32 1.442695, %v4480_v21  ;;  %v2919_v32 = vld [vmem:[%s3114_s3 + $0x1] sm:$0xff] }
 0x20c   : > { %1969 = vrot.lane.b32.xlu1 %v1952_v19, %s3022_s22  ;;  %v4668_v33 = vpop.permute.xlu0 %1313  ;;  %v2389_v49 = vmul.f32 -0.5, %v2381_v45  ;;  %v2276_v12 = vmul.f32 %v2268_v28, %v2268_v28  ;;  %v2287_v1 = vsel %vm402_vm0, %v2274_v0, 0.0  ;;  %2843 = vpow2.f32 %v2031_v59 }
 0x20d   : > { %1943 = vrot.lane.b32.xlu0 %v4670_v36, %s3022_s22  ;;  %v2487_v62 = vmul.f32 -0.5, %v2479_v34  ;;  %v1951_v8 = vmul.f32 %v4523_v50, %v4670_v36  ;;  %v1956_v21 = vmul.f32 %v4697_v20, %v4630_v43  ;;  %v1674_v58 = vadd.f32 %v5715_v60, %v5714_v13  ;;  %v4720_v34 = vld [vmem:[%s3114_s3 + $0x53] sm:$0xff] }
 0x20e   : > { %v4672_v63 = vpop.permute.xlu1 %1323  ;;  %v1659_v35 = vmul.f32 %v5716_v25, %v5716_v25  ;;  %v2197_v31 = vmul.f32 1.442695, %v2194_v4  ;;  %v2390_v19 = vmul.f32 -0.5, %v2388_v18  ;;  %v1662_v6 = vmul.f32 %v5717_v14, %v5717_v14  ;;  %5720 = vst [vmem:[#allocation70_spill] sm:$0xff] %v4720_v34  ;;  %v5725_v14 = vld [vmem:[#allocation35_spill] sm:$0xff] }
 0x20f   : > { %5710 = vst [vmem:[#allocation108_spill] sm:$0xff] %v4672_v63  ;;  %v2488_v45 = vmul.f32 -0.5, %v2486_v10  ;;  %v2293_v38 = vmul.f32 1.442695, %v2291_v44  ;;  %v2288_v57 = vadd.f32 %v2287_v1, %v2286_v61  ;;  %v1661_v52 = vmul.f32 %v1653_v46, %v1653_v46 }
 0x210   : > { %1973 = vrot.lane.b32.xlu1 %v1954_v39, %s3022_s22  ;;  %v4690_v23 = vpop.permute.xlu0 %1317  ;;  %2845 = vpow2.f32 %v2195_v41  ;;  %v2391_v29 = vmul.f32 1.442695, %v2389_v49  ;;  %v2289_v17 = vsel %vm402_vm0, %v2276_v12, 0.0  ;;  %v2489_v28 = vmul.f32 1.442695, %v2487_v62  ;;  %v5721_v49 = vld [vmem:[#allocation92_spill] sm:$0xff] }
 0x211   : > { %5711 = vst [vmem:[#allocation109_spill] sm:$0xff] %v4690_v23  ;;  %1967 = vrot.lane.b32.xlu0 %v1951_v8, %s3022_s22  ;;  %v242_v0 = vstv %s4666_s14  ;;  %v1953_v37 = vmul.f32 %v4470_v11, %v4670_v36  ;;  %v1958_v39 = vmul.f32 %v4720_v34, %v4630_v43  ;;  %v1666_v4 = vsel %vm220_vm4, %v1659_v35, 0.0  ;;  %v5724_v35 = vld [vmem:[#allocation54_spill] sm:$0xff]  ;;  %s3025_s14 = smov [#allocation5]  }
 0x212   : > { %v4694_v3 = vpop.permute.xlu1 %1327  ;;  %v2838_v46 = vpop.eup %2837  ;;  %2847 = vpow2.f32 %v2197_v31  ;;  %v2393_v18 = vmul.f32 1.442695, %v2390_v19  ;;  %v5534_v10 = vstv %s4680_s16  ;;  %v1675_v44 = vsel %vm220_vm4, %v1662_v6, 0.0 }
 0x213   : > { %5712 = vst [vmem:[#allocation110_spill] sm:$0xff] %v4694_v3  ;;  %v2491_v61 = vmul.f32 1.442695, %v2488_v45  ;;  %2849 = vpow2.f32 %v2293_v38  ;;  %v2290_v41 = vadd.f32 %v2289_v17, %v2288_v57  ;;  %v244_v43 = vmul.f32 %v5721_v49, %v242_v0  ;;  %v2910_v17 = vld [vmem:[%s3114_s3] sm:$0xff] }
 0x214   : > { %1977 = vrot.lane.b32.xlu1 %v1956_v21, %s3022_s22  ;;  %v4713_v7 = vpop.permute.xlu0 %1321  ;;  %2851 = vpow2.f32 %v2391_v29  ;;  %v243_v12 = vmul.f32 %v4414_v22, %v242_v0  ;;  %v776_v1 = vstv %s4687_s17  ;;  %v1668_v62 = vsel %vm220_vm4, %v1661_v52, 0.0  ;;  %v4736_v21 = vld [vmem:[%s3114_s3 + $0x33] sm:$0xff]  ;;  %v2911_v0 = vld [vmem:[%s3114_s3 + $0x20] sm:$0xff] }
 0x215   : > { %5718 = vst [vmem:[#allocation63_spill] sm:$0xff] %v4713_v7  ;;  %1971 = vrot.lane.b32.xlu0 %v1953_v37, %s3022_s22  ;;  %2853 = vpow2.f32 %v2489_v28  ;;  %5723 = vst [vmem:[#allocation92_spill] sm:$0xff] %v4736_v21  ;;  %v1955_v13 = vmul.f32 %v4736_v21, %v4670_v36  ;;  %v4744_v25 = vmul.f32 %v2838_v46, %v5534_v10  ;;  %v2292_v45 = vmul.f32 -0.5, %v2290_v41  ;;  %v2913_v41 = vld [vmem:[%s3114_s3 + $0x18] sm:$0xff] }
 0x216   : > { %v4717_v59 = vpop.permute.xlu1 %1389  ;;  %v1667_v22 = vadd.f32 %v1666_v4, %v5724_v35  ;;  %2855 = vpow2.f32 %v2393_v18  ;;  %v2840_v31 = vpop.eup %2839  ;;  %v4749_v19 = vadd.f32 %v1675_v44, %v1674_v58  ;;  %v4752_v6 = vmul.f32 %v5725_v14, %v776_v1  ;;  %v2909_v58 = vld [vmem:[%s3114_s3 + $0x8] sm:$0xff] }
 0x217   : > { %5719 = vst [vmem:[#allocation73_spill] sm:$0xff] %v4717_v59  ;;  %2857 = vpow2.f32 %v2491_v61  ;;  %v2842_v38 = vpop.eup %2841  ;;  %v4760_v52 = vmul.f32 %v4436_v48, %v776_v1  ;;  %v248_v29 = vmul.f32 %v2909_v58, %v244_v43  ;;  %v4764_v28 = vmul.f32 %v2910_v17, %v243_v12  ;;  %v4775_v4 = vld [vmem:[%s3114_s3 + $0x4b] sm:$0xff]  ;;  %v2914_v1 = vld [vmem:[%s3114_s3 + $0x38] sm:$0xff] }
 0x218   : > { %1981 = vrot.lane.b32.xlu1 %v1958_v39, %s3022_s22  ;;  %v4733_v8 = vpop.permute.xlu0 %1325  ;;  %v4757_v57 = vadd.f32 %v1668_v62, %v1667_v22  ;;  %v4769_v37 = vmul.f32 %v2911_v0, %v244_v43  ;;  %v1226_v39 = vstv %s4711_s21  ;;  %5727 = vst [vmem:[#allocation35_spill] sm:$0xff] %v4775_v4  ;;  %v1957_v48 = vmul.f32 %v4775_v4, %v4670_v36  ;;  %v2916_v36 = vld [vmem:[%s3114_s3 + $0x50] sm:$0xff]  ;;  %v5728_v14 = vld [vmem:[#allocation41_spill] sm:$0xff] }
 0x219   : > { %5722 = vst [vmem:[#allocation76_spill] sm:$0xff] %v4733_v8  ;;  %1975 = vrot.lane.b32.xlu0 %v1955_v13, %s3022_s22  ;;  %v2050_v44 = vmul.f32 %v4648_v47, %v4744_v25  ;;  %v2844_v61 = vpop.eup %2843  ;;  %v4786_v49 = vmul.f32 %v2913_v41, %v243_v12  ;;  %v4789_v62 = vmul.f32 %v2914_v1, %v244_v43  ;;  %v2915_v13 = vld [vmem:[%s3114_s3 + $0x30] sm:$0xff]  ;;  %v2917_v17 = vld [vmem:[%s3114_s3 + $0x48] sm:$0xff]  ;;  %v2922_v8 = vld [vmem:[%s3114_s3 + $0x39] sm:$0xff] }
 0x21a   : > { %v4740_v60 = vpop.permute.xlu1 %1413  ;;  %v4792_v35 = vmul.f32 %v2915_v13, %v243_v12  ;;  %v4795_v22 = vmul.f32 %v2916_v36, %v244_v43  ;;  %v337_v58 = vadd.f32 %v5728_v14, %v244_v43  ;;  %v4801_v0 = vmul.f32 %v2917_v17, %v243_v12  ;;  %v2918_v41 = vld [vmem:[%s3114_s3 + $0x9] sm:$0xff]  ;;  %v2920_v47 = vld [vmem:[%s3114_s3 + $0x21] sm:$0xff]  ;;  %v2924_v59 = vld [vmem:[%s3114_s3 + $0x51] sm:$0xff] }
 0x21b   : > { %v4805_v1 = vmul.f32 %v2918_v41, %v4752_v6  ;;  %v2295_v13 = vmul.f32 1.442695, %v2292_v45  ;;  %v5729_v36 = vld [vmem:[#allocation18_spill] sm:$0xff]  ;;  %v4812_v43 = vmul.f32 %v2919_v32, %v4760_v52  ;;  %v4814_v14 = vmul.f32 %v2840_v31, %v1226_v39  ;;  %v2921_v45 = vld [vmem:[%s3114_s3 + $0x19] sm:$0xff] }
 0x21c   : > { %2043 = vrot.lane.b32.xlu1 %v4744_v25, %s3023_s23  ;;  %v4772_v46 = vpop.permute.xlu0 %1387  ;;  %v336_v10 = vadd.f32 %v5729_v36, %v243_v12  ;;  %v4816_v17 = vmul.f32 %v2842_v38, %v1226_v39  ;;  %v4824_v12 = vmul.f32 %v2921_v45, %v4760_v52  ;;  %v5732_v32 = vstv %s4680_s16  ;;  %v5734_v39 = vld [vmem:[#allocation17_spill] sm:$0xff]  ;;  %s2955_s16 = sshll.u32 %s3025_s14, 4  ;;  %s2956_s16 = int_to_ptr.vmem [resolvable:$false] %s2955_s16 }
 0x21d   : > { %5726 = vst [vmem:[#allocation54_spill] sm:$0xff] %v4772_v46  ;;  %1979 = vrot.lane.b32.xlu0 %v1957_v48, %s3022_s22  ;;  %v2846_v41 = vpop.eup %2845  ;;  %v4820_v48 = vmul.f32 %v2920_v47, %v4752_v6  ;;  %v4830_v36 = vmul.f32 %v2844_v61, %v5732_v32  ;;  %v2052_v38 = vmul.f32 %v4545_v24, %v4744_v25  ;;  %v2200_v7 = vstv %s4747_s24  ;;  %v5735_v61 = vld [vmem:[#allocation24_spill] sm:$0xff]  ;;  %v2925_v24 = vld [vmem:[%s3114_s3 + $0x49] sm:$0xff]  ;;  %s2957_s17 = scalar_lea.vmem %s2956_s16, 2048 }
 0x21e   : > { %v4779_v18 = vpop.permute.xlu1 %1417  ;;  %5730 = vst [vmem:[#allocation41_spill] sm:$0xff] %v4816_v17  ;;  %v379_v46 = vadd.f32 %v5734_v39, %v248_v29  ;;  %v4839_v47 = vmul.f32 %v2922_v8, %v4752_v6  ;;  %v4843_v45 = vmul.f32 %v2923_v55, %v4760_v52  ;;  %v436_v32 = vadd.f32 %v5735_v61, %v337_v58  ;;  %v5736_v8 = vld [vmem:[#allocation25_spill] sm:$0xff] }
 0x21f   : > { %v2848_v26 = vpop.eup %2847  ;;  %v4849_v3 = vmul.f32 %v2924_v59, %v4752_v6  ;;  %v4853_v29 = vmul.f32 %v2925_v24, %v4760_v52  ;;  %2859 = vpow2.f32 %v2295_v13  ;;  %v435_v39 = vadd.f32 %v5736_v8, %v336_v10  ;;  %v5740_v24 = vld [vmem:[#allocation23_spill] sm:$0xff] }
 0x220   : > { %2067 = vrot.lane.b32.xlu1 %v2050_v44, %s3023_s23  ;;  %v4826_v44 = vpop.permute.xlu0 %1411  ;;  %v2850_v55 = vpop.eup %2849  ;;  %v4861_v58 = vmul.f32 %v4619_v30, %v4814_v14  ;;  %v4865_v59 = vmul.f32 %v4302_v27, %v4816_v17  ;;  %v4870_v23 = vmul.f32 %v4271_v15, %v4814_v14  ;;  %v4874_v13 = vmul.f32 %v4333_v42, %v4816_v17  ;;  %v5741_v15 = vld [vmem:[#allocation26_spill] sm:$0xff] }
 0x221   : > { %5731 = vst [vmem:[#allocation18_spill] sm:$0xff] %v4826_v44  ;;  %2041 = vrot.lane.b32.xlu0 %v4830_v36, %s3023_s23  ;;  %v2852_v61 = vpop.eup %2851  ;;  %v2049_v30 = vmul.f32 %v4523_v50, %v4830_v36  ;;  %v4882_v27 = vmul.f32 %v2846_v41, %v2200_v7  ;;  %v478_v44 = vadd.f32 %v5741_v15, %v379_v46  ;;  %v2396_v56 = vstv %s4783_s26 }
 0x222   : > { %v4832_v31 = vpop.permute.xlu1 %1421  ;;  %5737 = vst [vmem:[#allocation17_spill] sm:$0xff] %v4874_v13  ;;  %v2854_v8 = vpop.eup %2853  ;;  %v2494_v5 = vstv %s4797_s27  ;;  %v4891_v42 = vmul.f32 %v4309_v2, %v4814_v14  ;;  %v5744_v41 = vstv %s4766_s25  ;;  %v2051_v2 = vmul.f32 %v4470_v11, %v4830_v36  ;;  %v5753_v11 = vld [vmem:[#allocation47_spill] sm:$0xff] }
 0x223   : > { %5733 = vst [vmem:[#allocation112_spill] sm:$0xff] %v4832_v31  ;;  %v381_v31 = vadd.f32 %v5740_v24, %v4769_v37  ;;  %v2856_v63 = vpop.eup %2855  ;;  %v4902_v37 = vmul.f32 %v2850_v55, %v5744_v41  ;;  %v5746_v24 = vld [vmem:[#allocation51_spill] sm:$0xff]  ;;  %v2053_v55 = vmul.f32 %v4736_v21, %v4830_v36  ;;  %v4920_v13 = vmul.f32 %v2852_v61, %v2396_v56 }
 0x224   : > { %2071 = vrot.lane.b32.xlu1 %v2052_v38, %s3023_s23  ;;  %v4876_v10 = vpop.permute.xlu0 %1415  ;;  %v2858_v46 = vpop.eup %2857  ;;  %v601_v15 = vadd.f32 %v5746_v24, %v478_v44  ;;  %v4922_v44 = vmul.f32 %v2854_v8, %v2494_v5  ;;  %v4933_v21 = vmul.f32 %v2856_v63, %v2396_v56  ;;  %v2054_v61 = vmul.f32 %v4697_v20, %v4744_v25  ;;  %v5758_v56 = vld [vmem:[#allocation48_spill] sm:$0xff] }
 0x225   : > { %5738 = vst [vmem:[#allocation24_spill] sm:$0xff] %v4876_v10  ;;  %v5742_v10 = vld [vmem:[#allocation93_spill] sm:$0xff]  ;;  %2065 = vrot.lane.b32.xlu0 %v2049_v30, %s3023_s23  ;;  %5745 = vst [vmem:[#allocation26_spill] sm:$0xff] %v4902_v37  ;;  %v4937_v8 = vmul.f32 %v2858_v46, %v2494_v5  ;;  %v380_v63 = vadd.f32 %v5758_v56, %v4786_v49  ;;  %v5773_v20 = vld [vmem:[#allocation32_spill] sm:$0xff] }
 0x226   : > { %v4880_v38 = vpop.permute.xlu1 %1425  ;;  %v4895_v50 = vmul.f32 %v5742_v10, %v4816_v17  ;;  %v4911_v10 = vmul.f32 %v2848_v26, %v2200_v7  ;;  %v5748_v17 = vld [vmem:[#allocation42_spill] sm:$0xff]  ;;  %5751 = vst [vmem:[#allocation113_spill] sm:$0xff] %v4922_v44  ;;  %v383_v26 = vadd.f32 %v5753_v11, %v4789_v62  ;;  %v5754_v7 = vld [vmem:[#allocation28_spill] sm:$0xff]  ;;  %v5760_v46 = vld [vmem:[#allocation49_spill] sm:$0xff] }
 0x227   : > { %5739 = vst [vmem:[#allocation25_spill] sm:$0xff] %v4880_v38  ;;  %v4907_v38 = vmul.f32 %v4340_v53, %v4814_v14  ;;  %v559_v30 = vadd.f32 %v5748_v17, %v436_v32  ;;  %5750 = vst [vmem:[#allocation42_spill] sm:$0xff] %v4920_v13  ;;  %v5752_v53 = vld [vmem:[#allocation46_spill] sm:$0xff]  ;;  %v5755_v17 = vld [vmem:[#allocation60_spill] sm:$0xff] }
 0x228   : > { %5743 = vst [vmem:[#allocation23_spill] sm:$0xff] %v4895_v50  ;;  %2205 = vrot.lane.b32.xlu1 %v4882_v27, %s3019_s5  ;;  %v4914_v50 = vpop.permute.xlu0 %1419  ;;  %v378_v24 = vadd.f32 %v5752_v53, %v4764_v28  ;;  %v724_v32 = vadd.f32 %v5755_v17, %v601_v15  ;;  %v5756_v28 = vld [vmem:[#allocation16_spill] sm:$0xff]  ;;  %v4947_v15 = vmul.f32 %v4775_v4, %v4830_v36  ;;  %v5762_v36 = vld [vmem:[#allocation27_spill] sm:$0xff] }
 0x229   : > { %5747 = vst [vmem:[#allocation93_spill] sm:$0xff] %v4907_v38  ;;  %5749 = vst [vmem:[#allocation51_spill] sm:$0xff] %v4914_v50  ;;  %v480_v38 = vadd.f32 %v5754_v7, %v381_v31  ;;  %2069 = vrot.lane.b32.xlu0 %v2051_v2, %s3023_s23  ;;  %v682_v53 = vadd.f32 %v5756_v28, %v559_v30  ;;  %v5757_v50 = vld [vmem:[#allocation53_spill] sm:$0xff]  ;;  %v4943_v31 = vmul.f32 %v4720_v34, %v4744_v25  ;;  %v5759_v2 = vld [vmem:[#allocation50_spill] sm:$0xff] }
 0x22a   : > { %v4918_v41 = vpop.permute.xlu1 %1487  ;;  %v382_v5 = vadd.f32 %v5759_v2, %v4792_v35  ;;  %v385_v30 = vadd.f32 %v5760_v46, %v4795_v22  ;;  %v4961_v25 = vmul.f32 %v4911_v10, %v4276_v16  ;;  %v5763_v7 = vld [vmem:[#allocation30_spill] sm:$0xff]  ;;  %v790_v56 = vadd.f32 %v4805_v1, %v724_v32  ;;  %v5765_v2 = vld [vmem:[#allocation20_spill] sm:$0xff]  ;;  %v5766_v46 = vld [vmem:[#allocation87_spill] sm:$0xff] }
 0x22b   : > { %v603_v62 = vadd.f32 %v5757_v50, %v480_v38  ;;  %v477_v38 = vadd.f32 %v5762_v36, %v378_v24  ;;  %v482_v17 = vadd.f32 %v5763_v7, %v383_v26  ;;  %v5764_v28 = vld [vmem:[#allocation62_spill] sm:$0xff]  ;;  %v1678_v35 = vmul.f32 -0.5, %v4749_v19  ;;  %v4977_v24 = vld [vmem:[%s3114_s3 + $0x24] sm:$0xff]  ;;  %v5767_v32 = vld [vmem:[#allocation55_spill] sm:$0xff] }
 0x22c   : > { %2303 = vrot.lane.b32.xlu1 %v4902_v37, %s3018_s4  ;;  %v4955_v11 = vpop.permute.xlu0 %1423  ;;  %v558_v22 = vadd.f32 %v5765_v2, %v435_v39  ;;  %v4974_v16 = vmul.f32 %v4882_v27, %v5766_v46  ;;  %v4981_v26 = vmul.f32 %v4977_v24, %v4911_v10  ;;  %v2860_v1 = vpop.eup %2859  ;;  %v780_v19 = vadd.f32 %v4752_v6, %v682_v53  ;;  %v5769_v36 = vld [vmem:[#allocation69_spill] sm:$0xff]  ;;  %v5774_v53 = vld [vmem:[#allocation64_spill] sm:$0xff] }
 0x22d   : > { %5761 = vst [vmem:[#allocation46_spill] sm:$0xff] %v4955_v11  ;;  %v726_v49 = vadd.f32 %v5764_v28, %v603_v62  ;;  %2073 = vrot.lane.b32.xlu0 %v2053_v55, %s3023_s23  ;;  %v600_v39 = vadd.f32 %v5767_v32, %v477_v38  ;;  %v5768_v62 = vld [vmem:[#allocation56_spill] sm:$0xff]  ;;  %v888_v7 = vadd.f32 %v5769_v36, %v790_v56  ;;  %v5771_v46 = vld [vmem:[#allocation29_spill] sm:$0xff] }
 0x22e   : > { %v4957_v50 = vpop.permute.xlu1 %1511  ;;  %v605_v55 = vadd.f32 %v5768_v62, %v482_v17  ;;  %v5770_v28 = vld [vmem:[#allocation52_spill] sm:$0xff]  ;;  %v479_v4 = vadd.f32 %v5771_v46, %v380_v63  ;;  %v484_v37 = vadd.f32 %v5773_v20, %v385_v30  ;;  %v5775_v17 = vld [vmem:[#allocation65_spill] sm:$0xff]  ;;  %v5776_v62 = vld [vmem:[#allocation82_spill] sm:$0xff]  ;;  %v5779_v20 = vstv %s4766_s25 }
 0x22f   : > { %v384_v2 = vadd.f32 %v5770_v28, %v4801_v0  ;;  %v723_v38 = vadd.f32 %v5774_v53, %v600_v39  ;;  %v792_v56 = vadd.f32 %v4820_v48, %v726_v49  ;;  %v986_v36 = vadd.f32 %v5776_v62, %v888_v7  ;;  %v5777_v28 = vld [vmem:[#allocation57_spill] sm:$0xff]  ;;  %v5778_v46 = vld [vmem:[#allocation58_spill] sm:$0xff]  ;;  %v5780_v30 = vld [vmem:[#allocation19_spill] sm:$0xff] }
 0x230   : > { %2401 = vrot.lane.b32.xlu1 %v4920_v13, %s3022_s22  ;;  %v5772_v13 = vld [vmem:[#allocation31_spill] sm:$0xff]  ;;  %v4992_v11 = vpop.permute.xlu0 %1485  ;;  %v728_v32 = vadd.f32 %v5775_v17, %v605_v55  ;;  %v1681_v0 = vmul.f32 1.442695, %v1678_v35  ;;  %v602_v63 = vadd.f32 %v5777_v28, %v479_v4  ;;  %v681_v39 = vadd.f32 %v5780_v30, %v558_v22  ;;  %v5781_v55 = vld [vmem:[#allocation72_spill] sm:$0xff]  ;;  %v5782_v49 = vld [vmem:[#allocation94_spill] sm:$0xff] }
 0x231   : > { %v481_v34 = vadd.f32 %v5772_v13, %v382_v5  ;;  %v607_v13 = vadd.f32 %v5778_v46, %v484_v37  ;;  %2207 = vrot.lane.b32.xlu0 %v4911_v10, %s3019_s5  ;;  %v5006_v5 = vmul.f32 %v2860_v1, %v5779_v20  ;;  %v890_v48 = vadd.f32 %v5781_v55, %v792_v56  ;;  %v5014_v35 = vld [vmem:[%s3114_s3 + $0x1c] sm:$0xff]  ;;  %v5785_v1 = vld [vmem:[#allocation33_spill] sm:$0xff]  ;;  %v5786_v62 = vld [vmem:[#allocation66_spill] sm:$0xff] }
 0x232   : > { %v4994_v6 = vpop.permute.xlu1 %1515  ;;  %v1084_v7 = vadd.f32 %v5782_v49, %v986_v36  ;;  %5783 = vst [vmem:[#allocation47_spill] sm:$0xff] %v5014_v35  ;;  %v5018_v4 = vmul.f32 %v5014_v35, %v4882_v27  ;;  %v5784_v37 = vld [vmem:[#allocation59_spill] sm:$0xff]  ;;  %v483_v17 = vadd.f32 %v5785_v1, %v384_v2  ;;  %v725_v28 = vadd.f32 %v5786_v62, %v602_v63  ;;  %v5788_v55 = vld [vmem:[#allocation84_spill] sm:$0xff]  ;;  %v5791_v2 = vld [vmem:[#allocation61_spill] sm:$0xff] }
 0x233   : > { %v604_v53 = vadd.f32 %v5784_v37, %v481_v34  ;;  %v5787_v46 = vld [vmem:[#allocation67_spill] sm:$0xff]  ;;  %v789_v36 = vadd.f32 %v4812_v43, %v723_v38  ;;  %v794_v30 = vadd.f32 %v4839_v47, %v728_v32  ;;  %v988_v49 = vadd.f32 %v5788_v55, %v890_v48  ;;  %v5790_v34 = vld [vmem:[#allocation22_spill] sm:$0xff]  ;;  %v5792_v47 = vld [vmem:[#allocation68_spill] sm:$0xff] }
 0x234   : > { %2499 = vrot.lane.b32.xlu1 %v4922_v44, %s3023_s23  ;;  %v730_v20 = vadd.f32 %v5787_v46, %v607_v13  ;;  %v5024_v22 = vpop.permute.xlu0 %1509  ;;  %v5789_v44 = vld [vmem:[#allocation43_spill] sm:$0xff]  ;;  %2861 = vpow2.f32 %v1681_v0  ;;  %v846_v37 = vadd.f32 %v5790_v34, %v780_v19  ;;  %v606_v1 = vadd.f32 %v5791_v2, %v483_v17  ;;  %v5793_v32 = vld [vmem:[#allocation74_spill] sm:$0xff]  ;;  %v5795_v19 = vld [vmem:[#allocation36_spill] sm:$0xff] }
 0x235   : > { %v1182_v35 = vadd.f32 %v5789_v44, %v1084_v7  ;;  %2305 = vrot.lane.b32.xlu0 %v5006_v5, %s3018_s4  ;;  %v5038_v63 = vld [vmem:[%s3114_s3 + $0x3c] sm:$0xff]  ;;  %v727_v38 = vadd.f32 %v5792_v47, %v604_v53  ;;  %v887_v44 = vadd.f32 %v5793_v32, %v789_v36  ;;  %v1086_v48 = vadd.f32 %v5795_v19, %v988_v49  ;;  %v5797_v2 = vld [vmem:[#allocation85_spill] sm:$0xff]  ;;  %v5798_v47 = vld [vmem:[#allocation86_spill] sm:$0xff] }
 0x236   : > { %v5026_v56 = vpop.permute.xlu1 %1519  ;;  %v5042_v43 = vmul.f32 %v5038_v63, %v4911_v10  ;;  %v5794_v0 = vld [vmem:[#allocation75_spill] sm:$0xff]  ;;  %v779_v7 = vadd.f32 %v4760_v52, %v681_v39  ;;  %v796_v46 = vadd.f32 %v4849_v3, %v730_v20  ;;  %v5799_v32 = vld [vmem:[#allocation101_spill] sm:$0xff]  ;;  %v1677_v52 = vmul.f32 -0.5, %v4757_v57 }
 0x237   : > { %v892_v13 = vadd.f32 %v5794_v0, %v794_v30  ;;  %v5796_v17 = vld [vmem:[#allocation71_spill] sm:$0xff]  ;;  %v985_v53 = vadd.f32 %v5797_v2, %v887_v44  ;;  %v1184_v30 = vadd.f32 %v5799_v32, %v1086_v48  ;;  %v1240_v49 = vadd.f32 %v4861_v58, %v1182_v35  ;;  %v5800_v39 = vld [vmem:[#allocation77_spill] sm:$0xff]  ;;  %v5801_v0 = vld [vmem:[#allocation78_spill] sm:$0xff] }
 0x238   : > { %2075 = vrot.lane.b32.xlu1 %v2054_v61, %s3023_s23  ;;  %v729_v62 = vadd.f32 %v5796_v17, %v606_v1  ;;  %v791_v61 = vadd.f32 %v4824_v12, %v725_v28  ;;  %v5052_v55 = vpop.permute.xlu0 %1513  ;;  %v894_v12 = vadd.f32 %v5801_v0, %v796_v46  ;;  %v5802_v28 = vld [vmem:[#allocation80_spill] sm:$0xff]  ;;  %v793_v20 = vadd.f32 %v4843_v45, %v727_v38  ;;  %v5803_v44 = vld [vmem:[#allocation38_spill] sm:$0xff]  ;;  %v5804_v19 = vld [vmem:[#allocation95_spill] sm:$0xff] }
 0x239   : > { %v990_v36 = vadd.f32 %v5798_v47, %v892_v13  ;;  %v944_v3 = vadd.f32 %v5802_v28, %v846_v37  ;;  %2403 = vrot.lane.b32.xlu0 %v4933_v21, %s3022_s22  ;;  %v1083_v13 = vadd.f32 %v5803_v44, %v985_v53  ;;  %v1338_v57 = vadd.f32 %v4628_v54, %v1240_v49  ;;  %v5805_v48 = vld [vmem:[#allocation88_spill] sm:$0xff]  ;;  %v5807_v46 = vld [vmem:[#allocation91_spill] sm:$0xff]  ;;  %v5812_v0 = vld [vmem:[#allocation97_spill] sm:$0xff] }
 0x23a   : > { %v5054_v34 = vpop.permute.xlu1 %1523  ;;  %v889_v1 = vadd.f32 %v5800_v39, %v791_v61  ;;  %v795_v35 = vadd.f32 %v4853_v29, %v729_v62  ;;  %v5806_v61 = vld [vmem:[#allocation89_spill] sm:$0xff]  ;;  %v5809_v38 = vld [vmem:[#allocation103_spill] sm:$0xff]  ;;  %v1679_v49 = vmul.f32 1.442695, %v1677_v52  ;;  %v5811_v39 = vld [vmem:[#allocation96_spill] sm:$0xff] }
 0x23b   : > { %v1088_v58 = vadd.f32 %v5804_v19, %v990_v36  ;;  %v992_v37 = vadd.f32 %v5806_v61, %v894_v12  ;;  %v1042_v2 = vadd.f32 %v5807_v46, %v944_v3  ;;  %v1242_v36 = vadd.f32 %v4870_v23, %v1184_v30  ;;  %v5810_v29 = vld [vmem:[#allocation79_spill] sm:$0xff]  ;;  %v5813_v28 = vld [vmem:[#allocation21_spill] sm:$0xff] }
 0x23c   : > { %2079 = vrot.lane.b32.xlu1 %v4943_v31, %s3023_s23  ;;  %v987_v17 = vadd.f32 %v5805_v48, %v889_v1  ;;  %v5076_v47 = vpop.permute.xlu0 %1517  ;;  %v5808_v31 = vld [vmem:[#allocation102_spill] sm:$0xff]  ;;  %v1436_v54 = vadd.f32 %v4740_v60, %v1338_v57  ;;  %v891_v62 = vadd.f32 %v5810_v29, %v793_v20  ;;  %v845_v3 = vadd.f32 %v5813_v28, %v779_v7  ;;  %v5814_v23 = vld [vmem:[#allocation99_spill] sm:$0xff]  ;;  %v5815_v20 = vld [vmem:[#allocation81_spill] sm:$0xff] }
 0x23d   : > { %v1181_v45 = vadd.f32 %v5808_v31, %v1083_v13  ;;  %v1186_v53 = vadd.f32 %v5809_v38, %v1088_v58  ;;  %v1090_v12 = vadd.f32 %v5812_v0, %v992_v37  ;;  %2501 = vrot.lane.b32.xlu0 %v4937_v8, %s3023_s23  ;;  %v1140_v30 = vadd.f32 %v5814_v23, %v1042_v2  ;;  %v5816_v13 = vld [vmem:[#allocation90_spill] sm:$0xff]  ;;  %v5818_v37 = vld [vmem:[#allocation37_spill] sm:$0xff] }
 0x23e   : > { %v5078_v32 = vpop.permute.xlu1 %1585  ;;  %v1085_v1 = vadd.f32 %v5811_v39, %v987_v17  ;;  %v1340_v60 = vadd.f32 %v4645_v9, %v1242_v36  ;;  %v1534_v52 = vadd.f32 %v4957_v50, %v1436_v54  ;;  %v893_v44 = vadd.f32 %v5815_v20, %v795_v35  ;;  %v5817_v50 = vld [vmem:[#allocation83_spill] sm:$0xff]  ;;  %v5819_v2 = vld [vmem:[#allocation98_spill] sm:$0xff]  ;;  %v5822_v36 = vld [vmem:[#allocation45_spill] sm:$0xff] }
 0x23f   : > { %v989_v19 = vadd.f32 %v5816_v13, %v891_v62  ;;  %v1188_v57 = vadd.f32 %v4588_v51, %v1090_v12  ;;  %v1239_v17 = vadd.f32 %v4865_v59, %v1181_v45  ;;  %v1244_v7 = vadd.f32 %v4891_v42, %v1186_v53  ;;  %v5820_v42 = vld [vmem:[#allocation108_spill] sm:$0xff]  ;;  %v5821_v38 = vld [vmem:[#allocation34_spill] sm:$0xff] }
 0x240   : > { %2231 = vrot.lane.b32.xlu1 %v4961_v25, %s3019_s5  ;;  %v1183_v58 = vadd.f32 %v4586_v40, %v1085_v1  ;;  %v5101_v48 = vpop.permute.xlu0 %1521  ;;  %v1438_v61 = vadd.f32 %v4779_v18, %v1340_v60  ;;  %2863 = vpow2.f32 %v1679_v49  ;;  %v943_v35 = vadd.f32 %v5817_v50, %v845_v3  ;;  %v5823_v49 = vld [vmem:[#allocation17_spill] sm:$0xff]  ;;  %v5825_v1 = vld [vmem:[#allocation104_spill] sm:$0xff]  ;;  %v5826_v0 = vld [vmem:[#allocation18_spill] sm:$0xff] }
 0x241   : > { %v991_v46 = vadd.f32 %v5818_v37, %v893_v44  ;;  %v1087_v40 = vadd.f32 %v5819_v2, %v989_v19  ;;  %2077 = vrot.lane.b32.xlu0 %v4947_v15, %s3023_s23  ;;  %v2862_v51 = vpop.eup %2861  ;;  %v1230_v59 = vadd.f32 %v4814_v14, %v1140_v30  ;;  %v1337_v18 = vadd.f32 %v4668_v33, %v1239_v17  ;;  %v5824_v15 = vld [vmem:[#allocation93_spill] sm:$0xff]  ;;  %v5827_v12 = vld [vmem:[#allocation112_spill] sm:$0xff]  ;;  %v5831_v13 = vld [vmem:[#allocation110_spill] sm:$0xff] }
 0x242   : > { %v1610_v25 = vpop.permute.xlu1 %1609  ;;  %v1342_v31 = vadd.f32 %v5820_v42, %v1244_v7  ;;  %v1536_v45 = vadd.f32 %v4994_v6, %v1438_v61  ;;  %v1041_v53 = vadd.f32 %v5821_v38, %v943_v35  ;;  %v1241_v29 = vadd.f32 %v5823_v49, %v1183_v58  ;;  %v5828_v6 = vld [vmem:[#allocation39_spill] sm:$0xff]  ;;  %v5829_v30 = vld [vmem:[#allocation40_spill] sm:$0xff]  ;;  %v5832_v58 = vld [vmem:[#allocation73_spill] sm:$0xff] }
 0x243   : > { %v5106_v9 = vadd.f32 %v1610_v25, %v1534_v52  ;;  %v1185_v54 = vadd.f32 %v5822_v36, %v1087_v40  ;;  %v1246_v62 = vadd.f32 %v5824_v15, %v1188_v57  ;;  %v1296_v14 = vadd.f32 %v5825_v1, %v1230_v59  ;;  %v5830_v52 = vld [vmem:[#allocation109_spill] sm:$0xff]  ;;  %v5834_v50 = vld [vmem:[#allocation23_spill] sm:$0xff]  ;;  %v5835_v37 = vld [vmem:[#allocation24_spill] sm:$0xff] }
 0x244   : > { %2235 = vrot.lane.b32.xlu1 %v4981_v26, %s3019_s5  ;;  %v5123_v39 = vpop.permute.xlu0 %1583  ;;  %v1435_v33 = vadd.f32 %v5826_v0, %v1337_v18  ;;  %v1440_v28 = vadd.f32 %v5827_v12, %v1342_v31  ;;  %v1089_v23 = vadd.f32 %v5828_v6, %v991_v46  ;;  %v1139_v60 = vadd.f32 %v5829_v30, %v1041_v53  ;;  %v5833_v7 = vld [vmem:[#allocation105_spill] sm:$0xff]  ;;  %v5838_v36 = vld [vmem:[#allocation63_spill] sm:$0xff]  ;;  %v5841_v30 = vld [vmem:[#allocation76_spill] sm:$0xff] }
 0x245   : > { %v1339_v20 = vadd.f32 %v5830_v52, %v1241_v29  ;;  %2229 = vrot.lane.b32.xlu0 %v4974_v16, %s3019_s5  ;;  %v1684_v44 = vstv %s5091_s28  ;;  %v1344_v19 = vadd.f32 %v5831_v13, %v1246_v62  ;;  %v1394_v57 = vadd.f32 %v5832_v58, %v1296_v14  ;;  %v5836_v59 = vld [vmem:[#allocation25_spill] sm:$0xff]  ;;  %v5172_v1 = vld [vmem:[%s3114_s3 + $0x34] sm:$0xff] }
 0x246   : > { %v1614_v26 = vpop.permute.xlu1 %1613  ;;  %v1533_v25 = vadd.f32 %v5024_v22, %v1435_v33  ;;  %v1538_v17 = vadd.f32 %v5026_v56, %v1440_v28  ;;  %v1187_v61 = vadd.f32 %v5833_v7, %v1089_v23  ;;  %v1243_v35 = vadd.f32 %v5834_v50, %v1185_v54  ;;  %v5837_v31 = vld [vmem:[#allocation41_spill] sm:$0xff]  ;;  %v5839_v33 = vld [vmem:[#allocation106_spill] sm:$0xff]  ;;  %v5840_v28 = vld [vmem:[#allocation51_spill] sm:$0xff] }
 0x247   : > { %v5128_v3 = vadd.f32 %v1614_v26, %v1536_v45  ;;  %v1437_v16 = vadd.f32 %v5835_v37, %v1339_v20  ;;  %v1442_v18 = vadd.f32 %v5836_v59, %v1344_v19  ;;  %v1492_v22 = vadd.f32 %v4918_v41, %v1394_v57  ;;  %v2930_v38 = vld [vmem:[%s3114_s3 + $0x4a] sm:$0xff] }
 0x248   : > { %2239 = vrot.lane.b32.xlu1 %v5042_v43, %s3019_s5  ;;  %v1608_v46 = vpop.permute.xlu0 %1607  ;;  %v5146_v43 = vld [vmem:[%s3114_s3 + $0x54] sm:$0xff]  ;;  %v1229_v45 = vadd.f32 %v5837_v31, %v1139_v60  ;;  %v1237_v53 = vmul.f32 %v2930_v38, %v5837_v31  ;;  %v1341_v54 = vadd.f32 %v5838_v36, %v1243_v35  ;;  %v1686_v0 = vmul.f32 %v2862_v51, %v1684_v44  ;;  %v5188_v58 = vld [vmem:[%s3114_s3 + $0x4c] sm:$0xff] }
 0x249   : > { %v2220_v40 = vmul.f32 %v5146_v43, %v4911_v10  ;;  %v5152_v56 = vadd.f32 %v1608_v46, %v1533_v25  ;;  %2233 = vrot.lane.b32.xlu0 %v5018_v4, %s3019_s5  ;;  %v5163_v10 = vld [vmem:[%s3114_s3 + $0xc] sm:$0xff]  ;;  %v1535_v49 = vadd.f32 %v5052_v55, %v1437_v16  ;;  %v1540_v29 = vadd.f32 %v5054_v34, %v1442_v18  ;;  %v5847_v36 = vld [vmem:[#allocation47_spill] sm:$0xff] }
 0x24a   : > { %v1618_v2 = vpop.permute.xlu1 %1617  ;;  %v2312_v41 = vmul.f32 %v5163_v10, %v5006_v5  ;;  %v1590_v15 = vadd.f32 %v5078_v32, %v1492_v22  ;;  %v1245_v62 = vadd.f32 %v1237_v53, %v1187_v61  ;;  %v2217_v4 = vmul.f32 %v5172_v1, %v4882_v27  ;;  %v5842_v52 = vld [vmem:[#allocation54_spill] sm:$0xff]  ;;  %v5846_v53 = vld [vmem:[#allocation44_spill] sm:$0xff] }
 0x24b   : > { %v5154_v42 = vadd.f32 %v1618_v2, %v1538_v17  ;;  %v1295_v12 = vadd.f32 %v5839_v33, %v1229_v45  ;;  %v1439_v6 = vadd.f32 %v5840_v28, %v1341_v54  ;;  %v2314_v34 = vmul.f32 %v4977_v24, %v5006_v5  ;;  %v5843_v17 = vld [vmem:[#allocation107_spill] sm:$0xff]  ;;  %v5844_v61 = vld [vmem:[#allocation46_spill] sm:$0xff] }
 0x24c   : > { %2243 = vrot.lane.b32.xlu1 %v2220_v40, %s3019_s5  ;;  %v1612_v26 = vpop.permute.xlu0 %1611  ;;  %v1343_v60 = vadd.f32 %v5841_v30, %v1245_v62  ;;  %v1688_v13 = vadd.f32 %v1686_v0, %v1590_v15  ;;  %v2219_v57 = vmul.f32 %v5188_v58, %v4882_v27  ;;  %v1690_v7 = vmul.f32 %v5843_v17, %v1686_v0  ;;  %v5845_v46 = vld [vmem:[#allocation26_spill] sm:$0xff]  ;;  %v5848_v15 = vld [vmem:[#allocation100_spill] sm:$0xff] }
 0x24d   : > { %v1633_v55 = vadd.f32 %v1612_v26, %v1535_v49  ;;  %2237 = vrot.lane.b32.xlu0 %v2217_v4, %s3019_s5  ;;  %v2864_v32 = vpop.eup %2863  ;;  %v1393_v20 = vadd.f32 %v5842_v52, %v1295_v12  ;;  %v1537_v51 = vadd.f32 %v5076_v47, %v1439_v6  ;;  %v5197_v47 = vld [vmem:[%s3114_s3 + $0x4] sm:$0xff]  ;;  %v2316_v27 = vmul.f32 %v5038_v63, %v5006_v5  ;;  %v5849_v4 = vld [vmem:[#allocation111_spill] sm:$0xff]  ;;  %v5850_v52 = vld [vmem:[#allocation70_spill] sm:$0xff] }
 0x24e   : > { %v1622_v14 = vpop.permute.xlu1 %1621  ;;  %v1441_v50 = vadd.f32 %v5844_v61, %v1343_v60  ;;  %v2311_v2 = vmul.f32 %v5197_v47, %v5845_v46  ;;  %v1685_v45 = vmul.f32 %v2864_v32, %v1684_v44  ;;  %v2313_v54 = vmul.f32 %v5847_v36, %v5845_v46  ;;  %v2935_v32 = vld [vmem:[%s3114_s3 + $0x1b] sm:$0xff]  ;;  %s2696_s3 = sld [smem:[#allocation2 + $0x200]] }
 0x24f   : > { %v1638_v23 = vadd.f32 %v1622_v14, %v1540_v29  ;;  %v1491_v35 = vadd.f32 %v4992_v11, %v1393_v20  ;;  %v1698_v11 = vadd.f32 %v1690_v7, %v5106_v9  ;;  %v1694_v14 = vmul.f32 %v5849_v4, %v1686_v0  ;;  %v5851_v17 = vld [vmem:[#allocation92_spill] sm:$0xff] }
 0x250   : > { %2329 = vrot.lane.b32.xlu1 %v2312_v41, %s3018_s4  ;;  %v1616_v19 = vpop.permute.xlu0 %1615  ;;  %v1539_v40 = vadd.f32 %v5101_v48, %v1441_v50  ;;  %v1692_v41 = vmul.f32 %v5846_v53, %v1686_v0  ;;  %v2318_v48 = vmul.f32 %v5146_v43, %v5006_v5  ;;  %v1689_v62 = vmul.f32 %v5848_v15, %v1685_v45 }
 0x251   : > { %v1635_v37 = vadd.f32 %v1616_v19, %v1537_v51  ;;  %2241 = vrot.lane.b32.xlu0 %v2219_v57, %s3019_s5  ;;  %v1589_v59 = vadd.f32 %v5123_v39, %v1491_v35  ;;  %v2315_v33 = vmul.f32 %v5172_v1, %v5845_v46  ;;  %v2410_v6 = vmul.f32 %v5163_v10, %v4933_v21  ;;  %v5852_v35 = vld [vmem:[#allocation42_spill] sm:$0xff] }
 0x252   : > { %v1750_v25 = vpop.permute.xlu1 %1749  ;;  %v1700_v9 = vadd.f32 %v1692_v41, %v5128_v3  ;;  %v1697_v5 = vadd.f32 %v1689_v62, %v5152_v56  ;;  %v1702_v3 = vadd.f32 %v1694_v14, %v5154_v42  ;;  %v1691_v30 = vmul.f32 %v2935_v32, %v1685_v45 }
 0x253   : > { %v1754_v16 = vadd.f32 %v1750_v25, %v1688_v13  ;;  %v1687_v39 = vadd.f32 %v1685_v45, %v1589_v59  ;;  %v1696_v20 = vmul.f32 %v5850_v52, %v1686_v0  ;;  %v2317_v51 = vmul.f32 %v5188_v58, %v5845_v46 }
 0x254   : > { %2333 = vrot.lane.b32.xlu1 %v2314_v34, %s3018_s4  ;;  %v1620_v18 = vpop.permute.xlu0 %1619  ;;  %v1699_v56 = vadd.f32 %v1691_v30, %v1633_v55  ;;  %v2412_v57 = vmul.f32 %v4977_v24, %v4933_v21  ;;  %v1693_v7 = vmul.f32 %v5851_v17, %v1685_v45  ;;  %v2409_v46 = vmul.f32 %v5197_v47, %v5852_v35 }
 0x255   : > { %v1637_v31 = vadd.f32 %v1620_v18, %v1539_v40  ;;  %2327 = vrot.lane.b32.xlu0 %v2311_v2, %s3018_s4  ;;  %v1704_v42 = vadd.f32 %v1696_v20, %v1638_v23  ;;  %v2414_v23 = vmul.f32 %v5038_v63, %v4933_v21  ;;  %v2416_v53 = vmul.f32 %v5146_v43, %v4933_v21 }
 0x256   : > { %v1774_v22 = vpop.permute.xlu1 %1773  ;;  %v1701_v0 = vadd.f32 %v1693_v7, %v1635_v37  ;;  %v2411_v37 = vmul.f32 %v5847_v36, %v5852_v35 }
 0x257   : > { %v1796_v38 = vadd.f32 %v1774_v22, %v1698_v11 }
 0x258   : > { %2337 = vrot.lane.b32.xlu1 %v2316_v27, %s3018_s4  ;;  %v1748_v49 = vpop.permute.xlu0 %1747  ;;  %v5853_v27 = vld [vmem:[#allocation35_spill] sm:$0xff] }
 0x259   : > { %v1753_v44 = vadd.f32 %v1748_v49, %v1687_v39  ;;  %2331 = vrot.lane.b32.xlu0 %v2313_v54, %s3018_s4  ;;  %v1695_v40 = vmul.f32 %v5853_v27, %v1685_v45  ;;  %v2413_v45 = vmul.f32 %v5172_v1, %v5852_v35 }
 0x25a   : > { %v1778_v29 = vpop.permute.xlu1 %1777 }
 0x25b   : > { %v1798_v26 = vadd.f32 %v1778_v29, %v1700_v9  ;;  %v1703_v11 = vadd.f32 %v1695_v40, %v1637_v31  ;;  %v2508_v31 = vmul.f32 %v5163_v10, %v4937_v8  ;;  %v2510_v29 = vmul.f32 %v4977_v24, %v4937_v8 }
 0x25c   : > { %2341 = vrot.lane.b32.xlu1 %v2318_v48, %s3018_s4  ;;  %v1772_v12 = vpop.permute.xlu0 %1771 }
 0x25d   : > { %v1795_v34 = vadd.f32 %v1772_v12, %v1697_v5  ;;  %2335 = vrot.lane.b32.xlu0 %v2315_v33, %s3018_s4  ;;  %v2512_v33 = vmul.f32 %v5038_v63, %v4937_v8 }
 0x25e   : > { %v1782_v28 = vpop.permute.xlu1 %1781 }
 0x25f   : > { %v1800_v60 = vadd.f32 %v1782_v28, %v1702_v3 }
 0x260   : > { %2427 = vrot.lane.b32.xlu1 %v2410_v6, %s3022_s22  ;;  %v1776_v13 = vpop.permute.xlu0 %1775 }
 0x261   : > { %v1797_v25 = vadd.f32 %v1776_v13, %v1699_v56  ;;  %2339 = vrot.lane.b32.xlu0 %v2317_v51, %s3018_s4  ;;  %s148_s4 = sand.u32 1, %s3007_s10  }
 0x262   : > { %v1786_v19 = vpop.permute.xlu1 %1785  ;;  %s2675_s5 = sshll.u32 %s148_s4, 6 }
 0x263   : > { %v1802_v61 = vadd.f32 %v1786_v19, %v1704_v42 }
 0x264   : > { %2431 = vrot.lane.b32.xlu1 %v2412_v57, %s3022_s22  ;;  %v1780_v50 = vpop.permute.xlu0 %1779 }
 0x265   : > { %v1799_v2 = vadd.f32 %v1780_v50, %v1701_v0  ;;  %2425 = vrot.lane.b32.xlu0 %v2409_v46, %s3022_s22 }
 0x266   : > { %v1848_v55 = vpop.permute.xlu1 %1847 }
 0x267   : > { %v1852_v59 = vadd.f32 %v1848_v55, %v1754_v16 }
 0x268   : > { %2435 = vrot.lane.b32.xlu1 %v2414_v23, %s3022_s22  ;;  %v1784_v18 = vpop.permute.xlu0 %1783 }
 0x269   : > { %v1801_v41 = vadd.f32 %v1784_v18, %v1703_v11  ;;  %2429 = vrot.lane.b32.xlu0 %v2411_v37, %s3022_s22  ;;  %v5855_v18 = vld [vmem:[#allocation10_spill] sm:$0xff] }
 0x26a   : > { %v1872_v22 = vpop.permute.xlu1 %1871  ;;  %v2108_v37 = vsub.f32 %v4977_v24, %v5855_v18 }
 0x26b   : > { %v1894_v54 = vadd.f32 %v1872_v22, %v1796_v38  ;;  %v2415_v38 = vmul.f32 %v5188_v58, %v5852_v35  ;;  %v5856_v22 = vld [vmem:[#allocation11_spill] sm:$0xff] }
 0x26c   : > { %2439 = vrot.lane.b32.xlu1 %v2416_v53, %s3022_s22  ;;  %v1846_v16 = vpop.permute.xlu0 %1845  ;;  %v2106_v53 = vsub.f32 %v5163_v10, %v5856_v22 }
 0x26d   : > { %v1851_v39 = vadd.f32 %v1846_v16, %v1753_v44  ;;  %2433 = vrot.lane.b32.xlu0 %v2413_v45, %s3022_s22 }
 0x26e   : > { %v1876_v48 = vpop.permute.xlu1 %1875 }
 0x26f   : > { %v1896_v9 = vadd.f32 %v1876_v48, %v1798_v26  ;;  %v5854_v26 = vld [vmem:[#allocation113_spill] sm:$0xff] }
 0x270   : > { %2525 = vrot.lane.b32.xlu1 %v2508_v31, %s3023_s23  ;;  %v1870_v21 = vpop.permute.xlu0 %1869  ;;  %v2507_v4 = vmul.f32 %v5197_v47, %v5854_v26  ;;  %v2509_v28 = vmul.f32 %v5847_v36, %v5854_v26  ;;  %v2511_v52 = vmul.f32 %v5172_v1, %v5854_v26  ;;  %v2116_v31 = vmul.f32 %v2108_v37, %v2108_v37 }
 0x271   : > { %v1893_v15 = vadd.f32 %v1870_v21, %v1795_v34  ;;  %2437 = vrot.lane.b32.xlu0 %v2415_v38, %s3022_s22  ;;  %v2514_v34 = vmul.f32 %v5146_v43, %v4937_v8  ;;  %v2513_v8 = vmul.f32 %v5188_v58, %v5854_v26  ;;  %v5860_v26 = vld [vmem:[#allocation9_spill] sm:$0xff]  ;;  %s5386_s22 = scalar_lea.vmem [#allocation5], %s2675_s5 }
 0x272   : > { %v1880_v49 = vpop.permute.xlu1 %1879  ;;  %s2595_s29 = sshll.u32 %s5386_s22, 4  ;;  %s5424_s29 = int_to_ptr.vmem [resolvable:$true] %s2595_s29 }
 0x273   : > { %v1898_v62 = vadd.f32 %v1880_v49, %v1800_v60  ;;  %s2951_s8 = scalar_lea.vmem %s5424_s29, 1024  ;;  %p2958_p13 = scmp.lt.s32.totalorder %s5424_s29, %s2956_s16 }
 0x274   : > { %2529 = vrot.lane.b32.xlu1 %v2510_v29, %s3023_s23  ;;  %v1874_v44 = vpop.permute.xlu0 %1873  ;;  %p2952_p9 = scmp.ne.s32.totalorder %s5424_s29, %s2951_s8  ;;  %p2959_p0 = scmp.lt.s32.totalorder %s2957_s17, %s2951_s8 }
 0x275   : > { %v1895_v5 = vadd.f32 %v1874_v44, %v1797_v25  ;;  %2523 = vrot.lane.b32.xlu0 %v2507_v4, %s3023_s23  ;;  %v2105_v4 = vsub.f32 %v5197_v47, %v5860_v26 }
 0x276   : > { %v1884_v14 = vpop.permute.xlu1 %1883  ;;  %p2953_p10 = pnand %p2952_p9, %p3081_p5  ;;  %p2960_p1 = por %p2959_p0, %p2958_p13 }
 0x277   : > { %v1900_v3 = vadd.f32 %v1884_v14, %v1802_v61  ;;  %v2129_v14 = vsel %vm220_vm4, %v2116_v31, 0.0 }
 0x278   : > { %2533 = vrot.lane.b32.xlu1 %v2512_v33, %s3023_s23  ;;  %v1878_v12 = vpop.permute.xlu0 %1877  ;;  %p2954_p12 = pneg %p2953_p10 }
 0x279   : > { %v1897_v32 = vadd.f32 %v1878_v12, %v1799_v2  ;;  %2527 = vrot.lane.b32.xlu0 %v2509_v28, %s3023_s23  ;;  %v5861_v12 = vld [vmem:[#allocation13_spill] sm:$0xff] }
 0x27a   : > { %v1946_v6 = vpop.permute.xlu1 %1945  ;;  %v2109_v28 = vsub.f32 %v5172_v1, %v5861_v12  ;;  %p2961_p2 = pnand %p2960_p1, %p2954_p12 }
 0x27b   : > { %v5273_v30 = vadd.f32 %v1946_v6, %v1852_v59 }
 0x27c   : > { %2537 = vrot.lane.b32.xlu1 %v2514_v34, %s3023_s23  ;;  %v1882_v60 = vpop.permute.xlu0 %1881 }
 0x27d   : > { %v1899_v51 = vadd.f32 %v1882_v60, %v1801_v41  ;;  %2531 = vrot.lane.b32.xlu0 %v2511_v52, %s3023_s23  ;;  %v5857_v41 = vld [vmem:[#allocation12_spill] sm:$0xff] }
 0x27e   : > { %v1970_v20 = vpop.permute.xlu1 %1969 }
 0x27f   : > { %v1992_v56 = vadd.f32 %v1970_v20, %v1894_v54  ;;  %v2110_v54 = vsub.f32 %v5038_v63, %v5857_v41  ;;  %v2113_v20 = vmul.f32 %v2105_v4, %v2105_v4 }
 0x280   : > { %v1944_v42 = vpop.permute.xlu0 %1943 }
 0x281   : > { %v5282_v19 = vadd.f32 %v1944_v42, %v1851_v39  ;;  %2535 = vrot.lane.b32.xlu0 %v2513_v8, %s3023_s23  ;;  %v2114_v39 = vmul.f32 %v2106_v53, %v2106_v53  ;;  %v2118_v38 = vmul.f32 %v2110_v54, %v2110_v54  ;;  %s2708_s23 = sshll.u32 %s3064_s13, 10  ;;  %s5430_s13 = scalar_lea.sflag [#allocation3], %s148_s4 }
 0x282   : > { %v1974_v13 = vpop.permute.xlu1 %1973  ;;  %s5422_s7 = scalar_lea.hbm %s5472_s2, %s2708_s23 }
 0x283   : > { %v1994_v57 = vadd.f32 %v1974_v13, %v1896_v9  ;;  %v5858_v9 = vld [vmem:[#allocation14_spill] sm:$0xff]  ;;  %v2128_v33 = vsel %vm220_vm4, %v2114_v39, 0.0  ;;  %v2117_v13 = vmul.f32 %v2109_v28, %v2109_v28 }
 0x284   : > { %v1968_v25 = vpop.permute.xlu0 %1967  ;;  %v2112_v21 = vsub.f32 %v5146_v43, %v5858_v9 }
 0x285   : > { %v1991_v7 = vadd.f32 %v1968_v25, %v1893_v15  ;;  %v5859_v15 = vld [vmem:[#allocation8_spill] sm:$0xff] }
 0x286   : > { %v1978_v17 = vpop.permute.xlu1 %1977 }
 0x287   : > { %v5285_v61 = vadd.f32 %v1978_v17, %v1898_v62  ;;  %v2107_v62 = vsub.f32 %v5847_v36, %v5859_v15 }
 0x288   : > { %v1972_v0 = vpop.permute.xlu0 %1971 }
 0x289   : > { %v1993_v35 = vadd.f32 %v1972_v0, %v1895_v5  ;;  %v2120_v5 = vmul.f32 %v2112_v21, %v2112_v21  ;;  %v2115_v52 = vmul.f32 %v2107_v62, %v2107_v62 }
 0x28a   : > { %v1982_v50 = vpop.permute.xlu1 %1981 }
 0x28b   : > { %v5287_v46 = vadd.f32 %v1982_v50, %v1900_v3  ;;  %v2131_v3 = vsel %vm220_vm4, %v2118_v38, 0.0  ;;  %v2122_v0 = vsel %vm220_vm4, %v2115_v52, 0.0  ;;  %v2121_v50 = vsel %vm220_vm4, %v2113_v20, 0.0 }
 0x28c   : > { %v1976_v55 = vpop.permute.xlu0 %1975  ;;  %v2123_v18 = vadd.f32 %v2122_v0, %v2121_v50 }
 0x28d   : > { %v1995_v2 = vadd.f32 %v1976_v55, %v1897_v32  ;;  %v2130_v32 = vadd.f32 %v2129_v14, %v2128_v33  ;;  %v2124_v55 = vsel %vm220_vm4, %v2117_v13, 0.0  ;;  %v2142_v33 = vstv %s2696_s3 }
 0x28e   : > { %v5289_v23 = vpop.permute.xlu1 %2043  ;;  %v2125_v53 = vadd.f32 %v2124_v55, %v2123_v18 }
 0x28f   : > { %v2132_v8 = vadd.f32 %v2131_v3, %v2130_v32 }
 0x290   : > { %v1980_v27 = vpop.permute.xlu0 %1979 }
 0x291   : > { %v5291_v59 = vadd.f32 %v1980_v27, %v1899_v51  ;;  %v2133_v51 = vsel %vm220_vm4, %v2120_v5, 0.0  ;;  %v2048_v5 = vadd.f32 %v5289_v23, %v5273_v30 }
 0x292   : > { %v2068_v40 = vpop.permute.xlu1 %2067  ;;  %v2134_v17 = vadd.f32 %v2133_v51, %v2132_v8 }
 0x293   : > { %v5293_v11 = vadd.f32 %v2068_v40, %v1992_v56  ;;  %v5862_v56 = vld [vmem:[#allocation15_spill] sm:$0xff] }
 0x294   : > { %v5301_v16 = vpop.permute.xlu0 %2041  ;;  %v2111_v42 = vsub.f32 %v5188_v58, %v5862_v56  ;;  %v2136_v37 = vmul.f32 -0.5, %v2134_v17 }
 0x295   : > { %v2047_v56 = vadd.f32 %v5301_v16, %v5282_v19  ;;  %v3024_v16 = vmov 0.0  }
 0x296   : > { %v2072_v45 = vpop.permute.xlu1 %2071 }
 0x297   : > { %v5303_v48 = vadd.f32 %v2072_v45, %v1994_v57  ;;  %v2139_v45 = vmul.f32 1.442695, %v2136_v37 }
 0x298   : > { %v2066_v49 = vpop.permute.xlu0 %2065 }
 0x299   : > { %v5311_v44 = vadd.f32 %v2066_v49, %v1991_v7  ;;  %2865 = vpow2.f32 %v2139_v45 }
 0x29a   : > { %v5307_v29 = vpop.permute.xlu1 %2205 }
 0x29c   : > { %v2070_v6 = vpop.permute.xlu0 %2069 }
 0x29d   : > { %v5320_v60 = vadd.f32 %v2070_v6, %v1993_v35  ;;  %v2119_v35 = vmul.f32 %v2111_v42, %v2111_v42 }
 0x29e   : > { %v2304_v34 = vpop.permute.xlu1 %2303 }
 0x29f   : > { %v2126_v22 = vsel %vm220_vm4, %v2119_v35, 0.0 }
 0x2a0   : > { %v2074_v57 = vpop.permute.xlu0 %2073 }
 0x2a1   : > { %v5325_v7 = vadd.f32 %v2074_v57, %v1995_v2  ;;  %v2127_v2 = vadd.f32 %v2126_v22, %v2125_v53 }
 0x2a2   : > { %v2402_v25 = vpop.permute.xlu1 %2401 }
 0x2a3   : > { %v2135_v9 = vmul.f32 -0.5, %v2127_v2 }
 0x2a4   : > { %v2208_v27 = vpop.permute.xlu0 %2207 }
 0x2a5   : > { %v2137_v49 = vmul.f32 1.442695, %v2135_v9 }
 0x2a6   : > { %v2500_v40 = vpop.permute.xlu1 %2499  ;;  %v2866_v14 = vpop.eup %2865 }
 0x2a7   : > { %2867 = vpow2.f32 %v2137_v49  ;;  %v2144_v28 = vmul.f32 %v2866_v14, %v2142_v33 }
 0x2a8   : > { %v2306_v41 = vpop.permute.xlu0 %2305 }
 0x2a9   : > { %v2146_v6 = vadd.f32 %v2144_v28, %v2048_v5  ;;  %v2150_v14 = vmul.f32 %v4977_v24, %v2144_v28 }
 0x2aa   : > { %v5331_v54 = vpop.permute.xlu1 %2075 }
 0x2ab   : > { %v2212_v20 = vadd.f32 %v2208_v27, %v2146_v6  ;;  %v2094_v6 = vadd.f32 %v5331_v54, %v5285_v61 }
 0x2ac   : > { %v2404_v31 = vpop.permute.xlu0 %2403 }
 0x2ad   : > { %v2310_v42 = vadd.f32 %v2306_v41, %v2212_v20  ;;  %v2158_v20 = vadd.f32 %v2150_v14, %v5303_v48 }
 0x2ae   : > { %v5333_v39 = vpop.permute.xlu1 %2079 }
 0x2af   : > { %v2408_v30 = vadd.f32 %v2404_v31, %v2310_v42  ;;  %v2152_v42 = vmul.f32 %v5038_v63, %v2144_v28 }
 0x2b0   : > { %v2502_v21 = vpop.permute.xlu0 %2501 }
 0x2b1   : > { %v2506_v17 = vadd.f32 %v2502_v21, %v2408_v30  ;;  %v2160_v61 = vadd.f32 %v2152_v42, %v2094_v6 }
 0x2b2   : > { %v2232_v38 = vpop.permute.xlu1 %2231 }
 0x2b3   : > { %vm2556_vm5 = vcmp.eq.f32.partialorder %v2506_v17, 0.0 }
 0x2b4   : > { %v5335_v15 = vpop.permute.xlu0 %2077  ;;  %v2868_v51 = vpop.eup %2867  ;;  %v2702_v37 = vsel %vm2556_vm5, 1.0, %v3024_v16 }
 0x2b5   : > { %v5353_v57 = vmul.f32 %v2868_v51, %v2142_v33  ;;  %v2562_v45 = vadd.f32 %v2702_v37, %v2506_v17 }
 0x2b6   : > { %v2236_v62 = vpop.permute.xlu1 %2235 }
 0x2b7   : > { %v2145_v23 = vadd.f32 %v5353_v57, %v2047_v56  ;;  %2869 = vrcp.f32 %v2562_v45  ;;  %v2256_v56 = vadd.f32 %v2236_v62, %v2158_v20  ;;  %v2154_v62 = vmul.f32 %v5146_v43, %v2144_v28 }
 0x2b8   : > { %v5337_v26 = vpop.permute.xlu0 %2229 }
 0x2b9   : > { %v2211_v35 = vadd.f32 %v5307_v29, %v2145_v23  ;;  %v2096_v23 = vadd.f32 %v5333_v39, %v5287_v46 }
 0x2ba   : > { %v5339_v4 = vpop.permute.xlu1 %2239 }
 0x2bb   : > { %v2309_v55 = vadd.f32 %v2304_v34, %v2211_v35  ;;  %v2148_v34 = vmul.f32 %v5163_v10, %v2144_v28  ;;  %v2147_v10 = vmul.f32 %v5197_v47, %v5353_v57  ;;  %v2149_v47 = vmul.f32 %v5847_v36, %v5353_v57 }
 0x2bc   : > { %v5343_v3 = vpop.permute.xlu0 %2233  ;;  %v2258_v17 = vadd.f32 %v5339_v4, %v2160_v61  ;;  %v2162_v46 = vadd.f32 %v2154_v62, %v2096_v23 }
 0x2bd   : > { %v2407_v19 = vadd.f32 %v2402_v25, %v2309_v55  ;;  %v2156_v49 = vadd.f32 %v2148_v34, %v5293_v11  ;;  %v2155_v24 = vadd.f32 %v2147_v10, %v5311_v44  ;;  %v2157_v55 = vadd.f32 %v2149_v47, %v5320_v60 }
 0x2be   : > { %v5345_v12 = vpop.permute.xlu1 %2243 }
 0x2bf   : > { %v2505_v22 = vadd.f32 %v2500_v40, %v2407_v19  ;;  %v2254_v40 = vadd.f32 %v2232_v38, %v2156_v49  ;;  %v2253_v63 = vadd.f32 %v5337_v26, %v2155_v24  ;;  %v2255_v36 = vadd.f32 %v5343_v3, %v2157_v55 }
 0x2c0   : > { %v5347_v32 = vpop.permute.xlu0 %2237  ;;  %v2151_v26 = vmul.f32 %v5172_v1, %v5353_v57  ;;  %v2260_v4 = vadd.f32 %v5345_v12, %v2162_v46 }
 0x2c1   : > { %vm2555_vm6 = vcmp.eq.f32.partialorder %v2505_v22, 0.0 }
 0x2c2   : > { %v2330_v52 = vpop.permute.xlu1 %2329  ;;  %v2701_v29 = vsel %vm2555_vm6, 1.0, %v3024_v16 }
 0x2c3   : > { %v2561_v25 = vadd.f32 %v2701_v29, %v2505_v22  ;;  %v2352_v51 = vadd.f32 %v2330_v52, %v2254_v40 }
 0x2c4   : > { %v5351_v8 = vpop.permute.xlu0 %2241  ;;  %v2870_v52 = vpop.eup %2869 }
 0x2c5   : > { %2871 = vrcp.f32 %v2561_v25 }
 0x2c6   : > { %v2334_v13 = vpop.permute.xlu1 %2333 }
 0x2c7   : > { %v2354_v54 = vadd.f32 %v2334_v13, %v2256_v56 }
 0x2c8   : > { %v2328_v0 = vpop.permute.xlu0 %2327 }
 0x2c9   : > { %v2351_v39 = vadd.f32 %v2328_v0, %v2253_v63  ;;  %v2095_v0 = vadd.f32 %v5335_v15, %v5291_v59  ;;  %v2153_v59 = vmul.f32 %v5188_v58, %v5353_v57 }
 0x2ca   : > { %v2338_v50 = vpop.permute.xlu1 %2337 }
 0x2cb   : > { %v2356_v13 = vadd.f32 %v2338_v50, %v2258_v17  ;;  %v2159_v50 = vadd.f32 %v2151_v26, %v5325_v7 }
 0x2cc   : > { %v5357_v27 = vpop.permute.xlu0 %2331 }
 0x2cd   : > { %v2353_v45 = vadd.f32 %v5357_v27, %v2255_v36  ;;  %v2257_v29 = vadd.f32 %v5347_v32, %v2159_v50 }
 0x2ce   : > { %v5359_v18 = vpop.permute.xlu1 %2341 }
 0x2cf   : > { %v2358_v3 = vadd.f32 %v5359_v18, %v2260_v4  ;;  %v2161_v18 = vadd.f32 %v2153_v59, %v2095_v0 }
 0x2d0   : > { %v5361_v53 = vpop.permute.xlu0 %2335 }
 0x2d1   : > { %v2355_v25 = vadd.f32 %v5361_v53, %v2257_v29  ;;  %v2259_v32 = vadd.f32 %v5351_v8, %v2161_v18 }
 0x2d2   : > { %v2428_v41 = vpop.permute.xlu1 %2427  ;;  %v2872_v12 = vpop.eup %2871 }
 0x2d3   : > { %v2450_v11 = vadd.f32 %v2428_v41, %v2352_v51 }
 0x2d4   : > { %v5363_v2 = vpop.permute.xlu0 %2339 }
 0x2d6   : > { %v2432_v31 = vpop.permute.xlu1 %2431 }
 0x2d7   : > { %v2452_v35 = vadd.f32 %v2432_v31, %v2354_v54 }
 0x2d8   : > { %v2426_v9 = vpop.permute.xlu0 %2425 }
 0x2d9   : > { %v2449_v60 = vadd.f32 %v2426_v9, %v2351_v39 }
 0x2da   : > { %v2436_v21 = vpop.permute.xlu1 %2435 }
 0x2db   : > { %v2454_v28 = vadd.f32 %v2436_v21, %v2356_v13 }
 0x2dc   : > { %v2430_v33 = vpop.permute.xlu0 %2429 }
 0x2dd   : > { %v2451_v15 = vadd.f32 %v2430_v33, %v2353_v45 }
 0x2de   : > { %v2440_v5 = vpop.permute.xlu1 %2439 }
 0x2df   : > { %v2456_v7 = vadd.f32 %v2440_v5, %v2358_v3  ;;  %v2357_v5 = vadd.f32 %v5363_v2, %v2259_v32 }
 0x2e0   : > { %v2434_v38 = vpop.permute.xlu0 %2433 }
 0x2e1   : > { %v2453_v57 = vadd.f32 %v2434_v38, %v2355_v25 }
 0x2e2   : > { %v2526_v30 = vpop.permute.xlu1 %2525 }
 0x2e3   : > { %v2548_v48 = vadd.f32 %v2526_v30, %v2450_v11 }
 0x2e4   : > { %v2438_v19 = vpop.permute.xlu0 %2437 }
 0x2e5   : > { %v2566_v44 = vmul.f32 %v2870_v52, %v2548_v48  ;;  %v2455_v6 = vadd.f32 %v2438_v19, %v2357_v5 }
 0x2e6   : > { %v2530_v16 = vpop.permute.xlu1 %2529 }
 0x2e7   : > { %2574 = vst.msk [vmem:[%s5386_s22 + $0x8] sm:$0xff] %vm220_vm4, %v2566_v44  ;;  %v2550_v43 = vadd.f32 %v2530_v16, %v2452_v35 }
 0x2e8   : > { %v2524_v22 = vpop.permute.xlu0 %2523 }
 0x2e9   : > { %v2568_v37 = vmul.f32 %v2870_v52, %v2550_v43  ;;  %v2547_v31 = vadd.f32 %v2524_v22, %v2449_v60 }
 0x2ea   : > { %v2534_v41 = vpop.permute.xlu1 %2533 }
 0x2eb   : > { %2576 = vst.msk [vmem:[%s5386_s22 + $0x18] sm:$0xff] %vm220_vm4, %v2568_v37  ;;  %v2552_v1 = vadd.f32 %v2534_v41, %v2454_v28  ;;  %v2564_v34 = vmul.f32 %v2872_v12, %v2547_v31 }
 0x2ec   : > { %v2528_v27 = vpop.permute.xlu0 %2527 }
 0x2ed   : > { %v2570_v9 = vmul.f32 %v2870_v52, %v2552_v1  ;;  %2573 = vst.msk [vmem:[%s5386_s22] sm:$0xff] %vm220_vm4, %v2564_v34  ;;  %v2549_v49 = vadd.f32 %v2528_v27, %v2451_v15 }
 0x2ee   : > { %v2538_v21 = vpop.permute.xlu1 %2537 }
 0x2ef   : > { %2578 = vst.msk [vmem:[%s5386_s22 + $0x28] sm:$0xff] %vm220_vm4, %v2570_v9  ;;  %v2554_v58 = vadd.f32 %v2538_v21, %v2456_v7  ;;  %v2567_v40 = vmul.f32 %v2872_v12, %v2549_v49 }
 0x2f0   : > { %v2532_v33 = vpop.permute.xlu0 %2531 }
 0x2f1   : > { %v2572_v14 = vmul.f32 %v2870_v52, %v2554_v58  ;;  %2575 = vst.msk [vmem:[%s5386_s22 + $0x10] sm:$0xff] %vm220_vm4, %v2567_v40  ;;  %v2551_v53 = vadd.f32 %v2532_v33, %v2453_v57 }
 0x2f3   : > { %2580 = vst.msk [vmem:[%s5386_s22 + $0x38] sm:$0xff] %vm220_vm4, %v2572_v14  ;;  %v2569_v20 = vmul.f32 %v2872_v12, %v2551_v53 }
 0x2f4   : > { %v2536_v51 = vpop.permute.xlu0 %2535 }
 0x2f5   : > { %2577 = vst.msk [vmem:[%s5386_s22 + $0x20] sm:$0xff] %vm220_vm4, %v2569_v20  ;;  %v2553_v8 = vadd.f32 %v2536_v51, %v2455_v6 }
 0x2f7   : > { %v2571_v2 = vmul.f32 %v2872_v12, %v2553_v8 }
 0x2f9   : > { %2579 = vst.msk [vmem:[%s5386_s22 + $0x30] sm:$0xff] %vm220_vm4, %v2571_v2 }
 0x2fa   : > { %2964 = shalt.err (!%p2961_p2)
}
 0x2fb   : > { %s2965_s21 = scalar_lea.hbm %s5422_s7, 1024  ;;  %s2969_s26 = scalar_lea.hbm %s5472_s2, 2048 }
 0x2fc   : > { %p2966_p3 = scmp.ne.s32.totalorder %s5422_s7, %s2965_s21  ;;  %p2970_p8 = scmp.lt.s32.totalorder %s5422_s7, %s5472_s2 }
 0x2fd   : > { %p2971_p11 = scmp.lt.s32.totalorder %s2969_s26, %s2965_s21 }
 0x2fe   : > { %p2967_p4 = pnand %p2966_p3, %p3081_p5 }
 0x2ff   : > { %p2972_p9 = por %p2971_p11, %p2970_p8 }
 0x300   : > { %p2968_p7 = pneg %p2967_p4 }
 0x302   : > { %p2973_p10 = pnand %p2972_p9, %p2968_p7 }
 0x304   : > { %2976 = shalt.err (!%p2973_p10)
}
 0x305   : > { %s3026_s3 = smov 128   ;;  %s3027_s4 = smov 8  }
 0x306   : > { %2714 = dma.vmem_to_hbm [thread:$0]  (%p3081_p5), %s5424_s29, 1024, %s5422_s7, %s5430_s13, %s3026_s3, %s3026_s3, %s3027_s4  }
 0x307 PF: > { %p2726_p12 = scmp.ge.s32.totalorder %s3015_s12, 2  ;;  %s2610_s5 = sand.u32 1, %s3003_s9  }
 0x308   : > { %s2611_s22 = scalar_lea.sflag [#allocation3], %s2610_s5 }
 0x309   : > { %p2721_p13 = pnand %p2726_p12, %p3085_p6 }
 0x30b   : > { %p2722_p0 = pneg %p2721_p13 }
 0x30d   : > { %2998 = dma.done.wait (%p2722_p0), %s2611_s22, 1024  }
 0x30e   : > { %3000 = vsyncadd (%p2722_p0), %s2611_s22, 4294966272  ;;  %p13_p1 = scmp.ge.s32.totalorder %s3068_s15, 4   ;;  %s5863_s9 = smov %s3007_s10 }
 0x30f   : > { %s5864_s10 = smov %s3011_s11  ;;  %s5865_s11 = smov %s3079_s18 }
 0x310   : > { %s5866_s12 = smov %s3068_s15  ;;  %15 = sbr.rel (!%p13_p1) target bundleno = 4 (0x4), region = 68 }
 0x315   :  { %2616 = vsyncpa [#allocation3], 1 }
 0x316   :  { %2618 = vsyncpa [#allocation3 + $0x1], 1 }
 0x317   :  { %2619 = vsyncpa [#allocation4], 1 }
 0x318   :  { %2621 = vsyncpa [#allocation4 + $0x1], 1 }

</bundles_post_ra>
